<compile_context>
chip_gen: v7x
topology: tpu7x:2x2x1
jax: 0.10.0
libtpu: 0.0.40
codegen_flags: <defaults>
</compile_context>

<pallas_src>
import functools

import jax
import jax.numpy as jnp
from jax.experimental import pallas as pl
from jax.experimental.pallas import tpu as pltpu


_TARGET_BLOCK_BYTES = 12 << 20   # aim for ~8-16 MiB x blocks (post-padding)
_VMEM_LIMIT_BYTES = 48 << 20     # safe on v7x (64 MiB phys), ample on v5e/v6e


def _round_up(x, m):
    return ((x + m - 1) // m) * m


# ---------------------------------------------------------------------------
# Path A: batch-coalesced, single parallel grid axis, no reduction accumulator.
# ---------------------------------------------------------------------------
def _regressor_kernel_batched(x_ref, w_ref, b_ref, out_ref):
    # x_ref:   (b_tile, C, HW)  input dtype (f32 or bf16)
    # w_ref:   (C, 9) f32       fused (pose|trans) weights, pre-scaled by 1/HW
    # b_ref:   (1, 9) f32       fused bias
    # out_ref: (b_tile, 1, 9) f32
    pooled = jnp.sum(x_ref[...], axis=2, dtype=jnp.float32)          # f32 accumulate
    y = jnp.dot(pooled, w_ref[...], preferred_element_type=jnp.float32) + b_ref[...]
    out_ref[...] = y.reshape(out_ref.shape).astype(out_ref.dtype)


# ---------------------------------------------------------------------------
# Path B: C-tiled reduction fallback (only for very large H*W).
# ---------------------------------------------------------------------------
def _regressor_kernel_ctiled(x_ref, w_ref, b_ref, out_ref, acc_ref, *, c_tile):
    # x_ref:   (1, c_tile, HW)   channel tile of one batch element
    # w_ref:   (C, 9) f32        VMEM-resident fused weights (constant index_map)
    # b_ref:   (1, 9) f32
    # out_ref: (1, 1, 9) f32
    # acc_ref: (1, 9) f32        VMEM accumulator, persists over the C axis
    c = pl.program_id(1)

    @pl.when(c == 0)
    def _():
        acc_ref[...] = jnp.zeros_like(acc_ref)

    pooled = jnp.sum(x_ref[...], axis=2, dtype=jnp.float32)          # (1, c_tile)
    off = pl.multiple_of(c * c_tile, c_tile)
    w_blk = w_ref[pl.ds(off, c_tile), :]                             # resident slice
    acc_ref[...] += jnp.dot(pooled, w_blk, preferred_element_type=jnp.float32)

    @pl.when(c == pl.num_programs(1) - 1)
    def _():
        out_ref[...] = (acc_ref[...] + b_ref[...]).reshape(out_ref.shape).astype(out_ref.dtype)


# ---------------------------------------------------------------------------
# Tile-size selection (lane/sublane-padding aware).
# ---------------------------------------------------------------------------
def _padded_slab_bytes(C, HW, itemsize):
    """VMEM footprint of one (1, C, HW) slab after TPU layout padding."""
    lane = _round_up(HW, 128)                         # last dim pads to 128 lanes
    sub_mult = 8 * max(1, 4 // itemsize)              # bf16 packs 2 rows/sublane
    c_pad = _round_up(C, sub_mult)
    return c_pad * lane * itemsize


def _choose_b_tile(B, per_batch_bytes, target_bytes=_TARGET_BLOCK_BYTES):
    """Largest divisor of B so a (b_tile, C, HW) block stays near target_bytes,
    while keeping >= 2 parallel grid blocks when B >= 2 (v7x dual-TC)."""
    cap = max(1, target_bytes // max(1, per_batch_bytes))
    if B >= 2:
        cap = min(cap, B // 2)
    cap = max(1, cap)
    best = 1
    for d in range(1, B + 1):
        if B % d == 0 and d <= cap:
            best = d
    return best


def _choose_c_tile(C, HW, itemsize, target_bytes=_TARGET_BLOCK_BYTES):
    """Largest sublane-aligned divisor of C whose padded (1, c_tile, HW) block
    stays near target_bytes (fallback path only)."""
    per_chan = _round_up(HW, 128) * itemsize
    cap = max(8, target_bytes // per_chan)
    for d in range(min(C, int(cap)), 0, -1):
        if C % d == 0 and (d % 8 == 0 or d == C):
            return d
    return C


# ---------------------------------------------------------------------------
# Forward wrapper.
# ---------------------------------------------------------------------------
def object_regressor_forward(x_nchw, w_pose, b_pose, w_trans, b_trans,
                             *, force_c_tiled=False, c_tile=None):
    """x_nchw: (B, C, H, W). Weights in PyTorch Linear layout (out, in)."""
    B, C, H, W = x_nchw.shape
    HW = H * W
    itemsize = jnp.dtype(x_nchw.dtype).itemsize

    # Free contiguous NCHW -> (B, C, HW) reshape; no HBM transpose.
    x_bchw = x_nchw.reshape(B, C, HW)

    # Fuse both heads into one (C, 9) matrix; fold the 1/HW mean-pool scale in.
    inv_hw = 1.0 / float(HW)
    w_fused = (jnp.concatenate([w_pose.T, w_trans.T], axis=1) * inv_hw).astype(jnp.float32)
    b_fused = jnp.concatenate([b_pose, b_trans], axis=0)[None, :].astype(jnp.float32)

    cost = pl.CostEstimate(
        flops=B * C * HW + 2 * B * C * 9,
        transcendentals=0,
        bytes_accessed=itemsize * B * C * HW + 4 * (C * 9 + 9 + B * 9),
    )

    per_batch = _padded_slab_bytes(C, HW, itemsize)
    use_batched = (not force_c_tiled) and per_batch <= (16 << 20)

    if use_batched:
        b_tile = _choose_b_tile(B, per_batch)
        num_b = B // b_tile
        # TODO(synk): when B == 1 on v7x, split C into two parallel partial-sum
        # blocks combined in the wrapper so both TensorCores are used.
        out = pl.pallas_call(
            _regressor_kernel_batched,
            out_shape=jax.ShapeDtypeStruct((B, 1, 9), jnp.float32),
            grid_spec=pltpu.PrefetchScalarGridSpec(
                num_scalar_prefetch=0,
                grid=(num_b,),
                in_specs=[
                    pl.BlockSpec((b_tile, C, HW), lambda i: (i, 0, 0)),
                    pl.BlockSpec((C, 9), lambda i: (0, 0)),   # resident fused weights
                    pl.BlockSpec((1, 9), lambda i: (0, 0)),   # resident fused bias
                ],
                out_specs=pl.BlockSpec((b_tile, 1, 9), lambda i: (i, 0, 0)),
            ),
            compiler_params=pltpu.CompilerParams(
                dimension_semantics=("parallel",),
                vmem_limit_bytes=_VMEM_LIMIT_BYTES,
            ),
            cost_estimate=cost,
        )(x_bchw, w_fused, b_fused)
    else:
        if c_tile is None:
            c_tile = _choose_c_tile(C, HW, itemsize)
        assert C % c_tile == 0 and (c_tile % 8 == 0 or c_tile == C)
        num_c = C // c_tile
        kernel = functools.partial(_regressor_kernel_ctiled, c_tile=c_tile)
        out = pl.pallas_call(
            kernel,
            out_shape=jax.ShapeDtypeStruct((B, 1, 9), jnp.float32),
            grid_spec=pltpu.PrefetchScalarGridSpec(
                num_scalar_prefetch=0,
                grid=(B, num_c),  # reduction (C tiles) last
                in_specs=[
                    pl.BlockSpec((1, c_tile, HW), lambda b, c: (b, c, 0)),
                    pl.BlockSpec((C, 9), lambda b, c: (0, 0)),  # resident weights
                    pl.BlockSpec((1, 9), lambda b, c: (0, 0)),
                ],
                out_specs=pl.BlockSpec((1, 1, 9), lambda b, c: (b, 0, 0)),
                scratch_shapes=[pltpu.VMEM((1, 9), jnp.float32)],
            ),
            compiler_params=pltpu.CompilerParams(
                dimension_semantics=("parallel", "arbitrary"),
                vmem_limit_bytes=_VMEM_LIMIT_BYTES,
            ),
            cost_estimate=cost,
        )(x_bchw, w_fused, b_fused)

    pred_obj_pose = out[:, :, :6]    # (B, 1, 6)
    pred_obj_trans = out[:, 0, 6:9]  # (B, 3)
    return pred_obj_pose, pred_obj_trans


if __name__ == "__main__":
    key = jax.random.PRNGKey(0)
    k_x, k_wp, k_bp, k_wt, k_bt = jax.random.split(key, 5)

    B, C, H, W = 2, 2048, 8, 8
    x = jax.random.normal(k_x, (B, C, H, W), dtype=jnp.float32)

    # Deterministic synthetic parameters (PyTorch Linear layout: (out, in)).
    w_pose = 0.02 * jax.random.normal(k_wp, (6, 2048), dtype=jnp.float32)
    b_pose = 0.01 * jax.random.normal(k_bp, (6,), dtype=jnp.float32)
    w_trans = 0.02 * jax.random.normal(k_wt, (3, 2048), dtype=jnp.float32)
    b_trans = 0.01 * jax.random.normal(k_bt, (3,), dtype=jnp.float32)

    # Plain-JAX reference.
    pooled_ref = jnp.mean(x, axis=(2, 3))
    pose_ref = (pooled_ref @ w_pose.T + b_pose).reshape(B, -1, 6)
    trans_ref = pooled_ref @ w_trans.T + b_trans

    # 1) Batch-coalesced fast path (no reduction axis, no accumulator).
    pred_pose, pred_trans = object_regressor_forward(
        x, w_pose, b_pose, w_trans, b_trans
    )
    jax.block_until_ready((pred_pose, pred_trans))
    assert pred_pose.shape == (B, 1, 6) and pred_trans.shape == (B, 3)
    assert jnp.allclose(pred_pose, pose_ref, atol=2e-4, rtol=2e-4)
    assert jnp.allclose(pred_trans, trans_ref, atol=2e-4, rtol=2e-4)

    # 2) Forced C-tiled fallback: exercises the multi-step reduction grid,
    #    the pl.when init/finalize accumulator and the resident-weight slicing.
    pred_pose2, pred_trans2 = object_regressor_forward(
        x, w_pose, b_pose, w_trans, b_trans, force_c_tiled=True, c_tile=256
    )
    jax.block_until_ready((pred_pose2, pred_trans2))
    assert jnp.allclose(pred_pose2, pose_ref, atol=2e-4, rtol=2e-4)
    assert jnp.allclose(pred_trans2, trans_ref, atol=2e-4, rtol=2e-4)

    # 3) bf16 input with explicit f32 accumulation in-kernel (halves HBM traffic).
    x_bf = x.astype(jnp.bfloat16)
    pooled_bf_ref = jnp.mean(x_bf.astype(jnp.float32), axis=(2, 3))
    pose_bf_ref = (pooled_bf_ref @ w_pose.T + b_pose).reshape(B, -1, 6)
    trans_bf_ref = pooled_bf_ref @ w_trans.T + b_trans
    pred_pose3, pred_trans3 = object_regressor_forward(
        x_bf, w_pose, b_pose, w_trans, b_trans
    )
    jax.block_until_ready((pred_pose3, pred_trans3))
    assert jnp.allclose(pred_pose3, pose_bf_ref, atol=2e-3, rtol=2e-3)
    assert jnp.allclose(pred_trans3, trans_bf_ref, atol=2e-3, rtol=2e-3)

    print("KERNEL_OK")
</pallas_src>

<mosaic_0001>
module attributes {stable_mosaic.version = 11 : i64} {
  func.func @_regressor_kernel_batched(%arg0: i32, %arg1: memref<1x2048x64xf32, #tpu.memory_space<vmem>>, %arg2: memref<2048x9xf32, #tpu.memory_space<vmem>>, %arg3: memref<1x9xf32, #tpu.memory_space<vmem>>, %arg4: memref<1x1x9xf32, #tpu.memory_space<vmem>>) attributes {dimension_semantics = [#tpu.dimension_semantics<parallel>], iteration_bounds = array<i64: 2>, scalar_prefetch = 0 : i64, scratch_operands = 0 : i64, tpu.core_type = #tpu.core_type<tc>, window_params = [{transform_indices = @transform_0, window_bounds = array<i64: 1, 2048, 64>}, {pipeline_mode = #tpu.pipeline_mode<synchronous>, transform_indices = @transform_1, window_bounds = array<i64: 2048, 9>}, {pipeline_mode = #tpu.pipeline_mode<synchronous>, transform_indices = @transform_2, window_bounds = array<i64: 1, 9>}, {transform_indices = @transform_3, window_bounds = array<i64: 1, 1, 9>}]} {
    %c0 = arith.constant 0 : index
    %c0_0 = arith.constant 0 : index
    %c0_1 = arith.constant 0 : index
    %0 = vector.load %arg1[%c0, %c0_0, %c0_1] : memref<1x2048x64xf32, #tpu.memory_space<vmem>>, vector<1x2048x64xf32>
    %cst = arith.constant dense<0.000000e+00> : vector<1x2048xf32>
    %1 = vector.multi_reduction <add>, %0, %cst [2] : vector<1x2048x64xf32> to vector<1x2048xf32>
    %c0_2 = arith.constant 0 : index
    %c0_3 = arith.constant 0 : index
    %2 = vector.load %arg2[%c0_2, %c0_3] : memref<2048x9xf32, #tpu.memory_space<vmem>>, vector<2048x9xf32>
    %cst_4 = arith.constant dense<0.000000e+00> : vector<1x9xf32>
    %3 = tpu.matmul %1, %2, %cst_4 {dimension_numbers = #tpu.dot_dimension_numbers<[1], [0], [0], [1], [0, 0, 1, 1], [], []>} : vector<1x2048xf32>, vector<2048x9xf32>, vector<1x9xf32> -> vector<1x9xf32>
    %c0_5 = arith.constant 0 : index
    %c0_6 = arith.constant 0 : index
    %4 = vector.load %arg3[%c0_5, %c0_6] : memref<1x9xf32, #tpu.memory_space<vmem>>, vector<1x9xf32>
    %5 = arith.addf %3, %4 : vector<1x9xf32>
    %6 = vector.shape_cast %5 : vector<1x9xf32> to vector<1x1x9xf32>
    %c0_7 = arith.constant 0 : index
    %c0_8 = arith.constant 0 : index
    %c0_9 = arith.constant 0 : index
    %7 = vector.load %arg4[%c0_7, %c0_8, %c0_9] : memref<1x1x9xf32, #tpu.memory_space<vmem>>, vector<1x1x9xf32>
    tpu.vector_store %arg4[%c0_7, %c0_8, %c0_9], %6 {strides = array<i32>} : memref<1x1x9xf32, #tpu.memory_space<vmem>>, vector<1x1x9xf32>,
    return
  }
  func.func @transform_0(%arg0: i32) -> (i32, i32, i32) {
    %c0_i32 = arith.constant 0 : i32
    %c0_i32_0 = arith.constant 0 : i32
    %c0_i32_1 = arith.constant 0 : i32
    return %arg0, %c0_i32, %c0_i32_0 : i32, i32, i32
  }
  func.func @transform_1(%arg0: i32) -> (i32, i32) {
    %c0_i32 = arith.constant 0 : i32
    %c0_i32_0 = arith.constant 0 : i32
    %c0_i32_1 = arith.constant 0 : i32
    return %c0_i32, %c0_i32_0 : i32, i32
  }
  func.func @transform_2(%arg0: i32) -> (i32, i32) {
    %c0_i32 = arith.constant 0 : i32
    %c0_i32_0 = arith.constant 0 : i32
    %c0_i32_1 = arith.constant 0 : i32
    return %c0_i32, %c0_i32_0 : i32, i32
  }
  func.func @transform_3(%arg0: i32) -> (i32, i32, i32) {
    %c0_i32 = arith.constant 0 : i32
    %c0_i32_0 = arith.constant 0 : i32
    %c0_i32_1 = arith.constant 0 : i32
    return %arg0, %c0_i32, %c0_i32_0 : i32, i32, i32
  }
}

</mosaic_0001>

<bundles_post_ra>
// kernel: tpu_custom_call.1
= control target key start
LH: loop header
LB: loop body
LE: loop exit
PB: predicated region body
PF: predicated region fallthrough
CT: control target
= control target key end

     0   :  { %8 = vsyncpa [#allocation3], 0  ;;  %s6660_s0 = inlined_call_operand.vmem [shape: f32[2,2048,64], index: 0, kind: input, shape index: {}]   ;;  %s6661_s1 = inlined_call_operand.vmem [shape: f32[2048,9], index: 1, kind: input, shape index: {}]   ;;  %s6662_s2 = inlined_call_operand.vmem [shape: f32[1,9], index: 2, kind: input, shape index: {}]   ;;  %s6663_s3 = inlined_call_operand.hbm [shape: f32[2,1,9], index: 3, kind: output, shape index: {}]  }
   0x1   :  { %10 = vsyncpa [#allocation3 + $0x1], 0  ;;  %s4318_s12 = smov 0   ;;  %s4320_s13 = smov 0  }
   0x2   :  { %s4322_s14 = smov 0   ;;  %s4324_s15 = smov 0  }
   0x3 LB: > { %s4339_s16 = sadd.s32 4294967295, %s4295_s15   ;;  %s3648_s17 = sadd.s32 4294967294, %s4295_s15   ;;  %s4295_s15 = sphi %s4324_s15, %s6669_s15   ;;  %s4291_s14 = sphi %s4322_s14, %s6668_s14   ;;  %s4287_s13 = sphi %s4320_s13, %s6667_s13   ;;  %s4283_s12 = sphi %s4318_s12, %s6666_s12  }
   0x4   : > { %s4343_s18 = sadd.s32 1, %s4295_s15   ;;  %s91_s19 = sadd.s32 1, %s4291_s14 }
   0x5   : > { %s88_s20 = ssub.s32 %s4295_s15, %s4343_s18  ;;  %p101_p0 = scmp.ne.s32.totalorder %s4291_s14, %s4287_s13 }
   0x6   : > { %p89_p1 = scmp.eq.s32.totalorder %s88_s20, 0  ;;  %p102_p2 = scmp.eq.s32.totalorder %s4339_s16, 1 }
   0x7   : > { %p107_p3 = scmp.ne.s32.totalorder %s4287_s13, %s4283_s12  ;;  %p108_p4 = scmp.eq.s32.totalorder %s3648_s17, 1 }
   0x8   : > { %s4354_s21 = scalar_select %p89_p1, %s4291_s14, %s91_s19  }
   0x9   : > { %p4356_p5 = por %p102_p2, %p101_p0  ;;  %p4360_p6 = por %p108_p4, %p107_p3 }
   0xa   : > { %p3651_p7 = scmp.ge.s32.totalorder %s4295_s15, 1  ;;  %p140_p8 = scmp.lt.s32.totalorder %s4295_s15, 3 }
   0xc   : > { %p141_p9 = pnand %p3651_p7, %p140_p8 }
   0xd   : > { %p163_p10 = scmp.lt.s32.totalorder (!%p141_p9), %s4339_s16, 1  ;;  %vm424_vm0 = vcmask (!%p141_p9), 523264   ;;  %v1209_v50 = vld [vmem:[%s6661_s1 + $0x80] sm:$0xff] (!%p141_p9)  ;;  %v1210_v51 = vld [vmem:[%s6661_s1 + $0x88] sm:$0xff] (!%p141_p9)  ;;  %v1211_v60 = vld [vmem:[%s6661_s1 + $0x90] sm:$0xff] (!%p141_p9)  ;;  %vm1717_vm1 = vcmask (!%p141_p9), 130112  }
   0xe   : > { %144 = sbr.rel (%p141_p9) target bundleno = 913 (0x391), region = 32  ;;  %v3938_v54 = vpack.c.bf16 (!%p141_p9), %v1210_v51, %v1209_v50  ;;  %v1193_v55 = vld [vmem:[%s6661_s1] sm:$0xff] (!%p141_p9)  ;;  %v1194_v56 = vld [vmem:[%s6661_s1 + $0x8] sm:$0xff] (!%p141_p9)  ;;  %v1212_v61 = vld [vmem:[%s6661_s1 + $0x98] sm:$0xff] (!%p141_p9)  ;;  %vm1724_vm2 = vcmask (!%p141_p9), 195712   ;;  %vm1731_vm3 = vcmask (!%p141_p9), 261312  }
   0xf   : > { %v3940_v59 = vpack.c.bf16 (!%p141_p9), %v1194_v56, %v1193_v55  ;;  %v1205_v51 = vld [vmem:[%s6661_s1 + $0x60] sm:$0xff] (!%p141_p9)  ;;  %v1223_v56 = vld [vmem:[%s6661_s1 + $0xf0] sm:$0xff] (!%p141_p9)  ;;  %vm1738_vm4 = vcmask (!%p141_p9), 326912   ;;  %vm1745_vm5 = vcmask (!%p141_p9), 392512   ;;  %vm1752_vm6 = vcmask (!%p141_p9), 458112   ;;  %s3654_s26 = sshll.u32 (!%p141_p9), %s4339_s16, 4 }
  0x10   : > { %3939 = vmatprep.subr.bf16.mxu0 (!%p141_p9), %v3938_v54  ;;  %vm1759_vm7 = vcmask (!%p141_p9), 523712   ;;  %vm1766_vm8 = vcmask (!%p141_p9), 589312   ;;  %vm1773_vm9 = vcmask (!%p141_p9), 654912   ;;  %vm1780_vm10 = vcmask (!%p141_p9), 720512  }
  0x11   : > { %3941 = vmatpush3.bf16.msra.mxu0 (!%p141_p9), %v3940_v59  ;;  %vm1787_vm11 = vcmask (!%p141_p9), 786112   ;;  %vm1794_vm12 = vcmask (!%p141_p9), 851712   ;;  %vm1801_vm13 = vcmask (!%p141_p9), 917312   ;;  %vm1808_vm14 = vcmask (!%p141_p9), 982912  }
  0x12   : > { %vm1815_vm15 = vcmask (!%p141_p9), 1048512  }
  0x15   : > { %s164_s24 = scalar_select %p163_p10, %s4339_s16, 1 }
  0x16   : > { %s4297_s16 = smov [#allocation2]  }
  0x17   : > { %s3657_s25 = sshll.u32 %s164_s24, 11  ;;  %s4237_s7 = sshll.u32 %s4297_s16, 4  ;;  %s4238_s7 = int_to_ptr.vmem [resolvable:$false] %s4237_s7 }
  0x18   : > { %s4371_s28 = scalar_lea.vmem %s6660_s0, %s3657_s25  ;;  %s161_s25 = sand.u32 1, %s4287_s13  }
  0x19   : > { %v170_v0 = vld [vmem:[%s4371_s28 + $0x10] sm:$0xff]  ;;  %v168_v1 = vld [vmem:[%s4371_s28] sm:$0xff]  ;;  %v171_v2 = vld [vmem:[%s4371_s28 + $0x18] sm:$0xff]  ;;  %s162_s27 = scalar_lea.vmem [#allocation2], %s161_s25  ;;  %s3581_s5 = scalar_lea.sflag [#allocation3], %s161_s25 }
  0x1a   : > { %v431_v3 = vsel %vm424_vm0, %v170_v0, 0.0  ;;  %v425_v4 = vsel %vm424_vm0, %v168_v1, 0.0  ;;  %v169_v5 = vld [vmem:[%s4371_s28 + $0x8] sm:$0xff]  ;;  %v434_v6 = vsel %vm424_vm0, %v171_v2, 0.0  ;;  %v172_v9 = vld [vmem:[%s4371_s28 + $0x20] sm:$0xff]  ;;  %v175_v12 = vld [vmem:[%s4371_s28 + $0x38] sm:$0xff]  ;;  %v3942_v0 = vpack.c.bf16 %v1212_v61, %v1211_v60 }
  0x1b   : > { %432 = vadd.xlane.f32.xlu1 %v431_v3  ;;  %426 = vadd.xlane.f32.xlu0 %v425_v4  ;;  %v428_v7 = vsel %vm424_vm0, %v169_v5, 0.0  ;;  %v173_v8 = vld [vmem:[%s4371_s28 + $0x28] sm:$0xff]  ;;  %v437_v11 = vsel %vm424_vm0, %v172_v9, 0.0  ;;  %v174_v13 = vld [vmem:[%s4371_s28 + $0x30] sm:$0xff]  ;;  %v446_v14 = vsel %vm424_vm0, %v175_v12, 0.0  ;;  %v176_v17 = vld [vmem:[%s4371_s28 + $0x40] sm:$0xff] }
  0x1c   : > { %v440_v10 = vsel %vm424_vm0, %v173_v8, 0.0  ;;  %v443_v15 = vsel %vm424_vm0, %v174_v13, 0.0  ;;  %v177_v16 = vld [vmem:[%s4371_s28 + $0x48] sm:$0xff]  ;;  %v449_v19 = vsel %vm424_vm0, %v176_v17, 0.0  ;;  %v179_v20 = vld [vmem:[%s4371_s28 + $0x58] sm:$0xff]  ;;  %v178_v21 = vld [vmem:[%s4371_s28 + $0x50] sm:$0xff]  ;;  %3943 = vmatprep.subr.bf16.mxu0 %v3942_v0 }
  0x1d   : > { %v452_v18 = vsel %vm424_vm0, %v177_v16, 0.0  ;;  %v458_v22 = vsel %vm424_vm0, %v179_v20, 0.0  ;;  %v455_v23 = vsel %vm424_vm0, %v178_v21, 0.0  ;;  %v181_v24 = vld [vmem:[%s4371_s28 + $0x68] sm:$0xff]  ;;  %v180_v25 = vld [vmem:[%s4371_s28 + $0x60] sm:$0xff]  ;;  %v183_v28 = vld [vmem:[%s4371_s28 + $0x78] sm:$0xff] }
  0x1e   : > { %v464_v26 = vsel %vm424_vm0, %v181_v24, 0.0  ;;  %v461_v27 = vsel %vm424_vm0, %v180_v25, 0.0  ;;  %v182_v29 = vld [vmem:[%s4371_s28 + $0x70] sm:$0xff]  ;;  %v470_v30 = vsel %vm424_vm0, %v183_v28, 0.0  ;;  %v185_v32 = vld [vmem:[%s4371_s28 + $0x88] sm:$0xff]  ;;  %v184_v33 = vld [vmem:[%s4371_s28 + $0x80] sm:$0xff] }
  0x1f   : > { %435 = vadd.xlane.f32.xlu1 %v434_v6  ;;  %429 = vadd.xlane.f32.xlu0 %v428_v7  ;;  %v467_v31 = vsel %vm424_vm0, %v182_v29, 0.0  ;;  %v476_v34 = vsel %vm424_vm0, %v185_v32, 0.0  ;;  %v473_v35 = vsel %vm424_vm0, %v184_v33, 0.0  ;;  %v187_v36 = vld [vmem:[%s4371_s28 + $0x98] sm:$0xff]  ;;  %v186_v37 = vld [vmem:[%s4371_s28 + $0x90] sm:$0xff]  ;;  %v189_v40 = vld [vmem:[%s4371_s28 + $0xa8] sm:$0xff] }
  0x20   : > { %v482_v38 = vsel %vm424_vm0, %v187_v36, 0.0  ;;  %v479_v39 = vsel %vm424_vm0, %v186_v37, 0.0  ;;  %v188_v41 = vld [vmem:[%s4371_s28 + $0xa0] sm:$0xff]  ;;  %v488_v42 = vsel %vm424_vm0, %v189_v40, 0.0  ;;  %v191_v44 = vld [vmem:[%s4371_s28 + $0xb8] sm:$0xff]  ;;  %v190_v45 = vld [vmem:[%s4371_s28 + $0xb0] sm:$0xff] }
  0x21   : > { %v485_v43 = vsel %vm424_vm0, %v188_v41, 0.0  ;;  %v494_v46 = vsel %vm424_vm0, %v191_v44, 0.0  ;;  %v491_v47 = vsel %vm424_vm0, %v190_v45, 0.0  ;;  %v193_v48 = vld [vmem:[%s4371_s28 + $0xc8] sm:$0xff]  ;;  %v192_v49 = vld [vmem:[%s4371_s28 + $0xc0] sm:$0xff]  ;;  %v195_v57 = vld [vmem:[%s4371_s28 + $0xd8] sm:$0xff] }
  0x22   : > { %v500_v52 = vsel %vm424_vm0, %v193_v48, 0.0  ;;  %v497_v53 = vsel %vm424_vm0, %v192_v49, 0.0  ;;  %v194_v58 = vld [vmem:[%s4371_s28 + $0xd0] sm:$0xff]  ;;  %v506_v62 = vsel %vm424_vm0, %v195_v57, 0.0  ;;  %v1196_v2 = vld [vmem:[%s6661_s1 + $0x18] sm:$0xff]  ;;  %v197_v3 = vld [vmem:[%s4371_s28 + $0xe8] sm:$0xff] }
  0x23   : > { %441 = vadd.xlane.f32.xlu1 %v440_v10  ;;  %438 = vadd.xlane.f32.xlu0 %v437_v11  ;;  %v503_v63 = vsel %vm424_vm0, %v194_v58, 0.0  ;;  %v1195_v1 = vld [vmem:[%s6661_s1 + $0x10] sm:$0xff]  ;;  %v196_v4 = vld [vmem:[%s4371_s28 + $0xe0] sm:$0xff]  ;;  %v1214_v7 = vld [vmem:[%s6661_s1 + $0xa8] sm:$0xff]  ;;  %v512_v8 = vsel %vm424_vm0, %v197_v3, 0.0  ;;  %s3593_s29 = sshll.u32 %s162_s27, 4  ;;  %s6620_s29 = int_to_ptr.vmem [resolvable:$true] %s3593_s29 }
  0x24   : > { %v3944_v5 = vpack.c.bf16 %v1196_v2, %v1195_v1  ;;  %v1213_v6 = vld [vmem:[%s6661_s1 + $0xa0] sm:$0xff]  ;;  %v509_v9 = vsel %vm424_vm0, %v196_v4, 0.0  ;;  %v1198_v12 = vld [vmem:[%s6661_s1 + $0x28] sm:$0xff]  ;;  %v199_v13 = vld [vmem:[%s4371_s28 + $0xf8] sm:$0xff]  ;;  %s4233_s6 = scalar_lea.vmem %s6620_s29, 16  ;;  %s4239_s8 = scalar_lea.vmem %s4238_s7, 32 }
  0x25   : > { %v3946_v10 = vpack.c.bf16 %v1214_v7, %v1213_v6  ;;  %v1197_v11 = vld [vmem:[%s6661_s1 + $0x20] sm:$0xff]  ;;  %v1215_v16 = vld [vmem:[%s6661_s1 + $0xb0] sm:$0xff]  ;;  %v1216_v17 = vld [vmem:[%s6661_s1 + $0xb8] sm:$0xff]  ;;  %p4234_p11 = scmp.ne.s32.totalorder %s6620_s29, %s4233_s6  ;;  %p4240_p0 = scmp.lt.s32.totalorder %s6620_s29, %s4238_s7 }
  0x26   : > { %3945 = vmatpush3.bf16.msra.mxu0 %v3944_v5  ;;  %v3950_v20 = vpack.c.bf16 %v1216_v17, %v1215_v16  ;;  %v1199_v21 = vld [vmem:[%s6661_s1 + $0x30] sm:$0xff]  ;;  %v200_v24 = vld [vmem:[%s4371_s28 + $0x100] sm:$0xff]  ;;  %v1202_v32 = vld [vmem:[%s6661_s1 + $0x48] sm:$0xff]  ;;  %p4241_p1 = scmp.lt.s32.totalorder %s4239_s8, %s4233_s6 }
  0x27   : > { %447 = vadd.xlane.f32.xlu1 %v446_v14  ;;  %444 = vadd.xlane.f32.xlu0 %v443_v15  ;;  %v198_v14 = vld [vmem:[%s4371_s28 + $0xf0] sm:$0xff]  ;;  %v3948_v15 = vpack.c.bf16 %v1198_v12, %v1197_v11  ;;  %v521_v29 = vsel %vm424_vm0, %v200_v24, 0.0  ;;  %v203_v33 = vld [vmem:[%s4371_s28 + $0x118] sm:$0xff]  ;;  %v204_v44 = vld [vmem:[%s4371_s28 + $0x120] sm:$0xff]  ;;  %p4235_p12 = pnand %p4234_p11, %p4356_p5 }
  0x28   : > { %3947 = vmatprep.subr.bf16.mxu0 %v3946_v10  ;;  %v1219_v36 = vld [vmem:[%s6661_s1 + $0xd0] sm:$0xff]  ;;  %v1220_v37 = vld [vmem:[%s6661_s1 + $0xd8] sm:$0xff]  ;;  %v533_v49 = vsel %vm424_vm0, %v204_v44, 0.0  ;;  %v208_v0 = vld [vmem:[%s4371_s28 + $0x140] sm:$0xff]  ;;  %p4242_p2 = por %p4241_p1, %p4240_p0 }
  0x29   : > { %v3958_v40 = vpack.c.bf16 %v1220_v37, %v1219_v36  ;;  %v1203_v41 = vld [vmem:[%s6661_s1 + $0x50] sm:$0xff]  ;;  %v1224_v57 = vld [vmem:[%s6661_s1 + $0xf8] sm:$0xff]  ;;  %v545_v3 = vsel %vm424_vm0, %v208_v0, 0.0  ;;  %v217_v16 = vld [vmem:[%s4371_s28 + $0x188] sm:$0xff]  ;;  %p4236_p13 = pneg %p4235_p12 }
  0x2a   : > { %3949 = vmatpush3.bf16.msra.mxu0 %v3948_v15  ;;  %v206_v54 = vld [vmem:[%s4371_s28 + $0x130] sm:$0xff]  ;;  %v3966_v60 = vpack.c.bf16 %v1224_v57, %v1223_v56  ;;  %v211_v4 = vld [vmem:[%s4371_s28 + $0x158] sm:$0xff]  ;;  %v216_v17 = vld [vmem:[%s4371_s28 + $0x180] sm:$0xff] }
  0x2b   : > { %453 = vadd.xlane.f32.xlu1 %v452_v18  ;;  %450 = vadd.xlane.f32.xlu0 %v449_v19  ;;  %v518_v18 = vsel %vm424_vm0, %v199_v13, 0.0  ;;  %v515_v19 = vsel %vm424_vm0, %v198_v14, 0.0  ;;  %v539_v59 = vsel %vm424_vm0, %v206_v54, 0.0  ;;  %v1207_v61 = vld [vmem:[%s6661_s1 + $0x70] sm:$0xff]  ;;  %v554_v6 = vsel %vm424_vm0, %v211_v4, 0.0  ;;  %v215_v12 = vld [vmem:[%s4371_s28 + $0x178] sm:$0xff]  ;;  %p4243_p3 = pnand %p4242_p2, %p4236_p13 }
  0x2c   : > { %3951 = vmatprep.subr.bf16.mxu0 %v3950_v20  ;;  %v210_v5 = vld [vmem:[%s4371_s28 + $0x150] sm:$0xff]  ;;  %v566_v14 = vsel %vm424_vm0, %v215_v12, 0.0  ;;  %v219_v20 = vld [vmem:[%s4371_s28 + $0x198] sm:$0xff]  ;;  %v221_v24 = vld [vmem:[%s4371_s28 + $0x1a8] sm:$0xff] }
  0x2d   : > { %v551_v7 = vsel %vm424_vm0, %v210_v5, 0.0  ;;  %v214_v13 = vld [vmem:[%s4371_s28 + $0x170] sm:$0xff]  ;;  %v1245_v54 = vld [vmem:[%s6661_s1 + $0x1a0] sm:$0xff] }
  0x2e   : > { %v563_v15 = vsel %vm424_vm0, %v214_v13, 0.0  ;;  %v1243_v44 = vld [vmem:[%s6661_s1 + $0x190] sm:$0xff] }
  0x2f   : > { %459 = vadd.xlane.f32.xlu1 %v458_v22  ;;  %456 = vadd.xlane.f32.xlu0 %v455_v23  ;;  %v1200_v22 = vld [vmem:[%s6661_s1 + $0x38] sm:$0xff]  ;;  %v201_v23 = vld [vmem:[%s4371_s28 + $0x108] sm:$0xff]  ;;  %v1247_v0 = vld [vmem:[%s6661_s1 + $0x1b0] sm:$0xff] }
  0x30   : > { %v3952_v25 = vpack.c.bf16 %v1200_v22, %v1199_v21  ;;  %v524_v28 = vsel %vm424_vm0, %v201_v23, 0.0  ;;  %v218_v21 = vld [vmem:[%s4371_s28 + $0x190] sm:$0xff]  ;;  %v578_v22 = vsel %vm424_vm0, %v219_v20, 0.0 }
  0x31   : > { %v575_v23 = vsel %vm424_vm0, %v218_v21, 0.0  ;;  %v1231_v5 = vld [vmem:[%s6661_s1 + $0x130] sm:$0xff]  ;;  %v1252_v21 = vld [vmem:[%s6661_s1 + $0x1d8] sm:$0xff] }
  0x32   : > { %3953 = vmatpush3.bf16.msra.mxu0 %v3952_v25  ;;  %v220_v25 = vld [vmem:[%s4371_s28 + $0x1a0] sm:$0xff]  ;;  %v1251_v20 = vld [vmem:[%s6661_s1 + $0x1d0] sm:$0xff] }
  0x33   : > { %465 = vadd.xlane.f32.xlu1 %v464_v26  ;;  %462 = vadd.xlane.f32.xlu0 %v461_v27  ;;  %v1217_v26 = vld [vmem:[%s6661_s1 + $0xc0] sm:$0xff]  ;;  %v1218_v27 = vld [vmem:[%s6661_s1 + $0xc8] sm:$0xff] }
  0x37   : > { %471 = vadd.xlane.f32.xlu1 %v470_v30  ;;  %468 = vadd.xlane.f32.xlu0 %v467_v31  ;;  %v3954_v30 = vpack.c.bf16 %v1218_v27, %v1217_v26  ;;  %v1201_v31 = vld [vmem:[%s6661_s1 + $0x40] sm:$0xff]  ;;  %v584_v26 = vsel %vm424_vm0, %v221_v24, 0.0  ;;  %v581_v27 = vsel %vm424_vm0, %v220_v25, 0.0  ;;  %v3990_v24 = vpack.c.bf16 %v1252_v21, %v1251_v20  ;;  %v1235_v25 = vld [vmem:[%s6661_s1 + $0x150] sm:$0xff] }
  0x39   : > { %3955 = vmatprep.subr.bf16.mxu0 %v3954_v30 }
  0x3b   : > { %477 = vadd.xlane.f32.xlu1 %v476_v34  ;;  %474 = vadd.xlane.f32.xlu0 %v473_v35  ;;  %v202_v34 = vld [vmem:[%s4371_s28 + $0x110] sm:$0xff]  ;;  %v3956_v35 = vpack.c.bf16 %v1202_v32, %v1201_v31  ;;  %v225_v32 = vld [vmem:[%s4371_s28 + $0x1c8] sm:$0xff] }
  0x3c   : > { %v596_v36 = vsel %vm424_vm0, %v225_v32, 0.0 }
  0x3d   : > { %3957 = vmatpush3.bf16.msra.mxu0 %v3956_v35  ;;  %v1242_v35 = vld [vmem:[%s6661_s1 + $0x188] sm:$0xff] }
  0x3e   : > { %3959 = vmatprep.subr.bf16.mxu0 %v3958_v40  ;;  %v1226_v40 = vld [vmem:[%s6661_s1 + $0x108] sm:$0xff] }
  0x3f   : > { %483 = vadd.xlane.f32.xlu1 %v482_v38  ;;  %480 = vadd.xlane.f32.xlu0 %v479_v39  ;;  %v530_v38 = vsel %vm424_vm0, %v203_v33, 0.0  ;;  %v527_v39 = vsel %vm424_vm0, %v202_v34, 0.0  ;;  %v224_v33 = vld [vmem:[%s4371_s28 + $0x1c0] sm:$0xff] }
  0x40   : > { %v1241_v34 = vld [vmem:[%s6661_s1 + $0x180] sm:$0xff]  ;;  %v593_v37 = vsel %vm424_vm0, %v224_v33, 0.0 }
  0x43   : > { %489 = vadd.xlane.f32.xlu1 %v488_v42  ;;  %486 = vadd.xlane.f32.xlu0 %v485_v43  ;;  %v1204_v42 = vld [vmem:[%s6661_s1 + $0x58] sm:$0xff]  ;;  %v205_v43 = vld [vmem:[%s4371_s28 + $0x128] sm:$0xff] }
  0x44   : > { %v3960_v45 = vpack.c.bf16 %v1204_v42, %v1203_v41  ;;  %v536_v48 = vsel %vm424_vm0, %v205_v43, 0.0  ;;  %v227_v41 = vld [vmem:[%s4371_s28 + $0x1d8] sm:$0xff]  ;;  %v226_v42 = vld [vmem:[%s4371_s28 + $0x1d0] sm:$0xff] }
  0x46   : > { %3961 = vmatpush3.bf16.msra.mxu0 %v3960_v45  ;;  %v1244_v45 = vld [vmem:[%s6661_s1 + $0x198] sm:$0xff] }
  0x47   : > { %495 = vadd.xlane.f32.xlu1 %v494_v46  ;;  %492 = vadd.xlane.f32.xlu0 %v491_v47  ;;  %v1221_v46 = vld [vmem:[%s6661_s1 + $0xe0] sm:$0xff]  ;;  %v1222_v47 = vld [vmem:[%s6661_s1 + $0xe8] sm:$0xff] }
  0x48   : > { %v3962_v50 = vpack.c.bf16 %v1222_v47, %v1221_v46  ;;  %v602_v46 = vsel %vm424_vm0, %v227_v41, 0.0  ;;  %v599_v47 = vsel %vm424_vm0, %v226_v42, 0.0  ;;  %v1256_v41 = vld [vmem:[%s6661_s1 + $0x1f8] sm:$0xff] }
  0x4a   : > { %3963 = vmatprep.subr.bf16.mxu0 %v3962_v50  ;;  %v1228_v50 = vld [vmem:[%s6661_s1 + $0x118] sm:$0xff] }
  0x4b   : > { %501 = vadd.xlane.f32.xlu1 %v500_v52  ;;  %498 = vadd.xlane.f32.xlu0 %v497_v53  ;;  %v1206_v52 = vld [vmem:[%s6661_s1 + $0x68] sm:$0xff]  ;;  %v207_v53 = vld [vmem:[%s4371_s28 + $0x138] sm:$0xff] }
  0x4c   : > { %v3964_v55 = vpack.c.bf16 %v1206_v52, %v1205_v51  ;;  %v542_v58 = vsel %vm424_vm0, %v207_v53, 0.0  ;;  %v229_v51 = vld [vmem:[%s4371_s28 + $0x1e8] sm:$0xff]  ;;  %v228_v52 = vld [vmem:[%s4371_s28 + $0x1e0] sm:$0xff] }
  0x4d   : > { %v608_v56 = vsel %vm424_vm0, %v229_v51, 0.0  ;;  %v605_v57 = vsel %vm424_vm0, %v228_v52, 0.0 }
  0x4e   : > { %3965 = vmatpush3.bf16.msra.mxu0 %v3964_v55  ;;  %v1246_v55 = vld [vmem:[%s6661_s1 + $0x1a8] sm:$0xff] }
  0x4f   : > { %507 = vadd.xlane.f32.xlu1 %v506_v62  ;;  %504 = vadd.xlane.f32.xlu0 %v503_v63  ;;  %v1208_v62 = vld [vmem:[%s6661_s1 + $0x78] sm:$0xff]  ;;  %v209_v63 = vld [vmem:[%s4371_s28 + $0x148] sm:$0xff] }
  0x50   : > { %v3968_v1 = vpack.c.bf16 %v1208_v62, %v1207_v61  ;;  %3967 = vmatprep.subr.bf16.mxu0 %v3966_v60  ;;  %v548_v2 = vsel %vm424_vm0, %v209_v63, 0.0  ;;  %v1230_v60 = vld [vmem:[%s6661_s1 + $0x128] sm:$0xff]  ;;  %v231_v61 = vld [vmem:[%s4371_s28 + $0x1f8] sm:$0xff]  ;;  %v230_v62 = vld [vmem:[%s4371_s28 + $0x1f0] sm:$0xff] }
  0x52   : > { %3969 = vmatpush3.bf16.msra.mxu0 %v3968_v1  ;;  %v1248_v1 = vld [vmem:[%s6661_s1 + $0x1b8] sm:$0xff] }
  0x53   : > { %513 = vadd.xlane.f32.xlu1 %v512_v8  ;;  %510 = vadd.xlane.f32.xlu0 %v509_v9  ;;  %v213_v8 = vld [vmem:[%s4371_s28 + $0x168] sm:$0xff]  ;;  %v212_v9 = vld [vmem:[%s4371_s28 + $0x160] sm:$0xff]  ;;  %v3982_v4 = vpack.c.bf16 %v1248_v1, %v1247_v0 }
  0x54   : > { %v560_v10 = vsel %vm424_vm0, %v213_v8, 0.0  ;;  %v557_v11 = vsel %vm424_vm0, %v212_v9, 0.0  ;;  %v232_v8 = vld [vmem:[%s4371_s28 + $0x200] sm:$0xff] }
  0x55   : > { %v617_v13 = vsel %vm424_vm0, %v232_v8, 0.0  ;;  %v266_v8 = vld [vmem:[%s4371_s28 + $0x310] sm:$0xff] }
  0x57   : > { %519 = vadd.xlane.f32.xlu1 %v518_v18  ;;  %516 = vadd.xlane.f32.xlu0 %v515_v19  ;;  %v572_v18 = vsel %vm424_vm0, %v217_v16, 0.0  ;;  %v569_v19 = vsel %vm424_vm0, %v216_v17, 0.0  ;;  %v1234_v16 = vld [vmem:[%s6661_s1 + $0x148] sm:$0xff]  ;;  %v235_v17 = vld [vmem:[%s4371_s28 + $0x218] sm:$0xff] }
  0x5b   : > { %525 = vadd.xlane.f32.xlu1 %v524_v28  ;;  %522 = vadd.xlane.f32.xlu0 %v521_v29  ;;  %v223_v28 = vld [vmem:[%s4371_s28 + $0x1b8] sm:$0xff]  ;;  %v222_v29 = vld [vmem:[%s4371_s28 + $0x1b0] sm:$0xff] }
  0x5c   : > { %v590_v30 = vsel %vm424_vm0, %v223_v28, 0.0  ;;  %v587_v31 = vsel %vm424_vm0, %v222_v29, 0.0  ;;  %v236_v28 = vld [vmem:[%s4371_s28 + $0x220] sm:$0xff] }
  0x5d   : > { %v629_v33 = vsel %vm424_vm0, %v236_v28, 0.0 }
  0x5f   : > { %531 = vadd.xlane.f32.xlu1 %v530_v38  ;;  %528 = vadd.xlane.f32.xlu0 %v527_v39  ;;  %v3970_v38 = vpack.c.bf16 %v1242_v35, %v1241_v34  ;;  %v1225_v39 = vld [vmem:[%s6661_s1 + $0x100] sm:$0xff] }
  0x60   : > { %v3972_v43 = vpack.c.bf16 %v1226_v40, %v1225_v39  ;;  %v1237_v35 = vld [vmem:[%s6661_s1 + $0x160] sm:$0xff]  ;;  %v1255_v40 = vld [vmem:[%s6661_s1 + $0x1f0] sm:$0xff] }
  0x61   : > { %3971 = vmatprep.subr.bf16.mxu1 %v3970_v38  ;;  %v248_v38 = vld [vmem:[%s4371_s28 + $0x280] sm:$0xff] }
  0x62   : > { %3973 = vmatpush3.bf16.msra.mxu1 %v3972_v43  ;;  %v665_v43 = vsel %vm424_vm0, %v248_v38, 0.0 }
  0x63   : > { %537 = vadd.xlane.f32.xlu1 %v536_v48  ;;  %534 = vadd.xlane.f32.xlu0 %v533_v49  ;;  %v3974_v48 = vpack.c.bf16 %v1244_v45, %v1243_v44  ;;  %v1227_v49 = vld [vmem:[%s6661_s1 + $0x110] sm:$0xff]  ;;  %v3998_v44 = vpack.c.bf16 %v1256_v41, %v1255_v40  ;;  %v285_v41 = vld [vmem:[%s4371_s28 + $0x3a8] sm:$0xff] }
  0x64   : > { %v3976_v53 = vpack.c.bf16 %v1228_v50, %v1227_v49  ;;  %v1239_v45 = vld [vmem:[%s6661_s1 + $0x170] sm:$0xff] }
  0x65   : > { %3975 = vmatprep.subr.bf16.mxu1 %v3974_v48  ;;  %v250_v48 = vld [vmem:[%s4371_s28 + $0x290] sm:$0xff] }
  0x66   : > { %3977 = vmatpush3.bf16.msra.mxu1 %v3976_v53  ;;  %v671_v53 = vsel %vm424_vm0, %v250_v48, 0.0 }
  0x67   : > { %543 = vadd.xlane.f32.xlu1 %v542_v58  ;;  %540 = vadd.xlane.f32.xlu0 %v539_v59  ;;  %v3978_v58 = vpack.c.bf16 %v1246_v55, %v1245_v54  ;;  %v1229_v59 = vld [vmem:[%s6661_s1 + $0x120] sm:$0xff]  ;;  %v281_v54 = vld [vmem:[%s4371_s28 + $0x388] sm:$0xff] }
  0x68   : > { %v3980_v63 = vpack.c.bf16 %v1230_v60, %v1229_v59  ;;  %v280_v55 = vld [vmem:[%s4371_s28 + $0x380] sm:$0xff] }
  0x69   : > { %3979 = vmatprep.subr.bf16.mxu1 %v3978_v58  ;;  %v764_v58 = vsel %vm424_vm0, %v281_v54, 0.0  ;;  %v761_v59 = vsel %vm424_vm0, %v280_v55, 0.0  ;;  %v264_v60 = vld [vmem:[%s4371_s28 + $0x300] sm:$0xff] }
  0x6a   : > { %3981 = vmatpush3.bf16.msra.mxu1 %v3980_v63  ;;  %v713_v0 = vsel %vm424_vm0, %v264_v60, 0.0 }
  0x6b   : > { %549 = vadd.xlane.f32.xlu1 %v548_v2  ;;  %546 = vadd.xlane.f32.xlu0 %v545_v3  ;;  %v614_v2 = vsel %vm424_vm0, %v231_v61, 0.0  ;;  %v611_v3 = vsel %vm424_vm0, %v230_v62, 0.0  ;;  %v252_v61 = vld [vmem:[%s4371_s28 + $0x2a0] sm:$0xff] }
  0x6c   : > { %3983 = vmatprep.subr.bf16.mxu1 %v3982_v4  ;;  %v677_v1 = vsel %vm424_vm0, %v252_v61, 0.0 }
  0x6f   : > { %555 = vadd.xlane.f32.xlu1 %v554_v6  ;;  %552 = vadd.xlane.f32.xlu0 %v551_v7  ;;  %v1232_v6 = vld [vmem:[%s6661_s1 + $0x138] sm:$0xff]  ;;  %v233_v7 = vld [vmem:[%s4371_s28 + $0x208] sm:$0xff] }
  0x70   : > { %v3984_v9 = vpack.c.bf16 %v1232_v6, %v1231_v5  ;;  %v620_v12 = vsel %vm424_vm0, %v233_v7, 0.0 }
  0x72   : > { %3985 = vmatpush3.bf16.msra.mxu1 %v3984_v9  ;;  %v253_v9 = vld [vmem:[%s4371_s28 + $0x2a8] sm:$0xff] }
  0x73   : > { %561 = vadd.xlane.f32.xlu1 %v560_v10  ;;  %558 = vadd.xlane.f32.xlu0 %v557_v11  ;;  %v1249_v10 = vld [vmem:[%s6661_s1 + $0x1c0] sm:$0xff]  ;;  %v1250_v11 = vld [vmem:[%s6661_s1 + $0x1c8] sm:$0xff] }
  0x77   : > { %567 = vadd.xlane.f32.xlu1 %v566_v14  ;;  %564 = vadd.xlane.f32.xlu0 %v563_v15  ;;  %v3986_v14 = vpack.c.bf16 %v1250_v11, %v1249_v10  ;;  %v1233_v15 = vld [vmem:[%s6661_s1 + $0x140] sm:$0xff]  ;;  %v1706_v10 = vlaneseq }
  0x79   : > { %3987 = vmatprep.subr.bf16.mxu1 %v3986_v14  ;;  %v680_v14 = vsel %vm424_vm0, %v253_v9, 0.0 }
  0x7b   : > { %573 = vadd.xlane.f32.xlu1 %v572_v18  ;;  %570 = vadd.xlane.f32.xlu0 %v569_v19  ;;  %v234_v18 = vld [vmem:[%s4371_s28 + $0x210] sm:$0xff]  ;;  %v3988_v19 = vpack.c.bf16 %v1234_v16, %v1233_v15  ;;  %v283_v16 = vld [vmem:[%s4371_s28 + $0x398] sm:$0xff] }
  0x7c   : > { %v254_v15 = vld [vmem:[%s4371_s28 + $0x2b0] sm:$0xff]  ;;  %v770_v21 = vsel %vm424_vm0, %v283_v16, 0.0 }
  0x7d   : > { %3989 = vmatpush3.bf16.msra.mxu1 %v3988_v19  ;;  %v683_v20 = vsel %vm424_vm0, %v254_v15, 0.0 }
  0x7e   : > { %3991 = vmatprep.subr.bf16.mxu1 %v3990_v24  ;;  %v267_v24 = vld [vmem:[%s4371_s28 + $0x318] sm:$0xff] }
  0x7f   : > { %579 = vadd.xlane.f32.xlu1 %v578_v22  ;;  %576 = vadd.xlane.f32.xlu0 %v575_v23  ;;  %v626_v22 = vsel %vm424_vm0, %v235_v17, 0.0  ;;  %v623_v23 = vsel %vm424_vm0, %v234_v18, 0.0  ;;  %v4751_v17 = vand.u32 127, %v1706_v10 }
  0x81   : > { %v1740_v54 = vadd.s32 4294967256, %v4751_v17  ;;  %v1747_v55 = vadd.s32 4294967248, %v4751_v17  ;;  %v1761_v9 = vadd.s32 4294967232, %v4751_v17 }
  0x83   : > { %585 = vadd.xlane.f32.xlu1 %v584_v26  ;;  %582 = vadd.xlane.f32.xlu0 %v581_v27  ;;  %v1236_v26 = vld [vmem:[%s6661_s1 + $0x158] sm:$0xff]  ;;  %v237_v27 = vld [vmem:[%s4371_s28 + $0x228] sm:$0xff] }
  0x84   : > { %v3992_v29 = vpack.c.bf16 %v1236_v26, %v1235_v25  ;;  %v632_v32 = vsel %vm424_vm0, %v237_v27, 0.0  ;;  %v4762_v25 = vshrl.u32 %v1706_v10, 7  ;;  %v286_v10 = vld [vmem:[%s4371_s28 + $0x3b0] sm:$0xff] }
  0x86   : > { %3993 = vmatpush3.bf16.msra.mxu1 %v3992_v29  ;;  %v722_v29 = vsel %vm424_vm0, %v267_v24, 0.0  ;;  %v4830_v15 = vsub.s32 %v1747_v55, %v4762_v25 }
  0x87   : > { %591 = vadd.xlane.f32.xlu1 %v590_v30  ;;  %588 = vadd.xlane.f32.xlu0 %v587_v31  ;;  %v1253_v30 = vld [vmem:[%s6661_s1 + $0x1e0] sm:$0xff]  ;;  %v1254_v31 = vld [vmem:[%s6661_s1 + $0x1e8] sm:$0xff] }
  0x88   : > { %v3994_v34 = vpack.c.bf16 %v1254_v31, %v1253_v30  ;;  %v255_v31 = vld [vmem:[%s4371_s28 + $0x2b8] sm:$0xff] }
  0x89   : > { %v686_v38 = vsel %vm424_vm0, %v255_v31, 0.0 }
  0x8a   : > { %3995 = vmatprep.subr.bf16.mxu1 %v3994_v34  ;;  %v4778_v34 = vsub.s32 %v4751_v17, %v4762_v25 }
  0x8b   : > { %597 = vadd.xlane.f32.xlu1 %v596_v36  ;;  %594 = vadd.xlane.f32.xlu0 %v593_v37  ;;  %v1238_v36 = vld [vmem:[%s6661_s1 + $0x168] sm:$0xff] }
  0x8c   : > { %v249_v37 = vld [vmem:[%s4371_s28 + $0x288] sm:$0xff]  ;;  %v3996_v39 = vpack.c.bf16 %v1238_v36, %v1237_v35  ;;  %v1726_v35 = vadd.s32 4294967272, %v4751_v17 }
  0x8d   : > { %v668_v42 = vsel %vm424_vm0, %v249_v37, 0.0 }
  0x8e   : > { %3997 = vmatpush3.bf16.msra.mxu1 %v3996_v39 }
  0x8f   : > { %603 = vadd.xlane.f32.xlu1 %v602_v46  ;;  %600 = vadd.xlane.f32.xlu0 %v599_v47  ;;  %v1240_v46 = vld [vmem:[%s6661_s1 + $0x178] sm:$0xff] }
  0x90   : > { %v251_v47 = vld [vmem:[%s4371_s28 + $0x298] sm:$0xff]  ;;  %v4000_v49 = vpack.c.bf16 %v1240_v46, %v1239_v45  ;;  %3999 = vmatprep.subr.bf16.mxu1 %v3998_v44  ;;  %v1733_v44 = vadd.s32 4294967264, %v4751_v17  ;;  %v4798_v46 = vsub.s32 %v1726_v35, %v4762_v25  ;;  %v1775_v35 = vadd.s32 4294967216, %v4751_v17 }
  0x91   : > { %v674_v52 = vsel %vm424_vm0, %v251_v47, 0.0 }
  0x92   : > { %4001 = vmatpush3.bf16.msra.mxu1 %v4000_v49  ;;  %v776_v49 = vsel %vm424_vm0, %v285_v41, 0.0 }
  0x93   : > { %609 = vadd.xlane.f32.xlu1 %v608_v56  ;;  %606 = vadd.xlane.f32.xlu0 %v605_v57 }
  0x97   : > { %615 = vadd.xlane.f32.xlu1 %v614_v2  ;;  %612 = vadd.xlane.f32.xlu0 %v611_v3  ;;  %v282_v2 = vld [vmem:[%s4371_s28 + $0x390] sm:$0xff]  ;;  %v265_v3 = vld [vmem:[%s4371_s28 + $0x308] sm:$0xff] }
  0x98   : > { %v767_v6 = vsel %vm424_vm0, %v282_v2, 0.0  ;;  %v716_v7 = vsel %vm424_vm0, %v265_v3, 0.0  ;;  %v1754_v2 = vadd.s32 4294967240, %v4751_v17 }
  0x9b   : > { %621 = vadd.xlane.f32.xlu1 %v620_v12  ;;  %618 = vadd.xlane.f32.xlu0 %v617_v13  ;;  %v719_v13 = vsel %vm424_vm0, %v266_v8, 0.0  ;;  %v4821_v8 = vsub.s32 %v1740_v54, %v4762_v25 }
  0x9f   : > { %627 = vadd.xlane.f32.xlu1 %v626_v22  ;;  %624 = vadd.xlane.f32.xlu0 %v623_v23  ;;  %v1712_v22 = vadd.s32 4294967288, %v4751_v17  ;;  %v284_v23 = vld [vmem:[%s4371_s28 + $0x3a0] sm:$0xff] }
  0xa0   : > { %v773_v28 = vsel %vm424_vm0, %v284_v23, 0.0  ;;  %v4837_v23 = vsub.s32 %v1754_v2, %v4762_v25 }
  0xa1   : > { %v4771_v30 = vsub.s32 %v1712_v22, %v4762_v25 }
  0xa3   : > { %633 = vadd.xlane.f32.xlu1 %v632_v32  ;;  %630 = vadd.xlane.f32.xlu0 %v629_v33  ;;  %v238_v32 = vld [vmem:[%s4371_s28 + $0x230] sm:$0xff]  ;;  %v1719_v33 = vadd.s32 4294967280, %v4751_v17 }
  0xa4   : > { %v635_v39 = vsel %vm424_vm0, %v238_v32, 0.0 }
  0xa7   : > { %669 = vadd.xlane.f32.xlu1 %v668_v42  ;;  %666 = vadd.xlane.f32.xlu0 %v665_v43  ;;  %v268_v42 = vld [vmem:[%s4371_s28 + $0x320] sm:$0xff]  ;;  %v4792_v43 = vsub.s32 %v1719_v33, %v4762_v25  ;;  %v4845_v33 = vsub.s32 %v1761_v9, %v4762_v25 }
  0xa8   : > { %v4711_v50 = vpop.xlane.xlu1 %432  ;;  %v4713_v51 = vpop.xlane.xlu0 %426 }
  0xa9   : > { %v1711_v45 = vrot.slane %v4713_v51, %v4778_v34  ;;  %v239_v51 = vld [vmem:[%s4371_s28 + $0x238] sm:$0xff] }
  0xab   : > { %675 = vadd.xlane.f32.xlu1 %v674_v52  ;;  %672 = vadd.xlane.f32.xlu0 %v671_v53  ;;  %v725_v52 = vsel %vm424_vm0, %v268_v42, 0.0 }
  0xac   : > { %v4719_v56 = vpop.xlane.xlu1 %435  ;;  %v4721_v57 = vpop.xlane.xlu0 %429 }
  0xad   : > { %v1716_v40 = vrot.slane %v4721_v57, %v4771_v30  ;;  %v256_v57 = vld [vmem:[%s4371_s28 + $0x2c0] sm:$0xff] }
  0xaf   : > { %765 = vadd.xlane.f32.xlu1 %v764_v58  ;;  %762 = vadd.xlane.f32.xlu0 %v761_v59  ;;  %v1718_v53 = vsel %vm1717_vm1, %v1716_v40, %v1711_v45  ;;  %v1723_v58 = vrot.slane %v4711_v50, %v4792_v43  ;;  %v4810_v59 = vsub.s32 %v1733_v44, %v4762_v25  ;;  %v240_v40 = vld [vmem:[%s4371_s28 + $0x240] sm:$0xff] }
  0xb0   : > { %v4727_v62 = vpop.xlane.xlu1 %441  ;;  %v4729_v63 = vpop.xlane.xlu0 %438  ;;  %v641_v54 = vsel %vm424_vm0, %v240_v40, 0.0 }
  0xb1   : > { %v1744_v32 = vrot.slane %v4727_v62, %v4821_v8  ;;  %v1782_v62 = vadd.s32 4294967208, %v4751_v17 }
  0xb3   : > { %714 = vadd.xlane.f32.xlu1 %v713_v0  ;;  %678 = vadd.xlane.f32.xlu0 %v677_v1  ;;  %v1730_v0 = vrot.slane %v4719_v56, %v4798_v46  ;;  %v1725_v1 = vsel %vm1724_vm2, %v1723_v58, %v1718_v53 }
  0xb4   : > { %v4735_v4 = vpop.xlane.xlu1 %447  ;;  %v4737_v5 = vpop.xlane.xlu0 %444 }
  0xb5   : > { %v1751_v42 = vrot.slane %v4737_v5, %v4830_v15  ;;  %v1758_v55 = vrot.slane %v4735_v4, %v4837_v23  ;;  %v4879_v4 = vsub.s32 %v1782_v62, %v4762_v25  ;;  %v271_v62 = vld [vmem:[%s4371_s28 + $0x338] sm:$0xff] }
  0xb7   : > { %768 = vadd.xlane.f32.xlu1 %v767_v6  ;;  %717 = vadd.xlane.f32.xlu0 %v716_v7  ;;  %v689_v6 = vsel %vm424_vm0, %v256_v57, 0.0  ;;  %v638_v7 = vsel %vm424_vm0, %v239_v51, 0.0  ;;  %v4868_v51 = vsub.s32 %v1775_v35, %v4762_v25 }
  0xb8   : > { %v4743_v11 = vpop.xlane.xlu1 %453  ;;  %v4745_v12 = vpop.xlane.xlu0 %450 }
  0xbb   : > { %720 = vadd.xlane.f32.xlu1 %v719_v13  ;;  %681 = vadd.xlane.f32.xlu0 %v680_v14  ;;  %v269_v13 = vld [vmem:[%s4371_s28 + $0x328] sm:$0xff]  ;;  %v1737_v14 = vrot.slane %v4729_v63, %v4810_v59  ;;  %v1768_v63 = vadd.s32 4294967224, %v4751_v17 }
  0xbc   : > { %v4753_v18 = vpop.xlane.xlu1 %459  ;;  %v4755_v19 = vpop.xlane.xlu0 %456  ;;  %v728_v31 = vsel %vm424_vm0, %v269_v13, 0.0 }
  0xbd   : > { %v1786_v40 = vrot.slane %v4753_v18, %v4879_v4 }
  0xbf   : > { %684 = vadd.xlane.f32.xlu1 %v683_v20  ;;  %771 = vadd.xlane.f32.xlu0 %v770_v21  ;;  %v1732_v21 = vsel %vm1731_vm3, %v1730_v0, %v1725_v1  ;;  %v1765_v1 = vrot.slane %v4745_v12, %v4845_v33 }
  0xc0   : > { %v4764_v26 = vpop.xlane.xlu1 %465  ;;  %v4766_v27 = vpop.xlane.xlu0 %462  ;;  %v1739_v41 = vsel %vm1738_vm4, %v1737_v14, %v1732_v21  ;;  %v258_v21 = vld [vmem:[%s4371_s28 + $0x2d0] sm:$0xff] }
  0xc1   : > { %v1746_v57 = vsel %vm1745_vm5, %v1744_v32, %v1739_v41  ;;  %v1810_v32 = vadd.s32 4294967176, %v4751_v17 }
  0xc2   : > { %v1753_v0 = vsel %vm1752_vm6, %v1751_v42, %v1746_v57 }
  0xc3   : > { %774 = vadd.xlane.f32.xlu1 %v773_v28  ;;  %723 = vadd.xlane.f32.xlu0 %v722_v29  ;;  %v779_v29 = vsel %vm424_vm0, %v286_v10, 0.0  ;;  %v1760_v14 = vsel %vm1759_vm7, %v1758_v55, %v1753_v0  ;;  %v734_v55 = vsel %vm424_vm0, %v271_v62, 0.0  ;;  %v242_v0 = vld [vmem:[%s4371_s28 + $0x250] sm:$0xff] }
  0xc4   : > { %v4781_v36 = vpop.xlane.xlu1 %471  ;;  %v4783_v37 = vpop.xlane.xlu0 %468 }
  0xc7   : > { %687 = vadd.xlane.f32.xlu1 %v686_v38  ;;  %636 = vadd.xlane.f32.xlu0 %v635_v39  ;;  %v257_v39 = vld [vmem:[%s4371_s28 + $0x2c8] sm:$0xff] }
  0xc8   : > { %v478_v47 = vpop.xlane.xlu1 %477  ;;  %v475_v48 = vpop.xlane.xlu0 %474  ;;  %v692_v53 = vsel %vm424_vm0, %v257_v39, 0.0 }
  0xc9   : > { %v1824_v60 = vrot.slane %v478_v47, %v4771_v30  ;;  %v1820_v61 = vrot.slane %v475_v48, %v4778_v34  ;;  %v4859_v48 = vsub.s32 %v1768_v63, %v4762_v25  ;;  %v1767_v63 = vsel %vm1766_vm8, %v1765_v1, %v1760_v14  ;;  %v289_v14 = vld [vmem:[%s4371_s28 + $0x3c8] sm:$0xff] }
  0xcb   : > { %777 = vadd.xlane.f32.xlu1 %v776_v49  ;;  %726 = vadd.xlane.f32.xlu0 %v725_v52  ;;  %v1825_v16 = vsel %vm1717_vm1, %v1824_v60, %v1820_v61  ;;  %v1789_v49 = vadd.s32 4294967200, %v4751_v17  ;;  %v287_v60 = vld [vmem:[%s4371_s28 + $0x3b8] sm:$0xff]  ;;  %v270_v61 = vld [vmem:[%s4371_s28 + $0x330] sm:$0xff]  ;;  %v1772_v13 = vrot.slane %v4743_v11, %v4859_v48 }
  0xcc   : > { %v484_v50 = vpop.xlane.xlu1 %483  ;;  %v481_v3 = vpop.xlane.xlu0 %480  ;;  %v731_v10 = vsel %vm424_vm0, %v270_v61, 0.0  ;;  %v259_v61 = vld [vmem:[%s4371_s28 + $0x2d8] sm:$0xff] }
  0xcd   : > { %v1829_v56 = vrot.slane %v481_v3, %v4792_v43  ;;  %v1834_v20 = vrot.slane %v484_v50, %v4798_v46  ;;  %v1774_v41 = vsel %vm1773_vm9, %v1772_v13, %v1767_v63 }
  0xcf   : > { %v1830_v22 = vsel %vm1724_vm2, %v1829_v56, %v1825_v16  ;;  %690 = vadd.xlane.f32.xlu1 %v689_v6  ;;  %639 = vadd.xlane.f32.xlu0 %v638_v7  ;;  %v1796_v6 = vadd.s32 4294967192, %v4751_v17  ;;  %v4884_v7 = vsub.s32 %v1789_v49, %v4762_v25  ;;  %v782_v56 = vsel %vm424_vm0, %v287_v60, 0.0 }
  0xd0   : > { %v490_v24 = vpop.xlane.xlu1 %489  ;;  %v487_v28 = vpop.xlane.xlu0 %486  ;;  %v1835_v45 = vsel %vm1731_vm3, %v1834_v20, %v1830_v22  ;;  %v1803_v16 = vadd.s32 4294967184, %v4751_v17  ;;  %v241_v22 = vld [vmem:[%s4371_s28 + $0x248] sm:$0xff] }
  0xd1   : > { %v1839_v38 = vrot.slane %v487_v28, %v4810_v59  ;;  %v1844_v44 = vrot.slane %v490_v24, %v4821_v8  ;;  %v1779_v24 = vrot.slane %v4755_v19, %v4868_v51  ;;  %v695_v19 = vsel %vm424_vm0, %v258_v21, 0.0 }
  0xd2   : > { %v644_v39 = vsel %vm424_vm0, %v241_v22, 0.0  ;;  %v4911_v42 = vsub.s32 %v1803_v16, %v4762_v25  ;;  %v272_v16 = vld [vmem:[%s4371_s28 + $0x340] sm:$0xff] }
  0xd3   : > { %v1840_v47 = vsel %vm1738_vm4, %v1839_v38, %v1835_v45  ;;  %780 = vadd.xlane.f32.xlu1 %v779_v29  ;;  %729 = vadd.xlane.f32.xlu0 %v728_v31  ;;  %v4902_v31 = vsub.s32 %v1796_v6, %v4762_v25  ;;  %v288_v45 = vld [vmem:[%s4371_s28 + $0x3c0] sm:$0xff]  ;;  %v1781_v17 = vsel %vm1780_vm10, %v1779_v24, %v1774_v41  ;;  %v290_v41 = vld [vmem:[%s4371_s28 + $0x3d0] sm:$0xff] }
  0xd4   : > { %v496_v5 = vpop.xlane.xlu1 %495  ;;  %v493_v52 = vpop.xlane.xlu0 %492  ;;  %v1845_v50 = vsel %vm1745_vm5, %v1844_v44, %v1840_v47  ;;  %v1793_v47 = vrot.slane %v4766_v27, %v4884_v7  ;;  %v1788_v57 = vsel %vm1787_vm11, %v1786_v40, %v1781_v17  ;;  %v791_v17 = vsel %vm424_vm0, %v290_v41, 0.0 }
  0xd5   : > { %v1849_v58 = vrot.slane %v493_v52, %v4830_v15  ;;  %v1854_v2 = vrot.slane %v496_v5, %v4837_v23  ;;  %v1800_v27 = vrot.slane %v4764_v26, %v4902_v31 }
  0xd6   : > { %v1795_v1 = vsel %vm1794_vm12, %v1793_v47, %v1788_v57 }
  0xd7   : > { %v1850_v3 = vsel %vm1752_vm6, %v1849_v58, %v1845_v50  ;;  %693 = vadd.xlane.f32.xlu1 %v692_v53  ;;  %642 = vadd.xlane.f32.xlu0 %v641_v54  ;;  %v785_v54 = vsel %vm424_vm0, %v288_v45, 0.0  ;;  %v4928_v58 = vsub.s32 %v1810_v32, %v4762_v25  ;;  %v1802_v13 = vsel %vm1801_vm13, %v1800_v27, %v1795_v1  ;;  %v260_v32 = vld [vmem:[%s4371_s28 + $0x2e0] sm:$0xff]  ;;  %v274_v27 = vld [vmem:[%s4371_s28 + $0x350] sm:$0xff] }
  0xd8   : > { %v502_v12 = vpop.xlane.xlu1 %501  ;;  %v499_v9 = vpop.xlane.xlu0 %498  ;;  %v1855_v29 = vsel %vm1759_vm7, %v1854_v2, %v1850_v3  ;;  %v1807_v2 = vrot.slane %v4783_v37, %v4911_v42  ;;  %v262_v1 = vld [vmem:[%s4371_s28 + $0x2f0] sm:$0xff] }
  0xd9   : > { %v1859_v20 = vrot.slane %v499_v9, %v4845_v33  ;;  %v1864_v28 = vrot.slane %v502_v12, %v4859_v48  ;;  %v698_v12 = vsel %vm424_vm0, %v259_v61, 0.0  ;;  %v647_v9 = vsel %vm424_vm0, %v242_v0, 0.0 }
  0xda   : > { %v1809_v21 = vsel %vm1808_vm14, %v1807_v2, %v1802_v13  ;;  %v743_v0 = vsel %vm424_vm0, %v274_v27, 0.0  ;;  %v245_v2 = vld [vmem:[%s4371_s28 + $0x268] sm:$0xff] }
  0xdb   : > { %v1860_v11 = vsel %vm1766_vm8, %v1859_v20, %v1855_v29  ;;  %783 = vadd.xlane.f32.xlu1 %v782_v56  ;;  %732 = vadd.xlane.f32.xlu0 %v731_v10  ;;  %v1814_v56 = vrot.slane %v4781_v36, %v4928_v58  ;;  %v737_v29 = vsel %vm424_vm0, %v272_v16, 0.0  ;;  %v1262_v27 = vld [vmem:[%s6661_s1 + $0x228] sm:$0xff] }
  0xdc   : > { %v508_v35 = vpop.xlane.xlu1 %507  ;;  %v505_v38 = vpop.xlane.xlu0 %504  ;;  %v1865_v18 = vsel %vm1773_vm9, %v1864_v28, %v1860_v11  ;;  %v788_v28 = vsel %vm424_vm0, %v289_v14, 0.0 }
  0xdd   : > { %v1869_v44 = vrot.slane %v505_v38, %v4868_v51  ;;  %v1874_v49 = vrot.slane %v508_v35, %v4879_v4  ;;  %v1816_v11 = vsel %vm1815_vm15, %v1814_v56, %v1809_v21  ;;  %v243_v35 = vld [vmem:[%s4371_s28 + $0x258] sm:$0xff]  ;;  %v1274_v56 = vld [vmem:[%s6661_s1 + $0x288] sm:$0xff] }
  0xde   : > { %v650_v40 = vsel %vm424_vm0, %v243_v35, 0.0  ;;  %v1260_v35 = vld [vmem:[%s6661_s1 + $0x218] sm:$0xff] }
  0xdf   : > { %v1870_v5 = vsel %vm1780_vm10, %v1869_v44, %v1865_v18  ;;  %696 = vadd.xlane.f32.xlu1 %v695_v19  ;;  %645 = vadd.xlane.f32.xlu0 %v644_v39  ;;  %v701_v39 = vsel %vm424_vm0, %v260_v32, 0.0  ;;  %v273_v44 = vld [vmem:[%s4371_s28 + $0x348] sm:$0xff]  ;;  %v244_v18 = vld [vmem:[%s4371_s28 + $0x260] sm:$0xff]  ;;  %v1259_v32 = vld [vmem:[%s6661_s1 + $0x210] sm:$0xff] }
  0xe0   : > { %v514_v52 = vpop.xlane.xlu1 %513  ;;  %v511_v53 = vpop.xlane.xlu0 %510  ;;  %v1875_v26 = vsel %vm1787_vm11, %v1874_v49, %v1870_v5  ;;  %v740_v47 = vsel %vm424_vm0, %v273_v44, 0.0  ;;  %v261_v49 = vld [vmem:[%s4371_s28 + $0x2e8] sm:$0xff] }
  0xe1   : > { %v1879_v60 = vrot.slane %v511_v53, %v4884_v7  ;;  %v1884_v50 = vrot.slane %v514_v52, %v4902_v31  ;;  %v704_v53 = vsel %vm424_vm0, %v261_v49, 0.0  ;;  %v293_v49 = vld [vmem:[%s4371_s28 + $0x3e8] sm:$0xff] }
  0xe3   : > { %v1880_v3 = vsel %vm1794_vm12, %v1879_v60, %v1875_v26  ;;  %786 = vadd.xlane.f32.xlu1 %v785_v54  ;;  %735 = vadd.xlane.f32.xlu0 %v734_v55  ;;  %v653_v54 = vsel %vm424_vm0, %v244_v18, 0.0  ;;  %v291_v55 = vld [vmem:[%s4371_s28 + $0x3d8] sm:$0xff]  ;;  %v276_v18 = vld [vmem:[%s4371_s28 + $0x360] sm:$0xff] }
  0xe4   : > { %v520_v25 = vpop.xlane.xlu1 %519  ;;  %v517_v6 = vpop.xlane.xlu0 %516  ;;  %v1885_v20 = vsel %vm1801_vm13, %v1884_v50, %v1880_v3  ;;  %v794_v61 = vsel %vm424_vm0, %v291_v55, 0.0  ;;  %v707_v3 = vsel %vm424_vm0, %v262_v1, 0.0  ;;  %v1261_v55 = vld [vmem:[%s6661_s1 + $0x220] sm:$0xff] }
  0xe5   : > { %v1894_v37 = vrot.slane %v520_v25, %v4928_v58  ;;  %v1889_v10 = vrot.slane %v517_v6, %v4911_v42  ;;  %v656_v25 = vsel %vm424_vm0, %v245_v2, 0.0  ;;  %v292_v6 = vld [vmem:[%s4371_s28 + $0x3e0] sm:$0xff]  ;;  %v1306_v2 = vld [vmem:[%s6661_s1 + $0x388] sm:$0xff] }
  0xe6   : > { %v797_v21 = vsel %vm424_vm0, %v292_v6, 0.0  ;;  %v1305_v1 = vld [vmem:[%s6661_s1 + $0x380] sm:$0xff]  ;;  %v800_v6 = vsel %vm424_vm0, %v293_v49, 0.0  ;;  %v278_v49 = vld [vmem:[%s4371_s28 + $0x370] sm:$0xff] }
  0xe7   : > { %699 = vadd.xlane.f32.xlu1 %v698_v12  ;;  %648 = vadd.xlane.f32.xlu0 %v647_v9  ;;  %v1890_v22 = vsel %vm1808_vm14, %v1889_v10, %v1885_v20  ;;  %v275_v12 = vld [vmem:[%s4371_s28 + $0x358] sm:$0xff]  ;;  %v1273_v9 = vld [vmem:[%s6661_s1 + $0x280] sm:$0xff]  ;;  %v1258_v10 = vld [vmem:[%s6661_s1 + $0x208] sm:$0xff] }
  0xe8   : > { %v4951_v36 = vpop.xlane.xlu1 %525  ;;  %v4953_v63 = vpop.xlane.xlu0 %522  ;;  %v1895_v24 = vsel %vm1815_vm15, %v1894_v37, %v1890_v22  ;;  %v1257_v37 = vld [vmem:[%s6661_s1 + $0x200] sm:$0xff]  ;;  %v4002_v13 = vpack.c.bf16 %v1274_v56, %v1273_v9  ;;  %v746_v22 = vsel %vm424_vm0, %v275_v12, 0.0  ;;  %v749_v12 = vsel %vm424_vm0, %v276_v18, 0.0  ;;  %v294_v18 = vld [vmem:[%s4371_s28 + $0x3f0] sm:$0xff] }
  0xe9   : > { %3082 = vmatprep.mubr.f32.mxu0 %v1895_v24  ;;  %v4004_v14 = vpack.c.bf16 %v1258_v10, %v1257_v37  ;;  %v263_v24 = vld [vmem:[%s4371_s28 + $0x2f8] sm:$0xff]  ;;  %v4034_v9 = vpack.c.bf16 %v1306_v2, %v1305_v1  ;;  %v1903_v56 = vrot.slane %v4951_v36, %v4771_v30  ;;  %v1899_v37 = vrot.slane %v4953_v63, %v4778_v34  ;;  %v277_v10 = vld [vmem:[%s4371_s28 + $0x368] sm:$0xff]  ;;  %v1263_v63 = vld [vmem:[%s6661_s1 + $0x230] sm:$0xff] }
  0xea   : > { %3083 = vmatmul.mubr.f32.vlgmr.msra.gmra.mrb[0].mxu0 %v1816_v11  ;;  %4003 = vmatprep.subr.bf16.mxu0 %v4002_v13  ;;  %v1276_v11 = vld [vmem:[%s6661_s1 + $0x298] sm:$0xff]  ;;  %v1266_v1 = vld [vmem:[%s6661_s1 + $0x248] sm:$0xff] }
  0xeb   : > { %789 = vadd.xlane.f32.xlu1 %v788_v28  ;;  %738 = vadd.xlane.f32.xlu0 %v737_v29  ;;  %v246_v28 = vld [vmem:[%s4371_s28 + $0x270] sm:$0xff]  ;;  %v247_v13 = vld [vmem:[%s4371_s28 + $0x278] sm:$0xff] }
  0xec   : > { %v4961_v38 = vpop.xlane.xlu1 %531  ;;  %v4963_v19 = vpop.xlane.xlu0 %528  ;;  %v1275_v29 = vld [vmem:[%s6661_s1 + $0x290] sm:$0xff]  ;;  %4005 = vmatpush3.bf16.msra.mxu0 %v4004_v14  ;;  %4035 = vmatprep.subr.bf16.mxu1 %v4034_v9  ;;  %v1280_v36 = vld [vmem:[%s6661_s1 + $0x2b8] sm:$0xff]  ;;  %v803_v9 = vsel %vm424_vm0, %v294_v18, 0.0  ;;  %v313_v18 = vld [vmem:[%s4371_s28 + $0x488] sm:$0xff] }
  0xed   : > { %v1279_v14 = vld [vmem:[%s6661_s1 + $0x2b0] sm:$0xff] }
  0xef   : > { %702 = vadd.xlane.f32.xlu1 %v701_v39  ;;  %651 = vadd.xlane.f32.xlu0 %v650_v40  ;;  %v4006_v39 = vpack.c.bf16 %v1276_v11, %v1275_v29  ;;  %v4008_v40 = vpack.c.bf16 %v1260_v35, %v1259_v32  ;;  %v752_v35 = vsel %vm424_vm0, %v277_v10, 0.0 }
  0xf0   : > { %v4969_v45 = vpop.xlane.xlu1 %537  ;;  %v4971_v62 = vpop.xlane.xlu0 %534 }
  0xf1   : > { %4007 = vmatprep.subr.bf16.mxu0 %v4006_v39  ;;  %v662_v39 = vsel %vm424_vm0, %v247_v13, 0.0  ;;  %v279_v13 = vld [vmem:[%s4371_s28 + $0x378] sm:$0xff] }
  0xf2   : > { %4009 = vmatpush3.bf16.msra.mxu0 %v4008_v40  ;;  %v1904_v40 = vsel %vm1717_vm1, %v1903_v56, %v1899_v37  ;;  %v1923_v56 = vrot.slane %v4969_v45, %v4821_v8 }
  0xf3   : > { %792 = vadd.xlane.f32.xlu1 %v791_v17  ;;  %741 = vadd.xlane.f32.xlu0 %v740_v47  ;;  %v710_v17 = vsel %vm424_vm0, %v263_v24, 0.0  ;;  %v659_v47 = vsel %vm424_vm0, %v246_v28, 0.0  ;;  %v4014_v28 = vpack.c.bf16 %v1280_v36, %v1279_v14  ;;  %v295_v14 = vld [vmem:[%s4371_s28 + $0x3f8] sm:$0xff] }
  0xf4   : > { %v4977_v5 = vpop.xlane.xlu1 %543  ;;  %v4979_v52 = vpop.xlane.xlu0 %540 }
  0xf7   : > { %705 = vadd.xlane.f32.xlu1 %v704_v53  ;;  %654 = vadd.xlane.f32.xlu0 %v653_v54  ;;  %v1277_v53 = vld [vmem:[%s6661_s1 + $0x2a0] sm:$0xff]  ;;  %v1278_v54 = vld [vmem:[%s6661_s1 + $0x2a8] sm:$0xff] }
  0xf8   : > { %v4985_v57 = vpop.xlane.xlu1 %549  ;;  %v4987_v60 = vpop.xlane.xlu0 %546 }
  0xfb   : > { %795 = vadd.xlane.f32.xlu1 %v794_v61  ;;  %744 = vadd.xlane.f32.xlu0 %v743_v0  ;;  %v4010_v61 = vpack.c.bf16 %v1278_v54, %v1277_v53  ;;  %v4012_v0 = vpack.c.bf16 %v1262_v27, %v1261_v55  ;;  %v1281_v53 = vld [vmem:[%s6661_s1 + $0x2c0] sm:$0xff]  ;;  %v1918_v55 = vrot.slane %v4971_v62, %v4810_v59 }
  0xfc   : > { %v4993_v50 = vpop.xlane.xlu1 %555  ;;  %v4995_v26 = vpop.xlane.xlu0 %552 }
  0xfd   : > { %4011 = vmatprep.subr.bf16.mxu0 %v4010_v61 }
  0xfe   : > { %4013 = vmatpush3.bf16.msra.mxu0 %v4012_v0  ;;  %v1265_v0 = vld [vmem:[%s6661_s1 + $0x240] sm:$0xff] }
  0xff   : > { %708 = vadd.xlane.f32.xlu1 %v707_v3  ;;  %657 = vadd.xlane.f32.xlu0 %v656_v25 }
 0x100   : > { %v5013_v16 = vpop.xlane.xlu1 %561  ;;  %v5015_v20 = vpop.xlane.xlu0 %558  ;;  %4015 = vmatprep.subr.bf16.mxu0 %v4014_v28  ;;  %v1268_v28 = vld [vmem:[%s6661_s1 + $0x258] sm:$0xff] }
 0x103   : > { %798 = vadd.xlane.f32.xlu1 %v797_v21  ;;  %747 = vadd.xlane.f32.xlu0 %v746_v22  ;;  %v1908_v21 = vrot.slane %v4963_v19, %v4792_v43  ;;  %v1264_v19 = vld [vmem:[%s6661_s1 + $0x238] sm:$0xff] }
 0x104   : > { %v5033_v41 = vpop.xlane.xlu1 %567  ;;  %v5035_v44 = vpop.xlane.xlu0 %564  ;;  %v4016_v29 = vpack.c.bf16 %v1264_v19, %v1263_v63  ;;  %v1284_v63 = vld [vmem:[%s6661_s1 + $0x2d8] sm:$0xff]  ;;  %v1267_v19 = vld [vmem:[%s6661_s1 + $0x250] sm:$0xff] }
 0x105   : > { %v1909_v54 = vsel %vm1724_vm2, %v1908_v21, %v1904_v40  ;;  %v1283_v21 = vld [vmem:[%s6661_s1 + $0x2d0] sm:$0xff]  ;;  %v806_v40 = vsel %vm424_vm0, %v295_v14, 0.0 }
 0x106   : > { %4017 = vmatpush3.bf16.msra.mxu0 %v4016_v29  ;;  %v4022_v29 = vpack.c.bf16 %v1284_v63, %v1283_v21  ;;  %v1287_v14 = vld [vmem:[%s6661_s1 + $0x2f0] sm:$0xff]  ;;  %v1272_v63 = vld [vmem:[%s6661_s1 + $0x278] sm:$0xff] }
 0x107   : > { %711 = vadd.xlane.f32.xlu1 %v710_v17  ;;  %660 = vadd.xlane.f32.xlu0 %v659_v47  ;;  %v1913_v17 = vrot.slane %v4961_v38, %v4798_v46  ;;  %v1282_v38 = vld [vmem:[%s6661_s1 + $0x2c8] sm:$0xff] }
 0x108   : > { %v574_v3 = vpop.xlane.xlu1 %573  ;;  %v571_v25 = vpop.xlane.xlu0 %570  ;;  %v4018_v2 = vpack.c.bf16 %v1282_v38, %v1281_v53  ;;  %v312_v53 = vld [vmem:[%s4371_s28 + $0x480] sm:$0xff]  ;;  %v1286_v38 = vld [vmem:[%s6661_s1 + $0x2e8] sm:$0xff] }
 0x109   : > { %v1982_v22 = vrot.slane %v574_v3, %v4771_v30  ;;  %v1978_v24 = vrot.slane %v571_v25, %v4778_v34  ;;  %v4020_v3 = vpack.c.bf16 %v1266_v1, %v1265_v0  ;;  %v1914_v37 = vsel %vm1731_vm3, %v1913_v17, %v1909_v54  ;;  %v1285_v54 = vld [vmem:[%s6661_s1 + $0x2e0] sm:$0xff]  ;;  %v1270_v1 = vld [vmem:[%s6661_s1 + $0x268] sm:$0xff] }
 0x10a   : > { %4019 = vmatprep.subr.bf16.mxu0 %v4018_v2  ;;  %v1933_v17 = vrot.slane %v4977_v5, %v4837_v23  ;;  %v1269_v0 = vld [vmem:[%s6661_s1 + $0x260] sm:$0xff] }
 0x10b   : > { %801 = vadd.xlane.f32.xlu1 %v800_v6  ;;  %750 = vadd.xlane.f32.xlu0 %v749_v12  ;;  %v1983_v27 = vsel %vm1717_vm1, %v1982_v22, %v1978_v24  ;;  %v755_v12 = vsel %vm424_vm0, %v278_v49, 0.0  ;;  %v1919_v22 = vsel %vm1738_vm4, %v1918_v55, %v1914_v37  ;;  %v1928_v24 = vrot.slane %v4979_v52, %v4830_v15 }
 0x10c   : > { %v580_v11 = vpop.xlane.xlu1 %579  ;;  %v577_v32 = vpop.xlane.xlu0 %576  ;;  %4021 = vmatpush3.bf16.msra.mxu0 %v4020_v3  ;;  %v4028_v2 = vpack.c.bf16 %v1270_v1, %v1269_v0  ;;  %v344_v1 = vld [vmem:[%s4371_s28 + $0x580] sm:$0xff] }
 0x10d   : > { %v1987_v47 = vrot.slane %v577_v32, %v4792_v43  ;;  %v1992_v61 = vrot.slane %v580_v11, %v4798_v46  ;;  %v4024_v11 = vpack.c.bf16 %v1268_v28, %v1267_v19  ;;  %4023 = vmatprep.subr.bf16.mxu0 %v4022_v29 }
 0x10f   : > { %v1988_v62 = vsel %vm1724_vm2, %v1987_v47, %v1983_v27  ;;  %753 = vadd.xlane.f32.xlu1 %v752_v35  ;;  %663 = vadd.xlane.f32.xlu0 %v662_v39  ;;  %v758_v39 = vsel %vm424_vm0, %v279_v13, 0.0  ;;  %v1924_v47 = vsel %vm1745_vm5, %v1923_v56, %v1919_v22  ;;  %v1938_v27 = vrot.slane %v4987_v60, %v4845_v33  ;;  %v296_v13 = vld [vmem:[%s4371_s28 + $0x400] sm:$0xff] }
 0x110   : > { %v586_v25 = vpop.xlane.xlu1 %585  ;;  %v583_v6 = vpop.xlane.xlu0 %582  ;;  %v1993_v45 = vsel %vm1731_vm3, %v1992_v61, %v1988_v62  ;;  %v1929_v55 = vsel %vm1752_vm6, %v1928_v24, %v1924_v47  ;;  %4025 = vmatpush3.bf16.msra.mxu0 %v4024_v11  ;;  %v4026_v62 = vpack.c.bf16 %v1286_v38, %v1285_v54  ;;  %v1948_v22 = vrot.slane %v4995_v26, %v4868_v51  ;;  %v314_v47 = vld [vmem:[%s4371_s28 + $0x490] sm:$0xff] }
 0x111   : > { %v1997_v10 = vrot.slane %v583_v6, %v4810_v59  ;;  %v2002_v36 = vrot.slane %v586_v25, %v4821_v8  ;;  %v860_v6 = vsel %vm424_vm0, %v313_v18, 0.0  ;;  %v1934_v56 = vsel %vm1759_vm7, %v1933_v17, %v1929_v55  ;;  %v298_v17 = vld [vmem:[%s4371_s28 + $0x410] sm:$0xff] }
 0x112   : > { %4027 = vmatprep.subr.bf16.mxu0 %v4026_v62  ;;  %v1939_v21 = vsel %vm1766_vm8, %v1938_v27, %v1934_v56  ;;  %v1958_v18 = vrot.slane %v5015_v20, %v4884_v7  ;;  %v1963_v38 = vrot.slane %v5013_v16, %v4902_v31 }
 0x113   : > { %v1998_v52 = vsel %vm1738_vm4, %v1997_v10, %v1993_v45  ;;  %756 = vadd.xlane.f32.xlu1 %v755_v12  ;;  %804 = vadd.xlane.f32.xlu0 %v803_v9  ;;  %v857_v12 = vsel %vm424_vm0, %v312_v53, 0.0  ;;  %v1943_v9 = vrot.slane %v4985_v57, %v4859_v48  ;;  %v297_v10 = vld [vmem:[%s4371_s28 + $0x408] sm:$0xff]  ;;  %v1271_v45 = vld [vmem:[%s6661_s1 + $0x270] sm:$0xff] }
 0x114   : > { %v592_v32 = vpop.xlane.xlu1 %591  ;;  %v589_v35 = vpop.xlane.xlu0 %588  ;;  %v2003_v5 = vsel %vm1745_vm5, %v2002_v36, %v1998_v52  ;;  %4029 = vmatpush3.bf16.msra.mxu0 %v4028_v2  ;;  %v1288_v36 = vld [vmem:[%s6661_s1 + $0x2f8] sm:$0xff]  ;;  %v4032_v28 = vpack.c.bf16 %v1272_v63, %v1271_v45  ;;  %v812_v11 = vsel %vm424_vm0, %v297_v10, 0.0  ;;  %v1968_v2 = vrot.slane %v5035_v44, %v4911_v42 }
 0x115   : > { %v2007_v49 = vrot.slane %v589_v35, %v4830_v15  ;;  %v2012_v61 = vrot.slane %v592_v32, %v4837_v23  ;;  %v4030_v19 = vpack.c.bf16 %v1288_v36, %v1287_v14  ;;  %v809_v32 = vsel %vm424_vm0, %v296_v13, 0.0  ;;  %v1307_v36 = vld [vmem:[%s6661_s1 + $0x390] sm:$0xff]  ;;  %v1308_v45 = vld [vmem:[%s6661_s1 + $0x398] sm:$0xff] }
 0x116   : > { %v1953_v35 = vrot.slane %v4993_v50, %v4879_v4  ;;  %v1973_v10 = vrot.slane %v5033_v41, %v4928_v58 }
 0x117   : > { %v2008_v60 = vsel %vm1752_vm6, %v2007_v49, %v2003_v5  ;;  %759 = vadd.xlane.f32.xlu1 %v758_v39  ;;  %807 = vadd.xlane.f32.xlu0 %v806_v40  ;;  %v1944_v39 = vsel %vm1773_vm9, %v1943_v9, %v1939_v21  ;;  %v863_v5 = vsel %vm424_vm0, %v314_v47, 0.0  ;;  %v953_v9 = vsel %vm424_vm0, %v344_v1, 0.0  ;;  %v345_v21 = vld [vmem:[%s4371_s28 + $0x588] sm:$0xff] }
 0x118   : > { %v598_v3 = vpop.xlane.xlu1 %597  ;;  %v595_v25 = vpop.xlane.xlu0 %594  ;;  %v2013_v57 = vsel %vm1759_vm7, %v2012_v61, %v2008_v60  ;;  %4031 = vmatprep.subr.bf16.mxu0 %v4030_v19  ;;  %v1949_v49 = vsel %vm1780_vm10, %v1948_v22, %v1944_v39  ;;  %v815_v61 = vsel %vm424_vm0, %v298_v17, 0.0  ;;  %v315_v60 = vld [vmem:[%s4371_s28 + $0x498] sm:$0xff]  ;;  %v1289_v22 = vld [vmem:[%s6661_s1 + $0x300] sm:$0xff]  ;;  %v4038_v47 = vpack.c.bf16 %v1308_v45, %v1307_v36  ;;  %v1314_v45 = vld [vmem:[%s6661_s1 + $0x3c8] sm:$0xff] }
 0x119   : > { %v2017_v37 = vrot.slane %v595_v25, %v4845_v33  ;;  %v2022_v24 = vrot.slane %v598_v3, %v4859_v48  ;;  %4033 = vmatpush3.bf16.msra.mxu0 %v4032_v28  ;;  %v1954_v20 = vsel %vm1787_vm11, %v1953_v35, %v1949_v49  ;;  %v866_v56 = vsel %vm424_vm0, %v315_v60, 0.0  ;;  %v316_v17 = vld [vmem:[%s4371_s28 + $0x4a0] sm:$0xff]  ;;  %v1291_v49 = vld [vmem:[%s6661_s1 + $0x310] sm:$0xff]  ;;  %v329_v60 = vld [vmem:[%s4371_s28 + $0x508] sm:$0xff] }
 0x11a   : > { %v1959_v62 = vsel %vm1794_vm12, %v1958_v18, %v1954_v20  ;;  %v1292_v18 = vld [vmem:[%s6661_s1 + $0x318] sm:$0xff]  ;;  %v1313_v36 = vld [vmem:[%s6661_s1 + $0x3c0] sm:$0xff] }
 0x11b   : > { %v2018_v26 = vsel %vm1766_vm8, %v2017_v37, %v2013_v57  ;;  %861 = vadd.xlane.f32.xlu1 %v860_v6  ;;  %858 = vadd.xlane.f32.xlu0 %v857_v12  ;;  %v299_v37 = vld [vmem:[%s4371_s28 + $0x418] sm:$0xff]  ;;  %v1964_v14 = vsel %vm1801_vm13, %v1963_v38, %v1959_v62  ;;  %v346_v38 = vld [vmem:[%s4371_s28 + $0x590] sm:$0xff]  ;;  %v4040_v20 = vpack.c.bf16 %v1292_v18, %v1291_v49  ;;  %v1298_v49 = vld [vmem:[%s6661_s1 + $0x348] sm:$0xff] }
 0x11c   : > { %v604_v52 = vpop.xlane.xlu1 %603  ;;  %v601_v29 = vpop.xlane.xlu0 %600  ;;  %v2023_v54 = vsel %vm1773_vm9, %v2022_v24, %v2018_v26  ;;  %v1290_v24 = vld [vmem:[%s6661_s1 + $0x308] sm:$0xff]  ;;  %v1969_v41 = vsel %vm1808_vm14, %v1968_v2, %v1964_v14  ;;  %v1293_v2 = vld [vmem:[%s6661_s1 + $0x320] sm:$0xff]  ;;  %v1315_v18 = vld [vmem:[%s6661_s1 + $0x3d0] sm:$0xff] }
 0x11d   : > { %v2027_v40 = vrot.slane %v601_v29, %v4868_v51  ;;  %v2032_v53 = vrot.slane %v604_v52, %v4879_v4  ;;  %v818_v52 = vsel %vm424_vm0, %v299_v37, 0.0  ;;  %v956_v29 = vsel %vm424_vm0, %v345_v21, 0.0 }
 0x11e   : > { %v959_v37 = vsel %vm424_vm0, %v346_v38, 0.0 }
 0x11f   : > { %v2028_v50 = vsel %vm1780_vm10, %v2027_v40, %v2023_v54  ;;  %813 = vadd.xlane.f32.xlu1 %v812_v11  ;;  %810 = vadd.xlane.f32.xlu0 %v809_v32  ;;  %v328_v11 = vld [vmem:[%s4371_s28 + $0x500] sm:$0xff]  ;;  %v4036_v32 = vpack.c.bf16 %v1290_v24, %v1289_v22  ;;  %v1974_v40 = vsel %vm1815_vm15, %v1973_v10, %v1969_v41  ;;  %v1310_v54 = vld [vmem:[%s6661_s1 + $0x3a8] sm:$0xff]  ;;  %v908_v10 = vsel %vm424_vm0, %v329_v60, 0.0  ;;  %v1296_v41 = vld [vmem:[%s6661_s1 + $0x338] sm:$0xff] }
 0x120   : > { %v610_v55 = vpop.xlane.xlu1 %609  ;;  %v607_v27 = vpop.xlane.xlu0 %606  ;;  %v2033_v25 = vsel %vm1787_vm11, %v2032_v53, %v2028_v50  ;;  %v1309_v53 = vld [vmem:[%s6661_s1 + $0x3a0] sm:$0xff] }
 0x121   : > { %v2037_v0 = vrot.slane %v607_v27, %v4884_v7  ;;  %v2042_v3 = vrot.slane %v610_v55, %v4902_v31  ;;  %v4042_v62 = vpack.c.bf16 %v1310_v54, %v1309_v53  ;;  %v300_v22 = vld [vmem:[%s4371_s28 + $0x420] sm:$0xff]  ;;  %v1316_v53 = vld [vmem:[%s6661_s1 + $0x3d8] sm:$0xff] }
 0x122   : > { %v4054_v60 = vpack.c.bf16 %v1316_v53, %v1315_v18 }
 0x123   : > { %v2038_v6 = vsel %vm1794_vm12, %v2037_v0, %v2033_v25  ;;  %816 = vadd.xlane.f32.xlu1 %v815_v61  ;;  %864 = vadd.xlane.f32.xlu0 %v863_v5  ;;  %v905_v61 = vsel %vm424_vm0, %v328_v11, 0.0  ;;  %v869_v5 = vsel %vm424_vm0, %v316_v17, 0.0  ;;  %v1311_v25 = vld [vmem:[%s6661_s1 + $0x3b0] sm:$0xff]  ;;  %v4050_v17 = vpack.c.bf16 %v1314_v45, %v1313_v36  ;;  %v1320_v36 = vld [vmem:[%s6661_s1 + $0x3f8] sm:$0xff] }
 0x124   : > { %v616_v16 = vpop.xlane.xlu1 %615  ;;  %v613_v12 = vpop.xlane.xlu0 %612  ;;  %v2043_v57 = vsel %vm1801_vm13, %v2042_v3, %v2038_v6  ;;  %v1294_v3 = vld [vmem:[%s6661_s1 + $0x328] sm:$0xff]  ;;  %v1312_v6 = vld [vmem:[%s6661_s1 + $0x3b8] sm:$0xff] }
 0x125   : > { %v2052_v44 = vrot.slane %v616_v16, %v4928_v58  ;;  %v2047_v13 = vrot.slane %v613_v12, %v4911_v42  ;;  %v4046_v24 = vpack.c.bf16 %v1312_v6, %v1311_v25  ;;  %v1318_v25 = vld [vmem:[%s6661_s1 + $0x3e8] sm:$0xff] }
 0x127   : > { %954 = vadd.xlane.f32.xlu1 %v953_v9  ;;  %867 = vadd.xlane.f32.xlu0 %v866_v56  ;;  %v2048_v63 = vsel %vm1808_vm14, %v2047_v13, %v2043_v57  ;;  %v4044_v13 = vpack.c.bf16 %v1294_v3, %v1293_v2  ;;  %v1295_v57 = vld [vmem:[%s6661_s1 + $0x330] sm:$0xff]  ;;  %v1300_v2 = vld [vmem:[%s6661_s1 + $0x358] sm:$0xff]  ;;  %v1317_v3 = vld [vmem:[%s6661_s1 + $0x3e0] sm:$0xff] }
 0x128   : > { %v622_v26 = vpop.xlane.xlu1 %621  ;;  %v619_v19 = vpop.xlane.xlu0 %618  ;;  %v2053_v28 = vsel %vm1815_vm15, %v2052_v44, %v2048_v63  ;;  %v317_v44 = vld [vmem:[%s4371_s28 + $0x4a8] sm:$0xff] }
 0x129   : > { %v2061_v35 = vrot.slane %v622_v26, %v4771_v30  ;;  %v2057_v39 = vrot.slane %v619_v19, %v4778_v34  ;;  %3152 = vmatprep.mubr.f32.mxu1 %v2053_v28  ;;  %v872_v28 = vsel %vm424_vm0, %v317_v44, 0.0 }
 0x12a   : > { %3153 = vmatmul.mubr.f32.vlgmr.msra.gmra.mrb[0].mxu1 %v1974_v40  ;;  %v330_v40 = vld [vmem:[%s4371_s28 + $0x510] sm:$0xff] }
 0x12b   : > { %v2062_v50 = vsel %vm1717_vm1, %v2061_v35, %v2057_v39  ;;  %819 = vadd.xlane.f32.xlu1 %v818_v52  ;;  %957 = vadd.xlane.f32.xlu0 %v956_v29  ;;  %v821_v52 = vsel %vm424_vm0, %v300_v22, 0.0  ;;  %v347_v29 = vld [vmem:[%s4371_s28 + $0x598] sm:$0xff]  ;;  %v4058_v22 = vpack.c.bf16 %v1318_v25, %v1317_v3 }
 0x12c   : > { %v628_v55 = vpop.xlane.xlu1 %627  ;;  %v625_v27 = vpop.xlane.xlu0 %624  ;;  %4037 = vmatpush3.bf16.msra.mxu1 %v4036_v32  ;;  %v4048_v32 = vpack.c.bf16 %v1296_v41, %v1295_v57  ;;  %v1302_v57 = vld [vmem:[%s6661_s1 + $0x368] sm:$0xff]  ;;  %v1319_v41 = vld [vmem:[%s6661_s1 + $0x3f0] sm:$0xff] }
 0x12d   : > { %v2071_v0 = vrot.slane %v628_v55, %v4798_v46  ;;  %v2066_v1 = vrot.slane %v625_v27, %v4792_v43  ;;  %4039 = vmatprep.subr.bf16.mxu1 %v4038_v47  ;;  %v1297_v47 = vld [vmem:[%s6661_s1 + $0x340] sm:$0xff]  ;;  %v962_v27 = vsel %vm424_vm0, %v347_v29, 0.0 }
 0x12e   : > { %v4052_v38 = vpack.c.bf16 %v1298_v49, %v1297_v47 }
 0x12f   : > { %v2067_v16 = vsel %vm1724_vm2, %v2066_v1, %v2062_v50  ;;  %906 = vadd.xlane.f32.xlu1 %v905_v61  ;;  %870 = vadd.xlane.f32.xlu0 %v869_v5  ;;  %v911_v61 = vsel %vm424_vm0, %v330_v40, 0.0  ;;  %v318_v5 = vld [vmem:[%s4371_s28 + $0x4b0] sm:$0xff]  ;;  %v301_v1 = vld [vmem:[%s4371_s28 + $0x428] sm:$0xff] }
 0x130   : > { %v634_v12 = vpop.xlane.xlu1 %633  ;;  %v2072_v9 = vsel %vm1731_vm3, %v2071_v0, %v2067_v16  ;;  %v631_v56 = vpop.xlane.xlu0 %630  ;;  %4041 = vmatpush3.bf16.msra.mxu1 %v4040_v20  ;;  %v1303_v40 = vld [vmem:[%s6661_s1 + $0x370] sm:$0xff] }
 0x131   : > { %v2081_v14 = vrot.slane %v634_v12, %v4821_v8  ;;  %v2076_v21 = vrot.slane %v631_v56, %v4810_v59  ;;  %4043 = vmatprep.subr.bf16.mxu1 %v4042_v62  ;;  %v1299_v62 = vld [vmem:[%s6661_s1 + $0x350] sm:$0xff]  ;;  %v824_v56 = vsel %vm424_vm0, %v301_v1, 0.0 }
 0x132   : > { %v4056_v44 = vpack.c.bf16 %v1300_v2, %v1299_v62 }
 0x133   : > { %v2077_v63 = vsel %vm1738_vm4, %v2076_v21, %v2072_v9  ;;  %960 = vadd.xlane.f32.xlu1 %v959_v37  ;;  %909 = vadd.xlane.f32.xlu0 %v908_v10  ;;  %v875_v9 = vsel %vm424_vm0, %v318_v5, 0.0  ;;  %v348_v10 = vld [vmem:[%s4371_s28 + $0x5a0] sm:$0xff]  ;;  %v331_v21 = vld [vmem:[%s4371_s28 + $0x518] sm:$0xff]  ;;  %v349_v5 = vld [vmem:[%s4371_s28 + $0x5a8] sm:$0xff] }
 0x134   : > { %v670_v26 = vpop.xlane.xlu1 %669  ;;  %v667_v19 = vpop.xlane.xlu0 %666  ;;  %v5303_v11 = vsel %vm1745_vm5, %v2081_v14, %v2077_v63  ;;  %4045 = vmatpush3.bf16.msra.mxu1 %v4044_v13  ;;  %v968_v62 = vsel %vm424_vm0, %v349_v5, 0.0 }
 0x135   : > { %v2140_v35 = vrot.slane %v670_v26, %v4771_v30  ;;  %v2136_v39 = vrot.slane %v667_v19, %v4778_v34  ;;  %4047 = vmatprep.subr.bf16.mxu1 %v4046_v24  ;;  %v1301_v24 = vld [vmem:[%s6661_s1 + $0x360] sm:$0xff]  ;;  %v965_v19 = vsel %vm424_vm0, %v348_v10, 0.0 }
 0x136   : > { %v4060_v29 = vpack.c.bf16 %v1302_v57, %v1301_v24 }
 0x137   : > { %v2141_v54 = vsel %vm1717_vm1, %v2140_v35, %v2136_v39  ;;  %873 = vadd.xlane.f32.xlu1 %v872_v28  ;;  %822 = vadd.xlane.f32.xlu0 %v821_v52  ;;  %v914_v28 = vsel %vm424_vm0, %v331_v21, 0.0  ;;  %v319_v52 = vld [vmem:[%s4371_s28 + $0x4b8] sm:$0xff]  ;;  %v302_v35 = vld [vmem:[%s4371_s28 + $0x430] sm:$0xff]  ;;  %v4062_v39 = vpack.c.bf16 %v1320_v36, %v1319_v41  ;;  %v333_v21 = vld [vmem:[%s4371_s28 + $0x528] sm:$0xff] }
 0x138   : > { %v676_v50 = vpop.xlane.xlu1 %675  ;;  %v673_v55 = vpop.xlane.xlu0 %672  ;;  %4049 = vmatpush3.bf16.msra.mxu1 %v4048_v32  ;;  %v878_v53 = vsel %vm424_vm0, %v319_v52, 0.0  ;;  %v920_v36 = vsel %vm424_vm0, %v333_v21, 0.0  ;;  %v336_v21 = vld [vmem:[%s4371_s28 + $0x540] sm:$0xff] }
 0x139   : > { %v2150_v20 = vrot.slane %v676_v50, %v4798_v46  ;;  %v2145_v0 = vrot.slane %v673_v55, %v4792_v43  ;;  %4051 = vmatprep.subr.bf16.mxu1 %v4050_v17  ;;  %v1304_v17 = vld [vmem:[%s6661_s1 + $0x378] sm:$0xff] }
 0x13a   : > { %v4064_v50 = vpack.c.bf16 %v1304_v17, %v1303_v40  ;;  %v351_v40 = vld [vmem:[%s4371_s28 + $0x5b8] sm:$0xff]  ;;  %v334_v17 = vld [vmem:[%s4371_s28 + $0x530] sm:$0xff] }
 0x13b   : > { %v2146_v6 = vsel %vm1724_vm2, %v2145_v0, %v2141_v54  ;;  %963 = vadd.xlane.f32.xlu1 %v962_v27  ;;  %912 = vadd.xlane.f32.xlu0 %v911_v61  ;;  %v827_v54 = vsel %vm424_vm0, %v302_v35, 0.0 }
 0x13c   : > { %v766_v16 = vpop.xlane.xlu1 %765  ;;  %v763_v12 = vpop.xlane.xlu0 %762  ;;  %v2151_v37 = vsel %vm1731_vm3, %v2150_v20, %v2146_v6  ;;  %4053 = vmatpush3.bf16.msra.mxu1 %v4052_v38  ;;  %v332_v38 = vld [vmem:[%s4371_s28 + $0x520] sm:$0xff] }
 0x13d   : > { %v2298_v13 = vrot.slane %v766_v16, %v4771_v30  ;;  %v2294_v14 = vrot.slane %v763_v12, %v4778_v34  ;;  %4055 = vmatprep.subr.bf16.mxu1 %v4054_v60  ;;  %v917_v2 = vsel %vm424_vm0, %v332_v38, 0.0  ;;  %v320_v6 = vld [vmem:[%s4371_s28 + $0x4c0] sm:$0xff]  ;;  %v303_v16 = vld [vmem:[%s4371_s28 + $0x438] sm:$0xff] }
 0x13e   : > { %v881_v10 = vsel %vm424_vm0, %v320_v6, 0.0 }
 0x13f   : > { %v2299_v45 = vsel %vm1717_vm1, %v2298_v13, %v2294_v14  ;;  %876 = vadd.xlane.f32.xlu1 %v875_v9  ;;  %825 = vadd.xlane.f32.xlu0 %v824_v56  ;;  %v350_v14 = vld [vmem:[%s4371_s28 + $0x5b0] sm:$0xff] }
 0x140   : > { %v715_v63 = vpop.xlane.xlu1 %714  ;;  %v679_v26 = vpop.xlane.xlu0 %678  ;;  %4057 = vmatpush3.bf16.msra.mxu1 %v4056_v44  ;;  %v830_v44 = vsel %vm424_vm0, %v303_v16, 0.0  ;;  %v971_v41 = vsel %vm424_vm0, %v350_v14, 0.0  ;;  %v323_v16 = vld [vmem:[%s4371_s28 + $0x4d8] sm:$0xff]  ;;  %v353_v14 = vld [vmem:[%s4371_s28 + $0x5c8] sm:$0xff] }
 0x141   : > { %v2155_v32 = vrot.slane %v679_v26, %v4810_v59  ;;  %4059 = vmatprep.subr.bf16.mxu1 %v4058_v22  ;;  %v2215_v55 = vrot.slane %v715_v63, %v4778_v34  ;;  %v321_v26 = vld [vmem:[%s4371_s28 + $0x4c8] sm:$0xff] }
 0x142   : > { %v884_v35 = vsel %vm424_vm0, %v321_v26, 0.0 }
 0x143   : > { %v2156_v47 = vsel %vm1738_vm4, %v2155_v32, %v2151_v37  ;;  %966 = vadd.xlane.f32.xlu1 %v965_v19  ;;  %915 = vadd.xlane.f32.xlu0 %v914_v28  ;;  %v304_v19 = vld [vmem:[%s4371_s28 + $0x440] sm:$0xff] }
 0x144   : > { %v769_v49 = vpop.xlane.xlu1 %768  ;;  %v718_v18 = vpop.xlane.xlu0 %717  ;;  %4061 = vmatpush3.bf16.msra.mxu1 %v4060_v29 }
 0x145   : > { %v2303_v27 = vrot.slane %v769_v49, %v4792_v43  ;;  %v2219_v61 = vrot.slane %v718_v18, %v4771_v30  ;;  %4063 = vmatprep.subr.bf16.mxu1 %v4062_v39  ;;  %v833_v39 = vsel %vm424_vm0, %v304_v19, 0.0  ;;  %v974_v18 = vsel %vm424_vm0, %v351_v40, 0.0 }
 0x147   : > { %v2304_v20 = vsel %vm1724_vm2, %v2303_v27, %v2299_v45  ;;  %v2220_v0 = vsel %vm1717_vm1, %v2219_v61, %v2215_v55  ;;  %879 = vadd.xlane.f32.xlu1 %v878_v53  ;;  %828 = vadd.xlane.f32.xlu0 %v827_v54  ;;  %v923_v53 = vsel %vm424_vm0, %v334_v17, 0.0  ;;  %v322_v55 = vld [vmem:[%s4371_s28 + $0x4d0] sm:$0xff]  ;;  %v305_v27 = vld [vmem:[%s4371_s28 + $0x448] sm:$0xff] }
 0x148   : > { %v721_v1 = vpop.xlane.xlu1 %720  ;;  %v682_v60 = vpop.xlane.xlu0 %681  ;;  %4065 = vmatpush3.bf16.msra.mxu1 %v4064_v50 }
 0x149   : > { %v2224_v3 = vrot.slane %v721_v1, %v4792_v43  ;;  %v2160_v25 = vrot.slane %v682_v60, %v4821_v8  ;;  %v836_v1 = vsel %vm424_vm0, %v305_v27, 0.0  ;;  %v352_v60 = vld [vmem:[%s4371_s28 + $0x5c0] sm:$0xff]  ;;  %v355_v27 = vld [vmem:[%s4371_s28 + $0x5d8] sm:$0xff] }
 0x14b   : > { %v2225_v12 = vsel %vm1724_vm2, %v2224_v3, %v2220_v0  ;;  %v5389_v9 = vsel %vm1745_vm5, %v2160_v25, %v2156_v47  ;;  %969 = vadd.xlane.f32.xlu1 %v968_v62  ;;  %918 = vadd.xlane.f32.xlu0 %v917_v2  ;;  %v887_v0 = vsel %vm424_vm0, %v322_v55, 0.0  ;;  %v335_v62 = vld [vmem:[%s4371_s28 + $0x538] sm:$0xff]  ;;  %v977_v25 = vsel %vm424_vm0, %v352_v60, 0.0 }
 0x14c   : > { %v5391_v56 = vpop.xlane.xlu1 %684  ;;  %v772_v37 = vpop.xlane.xlu0 %771  ;;  %v926_v6 = vsel %vm424_vm0, %v335_v62, 0.0  ;;  %v986_v62 = vsel %vm424_vm0, %v355_v27, 0.0  ;;  %v357_v27 = vld [vmem:[%s4371_s28 + $0x5e8] sm:$0xff] }
 0x14d   : > { %v2308_v13 = vrot.slane %v772_v37, %v4798_v46 }
 0x14f   : > { %v2309_v22 = vsel %vm1731_vm3, %v2308_v13, %v2304_v20  ;;  %882 = vadd.xlane.f32.xlu1 %v881_v10  ;;  %831 = vadd.xlane.f32.xlu0 %v830_v44  ;;  %v890_v44 = vsel %vm424_vm0, %v323_v16, 0.0  ;;  %v309_v16 = vld [vmem:[%s4371_s28 + $0x468] sm:$0xff] }
 0x150   : > { %v775_v24 = vpop.xlane.xlu1 %774  ;;  %v724_v57 = vpop.xlane.xlu0 %723 }
 0x151   : > { %v2313_v45 = vrot.slane %v775_v24, %v4810_v59  ;;  %v2229_v63 = vrot.slane %v724_v57, %v4798_v46  ;;  %v980_v57 = vsel %vm424_vm0, %v353_v14, 0.0  ;;  %v848_v14 = vsel %vm424_vm0, %v309_v16, 0.0 }
 0x153   : > { %v2314_v28 = vsel %vm1738_vm4, %v2313_v45, %v2309_v22  ;;  %v2230_v52 = vsel %vm1731_vm3, %v2229_v63, %v2225_v12  ;;  %972 = vadd.xlane.f32.xlu1 %v971_v41  ;;  %921 = vadd.xlane.f32.xlu0 %v920_v36  ;;  %v306_v12 = vld [vmem:[%s4371_s28 + $0x450] sm:$0xff]  ;;  %v929_v41 = vsel %vm424_vm0, %v336_v21, 0.0  ;;  %v324_v36 = vld [vmem:[%s4371_s28 + $0x4e0] sm:$0xff]  ;;  %v307_v45 = vld [vmem:[%s4371_s28 + $0x458] sm:$0xff] }
 0x154   : > { %v5407_v29 = vpop.xlane.xlu1 %687  ;;  %v5409_v32 = vpop.xlane.xlu0 %636  ;;  %v839_v13 = vsel %vm424_vm0, %v306_v12, 0.0  ;;  %v893_v19 = vsel %vm424_vm0, %v324_v36, 0.0  ;;  %v356_v21 = vld [vmem:[%s4371_s28 + $0x5e0] sm:$0xff]  ;;  %v1338_v36 = vld [vmem:[%s6661_s1 + $0x488] sm:$0xff] }
 0x157   : > { %885 = vadd.xlane.f32.xlu1 %v884_v35  ;;  %834 = vadd.xlane.f32.xlu0 %v833_v39  ;;  %v337_v35 = vld [vmem:[%s4371_s28 + $0x548] sm:$0xff] }
 0x158   : > { %v778_v47 = vpop.xlane.xlu1 %777  ;;  %v727_v49 = vpop.xlane.xlu0 %726 }
 0x159   : > { %v2318_v54 = vrot.slane %v778_v47, %v4821_v8  ;;  %v2234_v50 = vrot.slane %v727_v49, %v4810_v59  ;;  %v932_v47 = vsel %vm424_vm0, %v337_v35, 0.0  ;;  %v325_v49 = vld [vmem:[%s4371_s28 + $0x4e8] sm:$0xff] }
 0x15b   : > { %v5422_v61 = vsel %vm1745_vm5, %v2318_v54, %v2314_v28  ;;  %v5425_v5 = vsel %vm1738_vm4, %v2234_v50, %v2230_v52  ;;  %975 = vadd.xlane.f32.xlu1 %v974_v18  ;;  %924 = vadd.xlane.f32.xlu0 %v923_v53  ;;  %v842_v28 = vsel %vm424_vm0, %v307_v45, 0.0  ;;  %v354_v52 = vld [vmem:[%s4371_s28 + $0x5d0] sm:$0xff]  ;;  %v308_v18 = vld [vmem:[%s4371_s28 + $0x460] sm:$0xff]  ;;  %v896_v50 = vsel %vm424_vm0, %v325_v49, 0.0 }
 0x15c   : > { %v5427_v38 = vpop.xlane.xlu1 %690  ;;  %v5429_v20 = vpop.xlane.xlu0 %639  ;;  %v983_v17 = vsel %vm424_vm0, %v354_v52, 0.0  ;;  %v845_v55 = vsel %vm424_vm0, %v308_v18, 0.0  ;;  %v989_v52 = vsel %vm424_vm0, %v356_v21, 0.0 }
 0x15f   : > { %888 = vadd.xlane.f32.xlu1 %v887_v0  ;;  %837 = vadd.xlane.f32.xlu0 %v836_v1  ;;  %v338_v0 = vld [vmem:[%s4371_s28 + $0x550] sm:$0xff] }
 0x160   : > { %v5435_v2 = vpop.xlane.xlu1 %780  ;;  %v5437_v3 = vpop.xlane.xlu0 %729 }
 0x163   : > { %978 = vadd.xlane.f32.xlu1 %v977_v25  ;;  %927 = vadd.xlane.f32.xlu0 %v926_v6  ;;  %v935_v25 = vsel %vm424_vm0, %v338_v0, 0.0  ;;  %v326_v6 = vld [vmem:[%s4371_s28 + $0x4f0] sm:$0xff]  ;;  %v340_v0 = vld [vmem:[%s4371_s28 + $0x560] sm:$0xff] }
 0x164   : > { %v5443_v37 = vpop.xlane.xlu1 %693  ;;  %v5445_v10 = vpop.xlane.xlu0 %642 }
 0x167   : > { %891 = vadd.xlane.f32.xlu1 %v890_v44  ;;  %840 = vadd.xlane.f32.xlu0 %v839_v13  ;;  %v899_v13 = vsel %vm424_vm0, %v326_v6, 0.0 }
 0x168   : > { %v5451_v22 = vpop.xlane.xlu1 %783  ;;  %v5453_v24 = vpop.xlane.xlu0 %732 }
 0x16b   : > { %981 = vadd.xlane.f32.xlu1 %v980_v57  ;;  %930 = vadd.xlane.f32.xlu0 %v929_v41  ;;  %v339_v57 = vld [vmem:[%s4371_s28 + $0x558] sm:$0xff]  ;;  %v1337_v41 = vld [vmem:[%s6661_s1 + $0x480] sm:$0xff] }
 0x16c   : > { %v5459_v63 = vpop.xlane.xlu1 %696  ;;  %v5461_v26 = vpop.xlane.xlu0 %645  ;;  %v4066_v45 = vpack.c.bf16 %v1338_v36, %v1337_v41  ;;  %v938_v35 = vsel %vm424_vm0, %v339_v57, 0.0  ;;  %v341_v57 = vld [vmem:[%s4371_s28 + $0x568] sm:$0xff]  ;;  %v311_v41 = vld [vmem:[%s4371_s28 + $0x478] sm:$0xff]  ;;  %v2165_v36 = vrot.slane %v5391_v56, %v4830_v15  ;;  %v2180_v56 = vrot.slane %v5443_v37, %v4859_v48 }
 0x16e   : > { %4067 = vmatprep.subr.bf16.mxu0 %v4066_v45  ;;  %v2170_v45 = vrot.slane %v5407_v29, %v4837_v23  ;;  %v2166_v29 = vsel %vm1752_vm6, %v2165_v36, %v5389_v9  ;;  %v376_v36 = vld [vmem:[%s4371_s28 + $0x680] sm:$0xff] }
 0x16f   : > { %894 = vadd.xlane.f32.xlu1 %v893_v19  ;;  %843 = vadd.xlane.f32.xlu0 %v842_v28 }
 0x170   : > { %v5467_v39 = vpop.xlane.xlu1 %786  ;;  %v5469_v40 = vpop.xlane.xlu0 %735 }
 0x173   : > { %984 = vadd.xlane.f32.xlu1 %v983_v17  ;;  %933 = vadd.xlane.f32.xlu0 %v932_v47  ;;  %v327_v17 = vld [vmem:[%s4371_s28 + $0x4f8] sm:$0xff]  ;;  %v310_v47 = vld [vmem:[%s4371_s28 + $0x470] sm:$0xff] }
 0x174   : > { %v5475_v53 = vpop.xlane.xlu1 %699  ;;  %v5477_v54 = vpop.xlane.xlu0 %648 }
 0x177   : > { %897 = vadd.xlane.f32.xlu1 %v896_v50  ;;  %846 = vadd.xlane.f32.xlu0 %v845_v55  ;;  %v902_v50 = vsel %vm424_vm0, %v327_v17, 0.0  ;;  %v851_v55 = vsel %vm424_vm0, %v310_v47, 0.0  ;;  %v944_v47 = vsel %vm424_vm0, %v341_v57, 0.0 }
 0x178   : > { %v5483_v1 = vpop.xlane.xlu1 %789  ;;  %v5485_v60 = vpop.xlane.xlu0 %738 }
 0x17b   : > { %987 = vadd.xlane.f32.xlu1 %v986_v62  ;;  %936 = vadd.xlane.f32.xlu0 %v935_v25  ;;  %v1369_v62 = vld [vmem:[%s6661_s1 + $0x580] sm:$0xff]  ;;  %v1370_v25 = vld [vmem:[%s6661_s1 + $0x588] sm:$0xff] }
 0x17c   : > { %v5491_v12 = vpop.xlane.xlu1 %702  ;;  %v5493_v44 = vpop.xlane.xlu0 %651  ;;  %v4098_v21 = vpack.c.bf16 %v1370_v25, %v1369_v62  ;;  %v2086_v62 = vrot.slane %v5409_v32, %v4830_v15  ;;  %v2190_v25 = vrot.slane %v5475_v53, %v4879_v4 }
 0x17e   : > { %4099 = vmatprep.subr.bf16.mxu1 %v4098_v21  ;;  %v2195_v21 = vrot.slane %v5491_v12, %v4884_v7 }
 0x17f   : > { %900 = vadd.xlane.f32.xlu1 %v899_v13  ;;  %849 = vadd.xlane.f32.xlu0 %v848_v14  ;;  %v992_v13 = vsel %vm424_vm0, %v357_v27, 0.0  ;;  %v941_v14 = vsel %vm424_vm0, %v340_v0, 0.0  ;;  %v358_v27 = vld [vmem:[%s4371_s28 + $0x5f0] sm:$0xff]  ;;  %v2171_v0 = vsel %vm1759_vm7, %v2170_v45, %v2166_v29 }
 0x180   : > { %v5505_v19 = vpop.xlane.xlu1 %792  ;;  %v5507_v28 = vpop.xlane.xlu0 %741  ;;  %v995_v53 = vsel %vm424_vm0, %v358_v27, 0.0 }
 0x183   : > { %990 = vadd.xlane.f32.xlu1 %v989_v52  ;;  %939 = vadd.xlane.f32.xlu0 %v938_v35  ;;  %v2175_v52 = vrot.slane %v5427_v38, %v4845_v33  ;;  %v2185_v38 = vrot.slane %v5459_v63, %v4868_v51  ;;  %v2091_v63 = vrot.slane %v5429_v20, %v4837_v23 }
 0x184   : > { %v5513_v49 = vpop.xlane.xlu1 %705  ;;  %v5515_v18 = vpop.xlane.xlu0 %654 }
 0x185   : > { %v2176_v9 = vsel %vm1766_vm8, %v2175_v52, %v2171_v0 }
 0x186   : > { %v2181_v45 = vsel %vm1773_vm9, %v2180_v56, %v2176_v9 }
 0x187   : > { %903 = vadd.xlane.f32.xlu1 %v902_v50  ;;  %852 = vadd.xlane.f32.xlu0 %v851_v55  ;;  %v854_v50 = vsel %vm424_vm0, %v311_v41, 0.0  ;;  %v342_v55 = vld [vmem:[%s4371_s28 + $0x570] sm:$0xff]  ;;  %v377_v41 = vld [vmem:[%s4371_s28 + $0x688] sm:$0xff]  ;;  %v2186_v52 = vsel %vm1780_vm10, %v2185_v38, %v2181_v45  ;;  %v2096_v38 = vrot.slane %v5445_v10, %v4845_v33  ;;  %v2244_v10 = vrot.slane %v5453_v24, %v4830_v15 }
 0x188   : > { %v5527_v6 = vpop.xlane.xlu1 %795  ;;  %v5529_v16 = vpop.xlane.xlu0 %744  ;;  %v947_v37 = vsel %vm424_vm0, %v342_v55, 0.0  ;;  %v2087_v55 = vsel %vm1752_vm6, %v2086_v62, %v5303_v11  ;;  %v2191_v27 = vsel %vm1787_vm11, %v2190_v25, %v2186_v52  ;;  %v1052_v56 = vsel %vm424_vm0, %v377_v41, 0.0  ;;  %v361_v25 = vld [vmem:[%s4371_s28 + $0x608] sm:$0xff] }
 0x189   : > { %v2092_v29 = vsel %vm1759_vm7, %v2091_v63, %v2087_v55  ;;  %v2196_v0 = vsel %vm1794_vm12, %v2195_v21, %v2191_v27  ;;  %v360_v63 = vld [vmem:[%s4371_s28 + $0x600] sm:$0xff]  ;;  %v2106_v21 = vrot.slane %v5477_v54, %v4868_v51  ;;  %v2116_v54 = vrot.slane %v5515_v18, %v4884_v7 }
 0x18a   : > { %v2097_v24 = vsel %vm1766_vm8, %v2096_v38, %v2092_v29  ;;  %v2338_v55 = vrot.slane %v5483_v1, %v4859_v48  ;;  %v1339_v38 = vld [vmem:[%s6661_s1 + $0x490] sm:$0xff] }
 0x18b   : > { %993 = vadd.xlane.f32.xlu1 %v992_v13  ;;  %942 = vadd.xlane.f32.xlu0 %v941_v14  ;;  %v343_v13 = vld [vmem:[%s4371_s28 + $0x578] sm:$0xff] }
 0x18c   : > { %v709_v35 = vpop.xlane.xlu1 %708  ;;  %v5541_v17 = vpop.xlane.xlu0 %657  ;;  %v359_v14 = vld [vmem:[%s4371_s28 + $0x5f8] sm:$0xff]  ;;  %v950_v12 = vsel %vm424_vm0, %v343_v13, 0.0  ;;  %v2101_v13 = vrot.slane %v5461_v26, %v4859_v48  ;;  %v2333_v26 = vrot.slane %v5467_v39, %v4845_v33 }
 0x18d   : > { %v2205_v20 = vrot.slane %v709_v35, %v4911_v42  ;;  %v2323_v35 = vrot.slane %v5435_v2, %v4830_v15  ;;  %v2328_v2 = vrot.slane %v5451_v22, %v4837_v23  ;;  %v1004_v22 = vsel %vm424_vm0, %v361_v25, 0.0 }
 0x18e   : > { %v2343_v25 = vrot.slane %v5505_v19, %v4868_v51 }
 0x18f   : > { %945 = vadd.xlane.f32.xlu1 %v944_v47  ;;  %855 = vadd.xlane.f32.xlu0 %v854_v50  ;;  %v2200_v47 = vrot.slane %v5513_v49, %v4902_v31  ;;  %v998_v50 = vsel %vm424_vm0, %v359_v14, 0.0  ;;  %v1049_v49 = vsel %vm424_vm0, %v376_v36, 0.0  ;;  %v2249_v36 = vrot.slane %v5469_v40, %v4837_v23 }
 0x190   : > { %v5566_v57 = vpop.xlane.xlu1 %798  ;;  %v5568_v32 = vpop.xlane.xlu0 %747  ;;  %v2324_v52 = vsel %vm1752_vm6, %v2323_v35, %v5422_v61  ;;  %v2121_v40 = vrot.slane %v5541_v17, %v4902_v31  ;;  %v1321_v61 = vld [vmem:[%s6661_s1 + $0x400] sm:$0xff] }
 0x191   : > { %v2201_v9 = vsel %vm1801_vm13, %v2200_v47, %v2196_v0  ;;  %v362_v47 = vld [vmem:[%s4371_s28 + $0x610] sm:$0xff]  ;;  %v2329_v18 = vsel %vm1759_vm7, %v2328_v2, %v2324_v52  ;;  %v1340_v0 = vld [vmem:[%s6661_s1 + $0x498] sm:$0xff]  ;;  %v408_v52 = vld [vmem:[%s4371_s28 + $0x780] sm:$0xff] }
 0x192   : > { %v2334_v29 = vsel %vm1766_vm8, %v2333_v26, %v2329_v18  ;;  %v1007_v1 = vsel %vm424_vm0, %v362_v47, 0.0  ;;  %v2348_v26 = vrot.slane %v5527_v6, %v4879_v4  ;;  %v379_v18 = vld [vmem:[%s4371_s28 + $0x698] sm:$0xff] }
 0x193   : > { %948 = vadd.xlane.f32.xlu1 %v947_v37  ;;  %996 = vadd.xlane.f32.xlu0 %v995_v53  ;;  %v2239_v37 = vrot.slane %v5437_v3, %v4821_v8  ;;  %v2206_v3 = vsel %vm1808_vm14, %v2205_v20, %v2201_v9  ;;  %v2111_v53 = vrot.slane %v5493_v44, %v4879_v4  ;;  %v1001_v44 = vsel %vm424_vm0, %v360_v63, 0.0 }
 0x194   : > { %v712_v11 = vpop.xlane.xlu1 %711  ;;  %v661_v62 = vpop.xlane.xlu0 %660 }
 0x195   : > { %v2210_v14 = vrot.slane %v712_v11, %v4928_v58  ;;  %v2240_v20 = vsel %vm1745_vm5, %v2239_v37, %v5425_v5  ;;  %v2126_v27 = vrot.slane %v661_v62, %v4911_v42  ;;  %v1322_v5 = vld [vmem:[%s6661_s1 + $0x408] sm:$0xff]  ;;  %v2254_v62 = vrot.slane %v5485_v60, %v4845_v33 }
 0x196   : > { %v2245_v17 = vsel %vm1752_vm6, %v2244_v10, %v2240_v20  ;;  %v4068_v2 = vpack.c.bf16 %v1322_v5, %v1321_v61  ;;  %v2339_v10 = vsel %vm1773_vm9, %v2338_v55, %v2334_v29  ;;  %v2264_v60 = vrot.slane %v5529_v16, %v4868_v51  ;;  %v1353_v5 = vld [vmem:[%s6661_s1 + $0x500] sm:$0xff] }
 0x197   : > { %951 = vadd.xlane.f32.xlu1 %v950_v12  ;;  %999 = vadd.xlane.f32.xlu0 %v998_v50  ;;  %v2211_v41 = vsel %vm1815_vm15, %v2210_v14, %v2206_v3  ;;  %v2102_v12 = vsel %vm1773_vm9, %v2101_v13, %v2097_v24  ;;  %v2250_v11 = vsel %vm1759_vm7, %v2249_v36, %v2245_v17  ;;  %v378_v13 = vld [vmem:[%s4371_s28 + $0x690] sm:$0xff]  ;;  %v1341_v24 = vld [vmem:[%s6661_s1 + $0x4a0] sm:$0xff]  ;;  %v1342_v36 = vld [vmem:[%s6661_s1 + $0x4a8] sm:$0xff] }
 0x198   : > { %v5617_v45 = vpop.xlane.xlu1 %801  ;;  %3222 = vmatprep.mubr.f32.mxu0 %v2211_v41  ;;  %v5619_v39 = vpop.xlane.xlu0 %750  ;;  %v2107_v50 = vsel %vm1780_vm10, %v2106_v21, %v2102_v12  ;;  %v2259_v14 = vrot.slane %v5507_v28, %v4859_v48  ;;  %v4070_v21 = vpack.c.bf16 %v1340_v0, %v1339_v38  ;;  %v1323_v3 = vld [vmem:[%s6661_s1 + $0x410] sm:$0xff]  ;;  %v1324_v28 = vld [vmem:[%s6661_s1 + $0x418] sm:$0xff]  ;;  %v1055_v41 = vsel %vm424_vm0, %v378_v13, 0.0  ;;  %v1354_v38 = vld [vmem:[%s6661_s1 + $0x508] sm:$0xff] }
 0x199   : > { %v2112_v35 = vsel %vm1787_vm11, %v2111_v53, %v2107_v50  ;;  %v2269_v53 = vrot.slane %v5568_v32, %v4879_v4  ;;  %v2255_v6 = vsel %vm1766_vm8, %v2254_v62, %v2250_v11  ;;  %v2353_v32 = vrot.slane %v5566_v57, %v4884_v7  ;;  %v1325_v57 = vld [vmem:[%s6661_s1 + $0x420] sm:$0xff]  ;;  %v1343_v0 = vld [vmem:[%s6661_s1 + $0x4b0] sm:$0xff]  ;;  %v1344_v11 = vld [vmem:[%s6661_s1 + $0x4b8] sm:$0xff] }
 0x19a   : > { %v2260_v20 = vsel %vm1773_vm9, %v2259_v14, %v2255_v6  ;;  %v2358_v12 = vrot.slane %v5617_v45, %v4902_v31  ;;  %v4072_v50 = vpack.c.bf16 %v1324_v28, %v1323_v3  ;;  %v4074_v45 = vpack.c.bf16 %v1342_v36, %v1341_v24  ;;  %v1356_v6 = vld [vmem:[%s6661_s1 + $0x518] sm:$0xff] }
 0x19b   : > { %1053 = vadd.xlane.f32.xlu1 %v1052_v56  ;;  %1050 = vadd.xlane.f32.xlu0 %v1049_v49  ;;  %v2117_v56 = vsel %vm1794_vm12, %v2116_v54, %v2112_v35  ;;  %v2344_v54 = vsel %vm1780_vm10, %v2343_v25, %v2339_v10  ;;  %v2265_v55 = vsel %vm1780_vm10, %v2264_v60, %v2260_v20  ;;  %v1145_v35 = vsel %vm424_vm0, %v408_v52, 0.0  ;;  %v409_v10 = vld [vmem:[%s4371_s28 + $0x788] sm:$0xff]  ;;  %v1371_v60 = vld [vmem:[%s6661_s1 + $0x590] sm:$0xff]  ;;  %v392_v20 = vld [vmem:[%s4371_s28 + $0x700] sm:$0xff] }
 0x19c   : > { %v754_v49 = vpop.xlane.xlu1 %753  ;;  %v664_v37 = vpop.xlane.xlu0 %663  ;;  %v2122_v9 = vsel %vm1801_vm13, %v2121_v40, %v2117_v56  ;;  %v2349_v17 = vsel %vm1787_vm11, %v2348_v26, %v2344_v54  ;;  %v2270_v29 = vsel %vm1787_vm11, %v2269_v53, %v2265_v55  ;;  %v4100_v28 = vpack.c.bf16 %v1354_v38, %v1353_v5  ;;  %v1327_v53 = vld [vmem:[%s6661_s1 + $0x430] sm:$0xff]  ;;  %v1345_v54 = vld [vmem:[%s6661_s1 + $0x4c0] sm:$0xff]  ;;  %v1374_v55 = vld [vmem:[%s6661_s1 + $0x5a8] sm:$0xff] }
 0x19d   : > { %v2131_v63 = vrot.slane %v664_v37, %v4928_v58  ;;  %v2127_v19 = vsel %vm1808_vm14, %v2126_v27, %v2122_v9  ;;  %v2279_v40 = vrot.slane %v754_v49, %v4902_v31  ;;  %v2354_v62 = vsel %vm1794_vm12, %v2353_v32, %v2349_v17  ;;  %v363_v37 = vld [vmem:[%s4371_s28 + $0x618] sm:$0xff]  ;;  %v1346_v32 = vld [vmem:[%s6661_s1 + $0x4c8] sm:$0xff]  ;;  %v1357_v17 = vld [vmem:[%s6661_s1 + $0x520] sm:$0xff] }
 0x19e   : > { %v1058_v49 = vsel %vm424_vm0, %v379_v18, 0.0  ;;  %v4078_v26 = vpack.c.bf16 %v1344_v11, %v1343_v0  ;;  %v1148_v52 = vsel %vm424_vm0, %v409_v10, 0.0  ;;  %v1330_v5 = vld [vmem:[%s6661_s1 + $0x448] sm:$0xff]  ;;  %v1347_v38 = vld [vmem:[%s6661_s1 + $0x4d0] sm:$0xff]  ;;  %v1348_v0 = vld [vmem:[%s6661_s1 + $0x4d8] sm:$0xff] }
 0x19f   : > { %1005 = vadd.xlane.f32.xlu1 %v1004_v22  ;;  %1002 = vadd.xlane.f32.xlu0 %v1001_v44  ;;  %v2132_v16 = vsel %vm1815_vm15, %v2131_v63, %v2127_v19  ;;  %v2274_v22 = vrot.slane %v5619_v39, %v4884_v7  ;;  %v1326_v39 = vld [vmem:[%s6661_s1 + $0x428] sm:$0xff]  ;;  %v1372_v19 = vld [vmem:[%s6661_s1 + $0x598] sm:$0xff] }
 0x1a0   : > { %v757_v44 = vpop.xlane.xlu1 %756  ;;  %3223 = vmatmul.mubr.f32.vlgmr.msra.gmra.mrb[2].mxu0 %v2132_v16  ;;  %v805_v47 = vpop.xlane.xlu0 %804  ;;  %v4076_v13 = vpack.c.bf16 %v1326_v39, %v1325_v57  ;;  %v1328_v16 = vld [vmem:[%s6661_s1 + $0x438] sm:$0xff]  ;;  %v1373_v39 = vld [vmem:[%s6661_s1 + $0x5a0] sm:$0xff] }
 0x1a1   : > { %4069 = vmatpush3.bf16.msra.mxu0 %v4068_v2  ;;  %v2284_v27 = vrot.slane %v757_v44, %v4911_v42  ;;  %v2363_v61 = vrot.slane %v805_v47, %v4911_v42  ;;  %v2359_v2 = vsel %vm1801_vm13, %v2358_v12, %v2354_v62  ;;  %v1010_v47 = vsel %vm424_vm0, %v363_v37, 0.0 }
 0x1a2   : > { %4071 = vmatprep.subr.bf16.mxu0 %v4070_v21  ;;  %v4102_v12 = vpack.c.bf16 %v1372_v19, %v1371_v60  ;;  %v4080_v57 = vpack.c.bf16 %v1328_v16, %v1327_v53  ;;  %v4086_v60 = vpack.c.bf16 %v1348_v0, %v1347_v38  ;;  %v1331_v19 = vld [vmem:[%s6661_s1 + $0x450] sm:$0xff]  ;;  %v1349_v53 = vld [vmem:[%s6661_s1 + $0x4e0] sm:$0xff]  ;;  %v1350_v16 = vld [vmem:[%s6661_s1 + $0x4e8] sm:$0xff] }
 0x1a3   : > { %1008 = vadd.xlane.f32.xlu1 %v1007_v1  ;;  %1056 = vadd.xlane.f32.xlu0 %v1055_v41  ;;  %v2275_v1 = vsel %vm1794_vm12, %v2274_v22, %v2270_v29  ;;  %v2364_v21 = vsel %vm1808_vm14, %v2363_v61, %v2359_v2  ;;  %v1355_v41 = vld [vmem:[%s6661_s1 + $0x510] sm:$0xff]  ;;  %v4082_v61 = vpack.c.bf16 %v1346_v32, %v1345_v54  ;;  %v1376_v2 = vld [vmem:[%s6661_s1 + $0x5b8] sm:$0xff]  ;;  %v381_v54 = vld [vmem:[%s4371_s28 + $0x6a8] sm:$0xff] }
 0x1a4   : > { %v760_v25 = vpop.xlane.xlu1 %759  ;;  %v808_v56 = vpop.xlane.xlu0 %807  ;;  %v2280_v14 = vsel %vm1801_vm13, %v2279_v40, %v2275_v1  ;;  %v1097_v1 = vsel %vm424_vm0, %v392_v20, 0.0  ;;  %v1377_v20 = vld [vmem:[%s6661_s1 + $0x5c0] sm:$0xff]  ;;  %v1064_v38 = vsel %vm424_vm0, %v381_v54, 0.0  ;;  %v411_v0 = vld [vmem:[%s4371_s28 + $0x798] sm:$0xff]  ;;  %v1382_v54 = vld [vmem:[%s6661_s1 + $0x5e8] sm:$0xff] }
 0x1a5   : > { %v2289_v9 = vrot.slane %v760_v25, %v4928_v58  ;;  %v2368_v63 = vrot.slane %v808_v56, %v4928_v58  ;;  %4073 = vmatpush3.bf16.msra.mxu0 %v4072_v50  ;;  %v2285_v3 = vsel %vm1808_vm14, %v2284_v27, %v2280_v14  ;;  %v380_v50 = vld [vmem:[%s4371_s28 + $0x6a0] sm:$0xff]  ;;  %v4104_v27 = vpack.c.bf16 %v1356_v6, %v1355_v41  ;;  %v410_v56 = vld [vmem:[%s4371_s28 + $0x790] sm:$0xff]  ;;  %v393_v14 = vld [vmem:[%s4371_s28 + $0x708] sm:$0xff] }
 0x1a6   : > { %4075 = vmatprep.subr.bf16.mxu0 %v4074_v45  ;;  %v1329_v45 = vld [vmem:[%s6661_s1 + $0x440] sm:$0xff]  ;;  %v1061_v25 = vsel %vm424_vm0, %v380_v50, 0.0  ;;  %v1100_v6 = vsel %vm424_vm0, %v393_v14, 0.0  ;;  %v1335_v14 = vld [vmem:[%s6661_s1 + $0x470] sm:$0xff] }
 0x1a7   : > { %1146 = vadd.xlane.f32.xlu1 %v1145_v35  ;;  %1059 = vadd.xlane.f32.xlu0 %v1058_v49  ;;  %v2369_v24 = vsel %vm1815_vm15, %v2368_v63, %v2364_v21  ;;  %v2290_v36 = vsel %vm1815_vm15, %v2289_v9, %v2285_v3  ;;  %v1358_v35 = vld [vmem:[%s6661_s1 + $0x528] sm:$0xff]  ;;  %v4106_v49 = vpack.c.bf16 %v1374_v55, %v1373_v39  ;;  %v1375_v63 = vld [vmem:[%s6661_s1 + $0x5b0] sm:$0xff]  ;;  %v1332_v21 = vld [vmem:[%s6661_s1 + $0x458] sm:$0xff] }
 0x1a8   : > { %v862_v22 = vpop.xlane.xlu1 %861  ;;  %3292 = vmatprep.mubr.f32.mxu1 %v2369_v24  ;;  %v859_v44 = vpop.xlane.xlu0 %858  ;;  %v4084_v9 = vpack.c.bf16 %v1330_v5, %v1329_v45  ;;  %v4108_v10 = vpack.c.bf16 %v1358_v35, %v1357_v17  ;;  %v1359_v3 = vld [vmem:[%s6661_s1 + $0x530] sm:$0xff]  ;;  %v4110_v32 = vpack.c.bf16 %v1376_v2, %v1375_v63  ;;  %v1333_v50 = vld [vmem:[%s6661_s1 + $0x460] sm:$0xff]  ;;  %v1352_v5 = vld [vmem:[%s6661_s1 + $0x4f8] sm:$0xff] }
 0x1a9   : > { %v2456_v40 = vrot.slane %v862_v22, %v4771_v30  ;;  %v2452_v18 = vrot.slane %v859_v44, %v4778_v34  ;;  %3293 = vmatmul.mubr.f32.vlgmr.msra.gmra.mrb[2].mxu1 %v2290_v36  ;;  %4077 = vmatpush3.bf16.msra.mxu0 %v4076_v13  ;;  %v1151_v36 = vsel %vm424_vm0, %v410_v56, 0.0  ;;  %v1361_v39 = vld [vmem:[%s6661_s1 + $0x540] sm:$0xff]  ;;  %v1351_v45 = vld [vmem:[%s6661_s1 + $0x4f0] sm:$0xff] }
 0x1aa   : > { %4101 = vmatpush3.bf16.msra.mxu1 %v4100_v28  ;;  %4079 = vmatprep.subr.bf16.mxu0 %v4078_v26  ;;  %v1360_v26 = vld [vmem:[%s6661_s1 + $0x538] sm:$0xff]  ;;  %v1379_v56 = vld [vmem:[%s6661_s1 + $0x5d0] sm:$0xff] }
 0x1ab   : > { %v2457_v29 = vsel %vm1717_vm1, %v2456_v40, %v2452_v18  ;;  %1011 = vadd.xlane.f32.xlu1 %v1010_v47  ;;  %1149 = vadd.xlane.f32.xlu0 %v1148_v52  ;;  %v364_v47 = vld [vmem:[%s4371_s28 + $0x620] sm:$0xff]  ;;  %v4088_v52 = vpack.c.bf16 %v1332_v21, %v1331_v19  ;;  %v4112_v40 = vpack.c.bf16 %v1360_v26, %v1359_v3  ;;  %v1363_v2 = vld [vmem:[%s6661_s1 + $0x550] sm:$0xff]  ;;  %v1154_v21 = vsel %vm424_vm0, %v411_v0, 0.0  ;;  %v1368_v0 = vld [vmem:[%s6661_s1 + $0x578] sm:$0xff] }
 0x1ac   : > { %v814_v11 = vpop.xlane.xlu1 %813  ;;  %v811_v62 = vpop.xlane.xlu0 %810  ;;  %4103 = vmatprep.subr.bf16.mxu1 %v4102_v12  ;;  %v1378_v12 = vld [vmem:[%s6661_s1 + $0x5c8] sm:$0xff]  ;;  %v4090_v18 = vpack.c.bf16 %v1350_v16, %v1349_v53 }
 0x1ad   : > { %v2377_v37 = vrot.slane %v814_v11, %v4771_v30  ;;  %v2373_v13 = vrot.slane %v811_v62, %v4778_v34  ;;  %4081 = vmatpush3.bf16.msra.mxu0 %v4080_v57  ;;  %v1334_v57 = vld [vmem:[%s6661_s1 + $0x468] sm:$0xff]  ;;  %v4114_v11 = vpack.c.bf16 %v1378_v12, %v1377_v20 }
 0x1ae   : > { %4105 = vmatpush3.bf16.msra.mxu1 %v4104_v27  ;;  %4083 = vmatprep.subr.bf16.mxu0 %v4082_v61  ;;  %v1362_v61 = vld [vmem:[%s6661_s1 + $0x548] sm:$0xff] }
 0x1af   : > { %v2378_v28 = vsel %vm1717_vm1, %v2377_v37, %v2373_v13  ;;  %1098 = vadd.xlane.f32.xlu1 %v1097_v1  ;;  %1062 = vadd.xlane.f32.xlu0 %v1061_v25  ;;  %v394_v1 = vld [vmem:[%s4371_s28 + $0x710] sm:$0xff]  ;;  %v4092_v25 = vpack.c.bf16 %v1334_v57, %v1333_v50  ;;  %v4116_v37 = vpack.c.bf16 %v1362_v61, %v1361_v39  ;;  %v412_v50 = vld [vmem:[%s4371_s28 + $0x7a0] sm:$0xff] }
 0x1b0   : > { %v817_v41 = vpop.xlane.xlu1 %816  ;;  %v865_v24 = vpop.xlane.xlu0 %864  ;;  %4107 = vmatprep.subr.bf16.mxu1 %v4106_v49  ;;  %v1380_v49 = vld [vmem:[%s6661_s1 + $0x5d8] sm:$0xff]  ;;  %v4094_v13 = vpack.c.bf16 %v1352_v5, %v1351_v45  ;;  %v1103_v3 = vsel %vm424_vm0, %v394_v1, 0.0  ;;  %v1383_v61 = vld [vmem:[%s6661_s1 + $0x5f0] sm:$0xff]  ;;  %v1157_v1 = vsel %vm424_vm0, %v412_v50, 0.0 }
 0x1b1   : > { %v2382_v22 = vrot.slane %v817_v41, %v4792_v43  ;;  %v2461_v44 = vrot.slane %v865_v24, %v4792_v43  ;;  %4085 = vmatpush3.bf16.msra.mxu0 %v4084_v9  ;;  %v1336_v9 = vld [vmem:[%s6661_s1 + $0x478] sm:$0xff]  ;;  %v4118_v26 = vpack.c.bf16 %v1380_v49, %v1379_v56  ;;  %v365_v24 = vld [vmem:[%s4371_s28 + $0x628] sm:$0xff] }
 0x1b2   : > { %4109 = vmatpush3.bf16.msra.mxu1 %v4108_v10  ;;  %4087 = vmatprep.subr.bf16.mxu0 %v4086_v60  ;;  %v1364_v10 = vld [vmem:[%s6661_s1 + $0x558] sm:$0xff] }
 0x1b3   : > { %v2383_v55 = vsel %vm1724_vm2, %v2382_v22, %v2378_v28  ;;  %v2462_v27 = vsel %vm1724_vm2, %v2461_v44, %v2457_v29  ;;  %1152 = vadd.xlane.f32.xlu1 %v1151_v36  ;;  %1101 = vadd.xlane.f32.xlu0 %v1100_v6  ;;  %v1013_v29 = vsel %vm424_vm0, %v364_v47, 0.0  ;;  %v382_v28 = vld [vmem:[%s4371_s28 + $0x6b0] sm:$0xff]  ;;  %v4096_v36 = vpack.c.bf16 %v1336_v9, %v1335_v14  ;;  %v1381_v6 = vld [vmem:[%s6661_s1 + $0x5e0] sm:$0xff]  ;;  %v1384_v45 = vld [vmem:[%s6661_s1 + $0x5f8] sm:$0xff] }
 0x1b4   : > { %v955_v17 = vpop.xlane.xlu1 %954  ;;  %v868_v35 = vpop.xlane.xlu0 %867  ;;  %4111 = vmatprep.subr.bf16.mxu1 %v4110_v32  ;;  %v4120_v32 = vpack.c.bf16 %v1364_v10, %v1363_v2  ;;  %v1365_v47 = vld [vmem:[%s6661_s1 + $0x560] sm:$0xff]  ;;  %v4122_v57 = vpack.c.bf16 %v1382_v54, %v1381_v6  ;;  %v4126_v56 = vpack.c.bf16 %v1384_v45, %v1383_v61  ;;  %v383_v14 = vld [vmem:[%s4371_s28 + $0x6b8] sm:$0xff]  ;;  %v366_v9 = vld [vmem:[%s4371_s28 + $0x630] sm:$0xff] }
 0x1b5   : > { %v2466_v62 = vrot.slane %v868_v35, %v4798_v46  ;;  %4089 = vmatpush3.bf16.msra.mxu0 %v4088_v52  ;;  %v2610_v53 = vrot.slane %v955_v17, %v4778_v34  ;;  %v1366_v52 = vld [vmem:[%s6661_s1 + $0x568] sm:$0xff] }
 0x1b6   : > { %4113 = vmatpush3.bf16.msra.mxu1 %v4112_v40  ;;  %4091 = vmatprep.subr.bf16.mxu0 %v4090_v18  ;;  %v1067_v40 = vsel %vm424_vm0, %v382_v28, 0.0  ;;  %v1016_v18 = vsel %vm424_vm0, %v365_v24, 0.0  ;;  %v4124_v17 = vpack.c.bf16 %v1366_v52, %v1365_v47  ;;  %v384_v52 = vld [vmem:[%s4371_s28 + $0x6c0] sm:$0xff] }
 0x1b7   : > { %v2467_v63 = vsel %vm1731_vm3, %v2466_v62, %v2462_v27  ;;  %1065 = vadd.xlane.f32.xlu1 %v1064_v38  ;;  %1014 = vadd.xlane.f32.xlu0 %v1013_v29  ;;  %v395_v27 = vld [vmem:[%s4371_s28 + $0x718] sm:$0xff]  ;;  %v1367_v29 = vld [vmem:[%s6661_s1 + $0x570] sm:$0xff]  ;;  %v1073_v50 = vsel %vm424_vm0, %v384_v52, 0.0 }
 0x1b8   : > { %v820_v60 = vpop.xlane.xlu1 %819  ;;  %v958_v19 = vpop.xlane.xlu0 %957  ;;  %4115 = vmatprep.subr.bf16.mxu1 %v4114_v11 }
 0x1b9   : > { %v2387_v16 = vrot.slane %v820_v60, %v4798_v46  ;;  %v2614_v41 = vrot.slane %v958_v19, %v4771_v30  ;;  %4093 = vmatpush3.bf16.msra.mxu0 %v4092_v25  ;;  %v1106_v25 = vsel %vm424_vm0, %v395_v27, 0.0  ;;  %v397_v27 = vld [vmem:[%s4371_s28 + $0x728] sm:$0xff] }
 0x1ba   : > { %4117 = vmatpush3.bf16.msra.mxu1 %v4116_v37  ;;  %4095 = vmatprep.subr.bf16.mxu0 %v4094_v13 }
 0x1bb   : > { %v2388_v22 = vsel %vm1731_vm3, %v2387_v16, %v2383_v55  ;;  %v2615_v44 = vsel %vm1717_vm1, %v2614_v41, %v2610_v53  ;;  %1155 = vadd.xlane.f32.xlu1 %v1154_v21  ;;  %1104 = vadd.xlane.f32.xlu0 %v1103_v3  ;;  %v1070_v21 = vsel %vm424_vm0, %v383_v14, 0.0  ;;  %v1019_v3 = vsel %vm424_vm0, %v366_v9, 0.0  ;;  %v413_v53 = vld [vmem:[%s4371_s28 + $0x7a8] sm:$0xff]  ;;  %v396_v16 = vld [vmem:[%s4371_s28 + $0x720] sm:$0xff]  ;;  %v415_v14 = vld [vmem:[%s4371_s28 + $0x7b8] sm:$0xff] }
 0x1bc   : > { %v907_v20 = vpop.xlane.xlu1 %906  ;;  %v871_v12 = vpop.xlane.xlu0 %870  ;;  %4119 = vmatprep.subr.bf16.mxu1 %v4118_v26  ;;  %v1160_v54 = vsel %vm424_vm0, %v413_v53, 0.0  ;;  %v398_v9 = vld [vmem:[%s4371_s28 + $0x730] sm:$0xff] }
 0x1bd   : > { %v2471_v39 = vrot.slane %v871_v12, %v4810_v59  ;;  %v3690_v55 = vpop.f32.mrb[0].mxu0  ;;  %4097 = vmatpush3.bf16.msra.mxu0 %v4096_v36  ;;  %v2531_v49 = vrot.slane %v907_v20, %v4778_v34  ;;  %v367_v20 = vld [vmem:[%s4371_s28 + $0x638] sm:$0xff] }
 0x1be   : > { %v3691_v5 = vpop.f32.mrb[1].mxu0  ;;  %4121 = vmatpush3.bf16.msra.mxu1 %v4120_v32  ;;  %v1109_v32 = vsel %vm424_vm0, %v396_v16, 0.0 }
 0x1bf   : > { %v2472_v35 = vsel %vm1738_vm4, %v2471_v39, %v2467_v63  ;;  %v5908_v38 = vadd.f32 %v3691_v5, %v3690_v55  ;;  %1068 = vadd.xlane.f32.xlu1 %v1067_v40  ;;  %1017 = vadd.xlane.f32.xlu0 %v1016_v18  ;;  %v4128_v63 = vpack.c.bf16 %v1368_v0, %v1367_v29  ;;  %v414_v55 = vld [vmem:[%s4371_s28 + $0x7b0] sm:$0xff] }
 0x1c0   : > { %v961_v11 = vpop.xlane.xlu1 %960  ;;  %v910_v62 = vpop.xlane.xlu0 %909  ;;  %4123 = vmatprep.subr.bf16.mxu1 %v4122_v57  ;;  %v1022_v57 = vsel %vm424_vm0, %v367_v20, 0.0 }
 0x1c1   : > { %v2619_v37 = vrot.slane %v961_v11, %v4792_v43  ;;  %v2535_v13 = vrot.slane %v910_v62, %v4771_v30  ;;  %v385_v11 = vld [vmem:[%s4371_s28 + $0x6c8] sm:$0xff]  ;;  %v368_v62 = vld [vmem:[%s4371_s28 + $0x640] sm:$0xff] }
 0x1c2   : > { %4125 = vmatpush3.bf16.msra.mxu1 %v4124_v17  ;;  %v1163_v17 = vsel %vm424_vm0, %v414_v55, 0.0  ;;  %v417_v55 = vld [vmem:[%s4371_s28 + $0x7c8] sm:$0xff] }
 0x1c3   : > { %v2620_v2 = vsel %vm1724_vm2, %v2619_v37, %v2615_v44  ;;  %v2536_v10 = vsel %vm1717_vm1, %v2535_v13, %v2531_v49  ;;  %1158 = vadd.xlane.f32.xlu1 %v1157_v1  ;;  %1107 = vadd.xlane.f32.xlu0 %v1106_v25  ;;  %v1076_v37 = vsel %vm424_vm0, %v385_v11, 0.0  ;;  %v1025_v13 = vsel %vm424_vm0, %v368_v62, 0.0 }
 0x1c4   : > { %v874_v60 = vpop.xlane.xlu1 %873  ;;  %v823_v19 = vpop.xlane.xlu0 %822  ;;  %4127 = vmatprep.subr.bf16.mxu1 %v4126_v56 }
 0x1c5   : > { %v2476_v28 = vrot.slane %v874_v60, %v4821_v8  ;;  %v2392_v26 = vrot.slane %v823_v19, %v4810_v59  ;;  %v1115_v60 = vsel %vm424_vm0, %v398_v9, 0.0 }
 0x1c6   : > { %4129 = vmatpush3.bf16.msra.mxu1 %v4128_v63 }
 0x1c7   : > { %v5932_v41 = vsel %vm1745_vm5, %v2476_v28, %v2472_v35  ;;  %v2393_v24 = vsel %vm1738_vm4, %v2392_v26, %v2388_v22  ;;  %1071 = vadd.xlane.f32.xlu1 %v1070_v21  ;;  %1020 = vadd.xlane.f32.xlu0 %v1019_v3  ;;  %v1112_v35 = vsel %vm424_vm0, %v397_v27, 0.0  ;;  %v386_v3 = vld [vmem:[%s4371_s28 + $0x6d0] sm:$0xff]  ;;  %v369_v28 = vld [vmem:[%s4371_s28 + $0x648] sm:$0xff]  ;;  %v400_v27 = vld [vmem:[%s4371_s28 + $0x740] sm:$0xff] }
 0x1c8   : > { %v964_v36 = vpop.xlane.xlu1 %963  ;;  %v913_v6 = vpop.xlane.xlu0 %912 }
 0x1c9   : > { %v2624_v44 = vrot.slane %v964_v36, %v4798_v46  ;;  %v2540_v47 = vrot.slane %v913_v6, %v4792_v43  ;;  %v1079_v36 = vsel %vm424_vm0, %v386_v3, 0.0  ;;  %v1028_v6 = vsel %vm424_vm0, %v369_v28, 0.0 }
 0x1cb   : > { %v2625_v12 = vsel %vm1731_vm3, %v2624_v44, %v2620_v2  ;;  %v2541_v22 = vsel %vm1724_vm2, %v2540_v47, %v2536_v10  ;;  %1161 = vadd.xlane.f32.xlu1 %v1160_v54  ;;  %1110 = vadd.xlane.f32.xlu0 %v1109_v32  ;;  %v1166_v10 = vsel %vm424_vm0, %v415_v14, 0.0  ;;  %v416_v54 = vld [vmem:[%s4371_s28 + $0x7c0] sm:$0xff]  ;;  %v399_v32 = vld [vmem:[%s4371_s28 + $0x738] sm:$0xff] }
 0x1cc   : > { %v5943_v40 = vpop.xlane.xlu1 %876  ;;  %v826_v18 = vpop.xlane.xlu0 %825  ;;  %v1169_v52 = vsel %vm424_vm0, %v416_v54, 0.0  ;;  %v1118_v20 = vsel %vm424_vm0, %v399_v32, 0.0 }
 0x1cd   : > { %v2397_v39 = vrot.slane %v826_v18, %v4821_v8 }
 0x1cf   : > { %v5951_v61 = vsel %vm1745_vm5, %v2397_v39, %v2393_v24  ;;  %1074 = vadd.xlane.f32.xlu1 %v1073_v50  ;;  %1023 = vadd.xlane.f32.xlu0 %v1022_v57 }
 0x1d0   : > { %v967_v45 = vpop.xlane.xlu1 %966  ;;  %v916_v5 = vpop.xlane.xlu0 %915 }
 0x1d1   : > { %v2629_v29 = vrot.slane %v967_v45, %v4810_v59  ;;  %v2545_v0 = vrot.slane %v916_v5, %v4798_v46 }
 0x1d3   : > { %v2630_v1 = vsel %vm1738_vm4, %v2629_v29, %v2625_v12  ;;  %v2546_v25 = vsel %vm1731_vm3, %v2545_v0, %v2541_v22  ;;  %1164 = vadd.xlane.f32.xlu1 %v1163_v17  ;;  %1113 = vadd.xlane.f32.xlu0 %v1112_v35  ;;  %v387_v12 = vld [vmem:[%s4371_s28 + $0x6d8] sm:$0xff]  ;;  %v370_v22 = vld [vmem:[%s4371_s28 + $0x650] sm:$0xff]  ;;  %v1172_v17 = vsel %vm424_vm0, %v417_v55, 0.0  ;;  %v1121_v35 = vsel %vm424_vm0, %v400_v27, 0.0  ;;  %v388_v29 = vld [vmem:[%s4371_s28 + $0x6e0] sm:$0xff] }
 0x1d4   : > { %v5961_v56 = vpop.xlane.xlu1 %879  ;;  %v5963_v49 = vpop.xlane.xlu0 %828  ;;  %v1082_v57 = vsel %vm424_vm0, %v387_v12, 0.0  ;;  %v1031_v39 = vsel %vm424_vm0, %v370_v22, 0.0  ;;  %v371_v0 = vld [vmem:[%s4371_s28 + $0x658] sm:$0xff]  ;;  %v390_v12 = vld [vmem:[%s4371_s28 + $0x6f0] sm:$0xff]  ;;  %v373_v22 = vld [vmem:[%s4371_s28 + $0x668] sm:$0xff] }
 0x1d5   : > { %v1091_v27 = vsel %vm424_vm0, %v390_v12, 0.0 }
 0x1d7   : > { %1077 = vadd.xlane.f32.xlu1 %v1076_v37  ;;  %1026 = vadd.xlane.f32.xlu0 %v1025_v13  ;;  %v418_v37 = vld [vmem:[%s4371_s28 + $0x7d0] sm:$0xff]  ;;  %v401_v13 = vld [vmem:[%s4371_s28 + $0x748] sm:$0xff] }
 0x1d8   : > { %v970_v63 = vpop.xlane.xlu1 %969  ;;  %v919_v2 = vpop.xlane.xlu0 %918 }
 0x1d9   : > { %v2634_v19 = vrot.slane %v970_v63, %v4821_v8  ;;  %v2550_v21 = vrot.slane %v919_v2, %v4810_v59  ;;  %v1175_v63 = vsel %vm424_vm0, %v418_v37, 0.0  ;;  %v1124_v2 = vsel %vm424_vm0, %v401_v13, 0.0  ;;  %v1402_v37 = vld [vmem:[%s6661_s1 + $0x688] sm:$0xff] }
 0x1db   : > { %v5976_v26 = vsel %vm1745_vm5, %v2634_v19, %v2630_v1  ;;  %v5979_v53 = vsel %vm1738_vm4, %v2550_v21, %v2546_v25  ;;  %1167 = vadd.xlane.f32.xlu1 %v1166_v10  ;;  %1116 = vadd.xlane.f32.xlu0 %v1115_v60  ;;  %v1085_v1 = vsel %vm424_vm0, %v388_v29, 0.0  ;;  %v1034_v25 = vsel %vm424_vm0, %v371_v0, 0.0  ;;  %v389_v10 = vld [vmem:[%s4371_s28 + $0x6e8] sm:$0xff]  ;;  %v372_v60 = vld [vmem:[%s4371_s28 + $0x660] sm:$0xff]  ;;  %v403_v0 = vld [vmem:[%s4371_s28 + $0x758] sm:$0xff] }
 0x1dc   : > { %v5981_v16 = vpop.xlane.xlu1 %882  ;;  %v5983_v24 = vpop.xlane.xlu0 %831  ;;  %v1088_v3 = vsel %vm424_vm0, %v389_v10, 0.0  ;;  %v1037_v28 = vsel %vm424_vm0, %v372_v60, 0.0  ;;  %v420_v29 = vld [vmem:[%s4371_s28 + $0x7e0] sm:$0xff] }
 0x1dd   : > { %v1181_v60 = vsel %vm424_vm0, %v420_v29, 0.0 }
 0x1df   : > { %1080 = vadd.xlane.f32.xlu1 %v1079_v36  ;;  %1029 = vadd.xlane.f32.xlu0 %v1028_v6  ;;  %v419_v36 = vld [vmem:[%s4371_s28 + $0x7d8] sm:$0xff]  ;;  %v402_v6 = vld [vmem:[%s4371_s28 + $0x750] sm:$0xff] }
 0x1e0   : > { %v5989_v44 = vpop.xlane.xlu1 %972  ;;  %v5991_v47 = vpop.xlane.xlu0 %921 }
 0x1e3   : > { %1170 = vadd.xlane.f32.xlu1 %v1169_v52  ;;  %1119 = vadd.xlane.f32.xlu0 %v1118_v20  ;;  %v1178_v52 = vsel %vm424_vm0, %v419_v36, 0.0  ;;  %v1127_v20 = vsel %vm424_vm0, %v402_v6, 0.0  ;;  %v391_v6 = vld [vmem:[%s4371_s28 + $0x6f8] sm:$0xff] }
 0x1e4   : > { %v5997_v18 = vpop.xlane.xlu1 %885  ;;  %v5999_v50 = vpop.xlane.xlu0 %834  ;;  %v1094_v12 = vsel %vm424_vm0, %v391_v6, 0.0 }
 0x1e7   : > { %1083 = vadd.xlane.f32.xlu1 %v1082_v57  ;;  %1032 = vadd.xlane.f32.xlu0 %v1031_v39  ;;  %v1449_v57 = vld [vmem:[%s6662_s2] sm:$0x1] }
 0x1e8   : > { %v6005_v45 = vpop.xlane.xlu1 %975  ;;  %v6007_v5 = vpop.xlane.xlu0 %924  ;;  %v3085_v13 = vadd.f32 %v5908_v38, %v1449_v57  ;;  %v421_v57 = vld [vmem:[%s4371_s28 + $0x7e8] sm:$0xff] }
 0x1eb   : > { %1173 = vadd.xlane.f32.xlu1 %v1172_v17  ;;  %1122 = vadd.xlane.f32.xlu0 %v1121_v35  ;;  %v1040_v17 = vsel %vm424_vm0, %v373_v22, 0.0 }
 0x1ec   : > { %v6013_v11 = vpop.xlane.xlu1 %888  ;;  %v6015_v62 = vpop.xlane.xlu0 %837 }
 0x1ef   : > { %1086 = vadd.xlane.f32.xlu1 %v1085_v1  ;;  %1035 = vadd.xlane.f32.xlu0 %v1034_v25  ;;  %v1401_v25 = vld [vmem:[%s6661_s1 + $0x680] sm:$0xff] }
 0x1f0   : > { %v6021_v14 = vpop.xlane.xlu1 %978  ;;  %v6023_v9 = vpop.xlane.xlu0 %927 }
 0x1f3   : > { %1176 = vadd.xlane.f32.xlu1 %v1175_v63  ;;  %1125 = vadd.xlane.f32.xlu0 %v1124_v2 }
 0x1f4   : > { %v6029_v19 = vpop.xlane.xlu1 %891  ;;  %v6031_v21 = vpop.xlane.xlu0 %840 }
 0x1f7   : > { %1089 = vadd.xlane.f32.xlu1 %v1088_v3  ;;  %1038 = vadd.xlane.f32.xlu0 %v1037_v28  ;;  %v1130_v3 = vsel %vm424_vm0, %v403_v0, 0.0  ;;  %v4130_v28 = vpack.c.bf16 %v1402_v37, %v1401_v25  ;;  %v1184_v0 = vsel %vm424_vm0, %v421_v57, 0.0  ;;  %v1434_v25 = vld [vmem:[%s6661_s1 + $0x788] sm:$0xff]  ;;  %v406_v57 = vld [vmem:[%s4371_s28 + $0x770] sm:$0xff] }
 0x1f8   : > { %v6037_v54 = vpop.xlane.xlu1 %981  ;;  %v6039_v32 = vpop.xlane.xlu0 %930  ;;  %v405_v37 = vld [vmem:[%s4371_s28 + $0x768] sm:$0xff] }
 0x1f9   : > { %4131 = vmatprep.subr.bf16.mxu0 %v4130_v28  ;;  %v2491_v28 = vrot.slane %v5981_v16, %v4845_v33  ;;  %v2501_v16 = vrot.slane %v6013_v11, %v4868_v51 }
 0x1fb   : > { %1179 = vadd.xlane.f32.xlu1 %v1178_v52  ;;  %1128 = vadd.xlane.f32.xlu0 %v1127_v20  ;;  %v374_v52 = vld [vmem:[%s4371_s28 + $0x670] sm:$0xff] }
 0x1fc   : > { %v6048_v39 = vpop.xlane.xlu1 %894  ;;  %v6050_v55 = vpop.xlane.xlu0 %843  ;;  %v1043_v22 = vsel %vm424_vm0, %v374_v52, 0.0 }
 0x1fd   : > { %v3725_v35 = vpop.f32.mrb[0].mxu1  ;;  %v2511_v11 = vrot.slane %v6048_v39, %v4884_v7 }
 0x1fe   : > { %v3726_v1 = vpop.f32.mrb[1].mxu1 }
 0x1ff   : > { %v3727_v63 = vadd.f32 %v3726_v1, %v3725_v35  ;;  %1092 = vadd.xlane.f32.xlu1 %v1091_v27  ;;  %1041 = vadd.xlane.f32.xlu0 %v1040_v17  ;;  %v404_v27 = vld [vmem:[%s4371_s28 + $0x760] sm:$0xff] }
 0x200   : > { %v6063_v2 = vpop.xlane.xlu1 %984  ;;  %v6065_v10 = vpop.xlane.xlu0 %933  ;;  %v1433_v17 = vld [vmem:[%s6661_s1 + $0x780] sm:$0xff]  ;;  %v1133_v1 = vsel %vm424_vm0, %v404_v27, 0.0  ;;  %v422_v27 = vld [vmem:[%s4371_s28 + $0x7f0] sm:$0xff] }
 0x201   : > { %v6069_v36 = vadd.f32 %v3727_v63, %v3085_v13  ;;  %v375_v13 = vld [vmem:[%s4371_s28 + $0x678] sm:$0xff]  ;;  %v4162_v63 = vpack.c.bf16 %v1434_v25, %v1433_v17 }
 0x203   : > { %1182 = vadd.xlane.f32.xlu1 %v1181_v60  ;;  %1131 = vadd.xlane.f32.xlu0 %v1130_v3  ;;  %v2481_v60 = vrot.slane %v5943_v40, %v4830_v15  ;;  %v2486_v3 = vrot.slane %v5961_v56, %v4837_v23  ;;  %v2496_v40 = vrot.slane %v5997_v18, %v4859_v48  ;;  %v1139_v18 = vsel %vm424_vm0, %v406_v57, 0.0 }
 0x204   : > { %v6073_v38 = vpop.xlane.xlu1 %897  ;;  %v6075_v20 = vpop.xlane.xlu0 %846  ;;  %4163 = vmatprep.subr.bf16.mxu1 %v4162_v63  ;;  %v407_v63 = vld [vmem:[%s4371_s28 + $0x778] sm:$0xff] }
 0x205   : > { %v2482_v56 = vsel %vm1752_vm6, %v2481_v60, %v5932_v41  ;;  %v2407_v41 = vrot.slane %v5983_v24, %v4837_v23  ;;  %v2516_v60 = vrot.slane %v6073_v38, %v4902_v31 }
 0x206   : > { %v2487_v17 = vsel %vm1759_vm7, %v2486_v3, %v2482_v56  ;;  %v423_v3 = vld [vmem:[%s4371_s28 + $0x7f8] sm:$0xff]  ;;  %s6618_s28 = scalar_lea.hbm %s6663_s3, %s3654_s26 }
 0x207   : > { %1095 = vadd.xlane.f32.xlu1 %v1094_v12  ;;  %1044 = vadd.xlane.f32.xlu0 %v1043_v22  ;;  %v1136_v12 = vsel %vm424_vm0, %v405_v37, 0.0  ;;  %v1046_v22 = vsel %vm424_vm0, %v375_v13, 0.0  ;;  %v2492_v25 = vsel %vm1766_vm8, %v2491_v28, %v2487_v17 }
 0x208   : > { %v6084_v35 = vpop.xlane.xlu1 %987  ;;  %v6086_v29 = vpop.xlane.xlu0 %936 }
 0x20b   : > { %1185 = vadd.xlane.f32.xlu1 %v1184_v0  ;;  %1134 = vadd.xlane.f32.xlu0 %v1133_v1  ;;  %v2402_v0 = vrot.slane %v5963_v49, %v4830_v15  ;;  %v2506_v1 = vrot.slane %v6029_v19, %v4879_v4  ;;  %v1187_v49 = vsel %vm424_vm0, %v422_v27, 0.0  ;;  %v2497_v19 = vsel %vm1773_vm9, %v2496_v40, %v2492_v25 }
 0x20c   : > { %v901_v6 = vpop.xlane.xlu1 %900  ;;  %v6101_v52 = vpop.xlane.xlu0 %849  ;;  %v2502_v28 = vsel %vm1780_vm10, %v2501_v16, %v2497_v19  ;;  %v2412_v40 = vrot.slane %v5999_v50, %v4845_v33  ;;  %v2417_v16 = vrot.slane %v6015_v62, %v4859_v48  ;;  %v2644_v50 = vrot.slane %v6005_v45, %v4837_v23 }
 0x20d   : > { %v2521_v24 = vrot.slane %v901_v6, %v4911_v42  ;;  %v2403_v39 = vsel %vm1752_vm6, %v2402_v0, %v5951_v61  ;;  %v1190_v6 = vsel %vm424_vm0, %v423_v3, 0.0  ;;  %v2639_v61 = vrot.slane %v5989_v44, %v4830_v15  ;;  %v1385_v3 = vld [vmem:[%s6661_s1 + $0x600] sm:$0xff] }
 0x20e   : > { %v2408_v57 = vsel %vm1759_vm7, %v2407_v41, %v2403_v39  ;;  %v2560_v44 = vrot.slane %v6007_v5, %v4830_v15  ;;  %v2427_v62 = vrot.slane %v6050_v55, %v4879_v4  ;;  %v2649_v45 = vrot.slane %v6021_v14, %v4845_v33  ;;  %v1404_v39 = vld [vmem:[%s6661_s1 + $0x698] sm:$0xff] }
 0x20f   : > { %1137 = vadd.xlane.f32.xlu1 %v1136_v12  ;;  %1047 = vadd.xlane.f32.xlu0 %v1046_v22  ;;  %v2507_v12 = vsel %vm1787_vm11, %v2506_v1, %v2502_v28  ;;  %v1142_v22 = vsel %vm424_vm0, %v407_v63, 0.0  ;;  %v2555_v1 = vrot.slane %v5991_v47, %v4821_v8  ;;  %v2413_v47 = vsel %vm1766_vm8, %v2412_v40, %v2408_v57 }
 0x210   : > { %v6124_v37 = vpop.xlane.xlu1 %990  ;;  %v6126_v13 = vpop.xlane.xlu0 %939  ;;  %v2512_v38 = vsel %vm1794_vm12, %v2511_v11, %v2507_v12  ;;  %v2640_v5 = vsel %vm1752_vm6, %v2639_v61, %v5976_v26  ;;  %v2418_v55 = vsel %vm1773_vm9, %v2417_v16, %v2413_v47  ;;  %v2437_v63 = vrot.slane %v6101_v52, %v4902_v31  ;;  %v1386_v26 = vld [vmem:[%s6661_s1 + $0x608] sm:$0xff] }
 0x211   : > { %v2517_v17 = vsel %vm1801_vm13, %v2516_v60, %v2512_v38  ;;  %v2556_v19 = vsel %vm1745_vm5, %v2555_v1, %v5979_v53  ;;  %v2565_v14 = vrot.slane %v6023_v9, %v4837_v23  ;;  %v2645_v52 = vsel %vm1759_vm7, %v2644_v50, %v2640_v5 }
 0x212   : > { %v2522_v25 = vsel %vm1808_vm14, %v2521_v24, %v2517_v17  ;;  %v2561_v28 = vsel %vm1752_vm6, %v2560_v44, %v2556_v19  ;;  %v2654_v53 = vrot.slane %v6037_v54, %v4859_v48  ;;  %v1403_v24 = vld [vmem:[%s6661_s1 + $0x690] sm:$0xff]  ;;  %v2650_v12 = vsel %vm1766_vm8, %v2649_v45, %v2645_v52  ;;  %v1406_v44 = vld [vmem:[%s6661_s1 + $0x6a8] sm:$0xff]  ;;  %v1389_v19 = vld [vmem:[%s6661_s1 + $0x620] sm:$0xff] }
 0x213   : > { %1140 = vadd.xlane.f32.xlu1 %v1139_v18  ;;  %1188 = vadd.xlane.f32.xlu0 %v1187_v49  ;;  %v2422_v18 = vrot.slane %v6031_v21, %v4868_v51  ;;  %v2432_v21 = vrot.slane %v6075_v20, %v4884_v7  ;;  %v2659_v57 = vrot.slane %v6063_v2, %v4868_v51  ;;  %v1418_v52 = vld [vmem:[%s6661_s1 + $0x708] sm:$0xff]  ;;  %vm3578_vm0 = vcmask 65536  }
 0x214   : > { %v904_v27 = vpop.xlane.xlu1 %903  ;;  %v853_v56 = vpop.xlane.xlu0 %852  ;;  %v4132_v61 = vpack.c.bf16 %v1386_v26, %v1385_v3  ;;  %v2566_v16 = vsel %vm1759_vm7, %v2565_v14, %v2561_v28  ;;  %v4134_v2 = vpack.c.bf16 %v1404_v39, %v1403_v24  ;;  %v2655_v1 = vsel %vm1773_vm9, %v2654_v53, %v2650_v12  ;;  %v1407_v28 = vld [vmem:[%s6661_s1 + $0x6b0] sm:$0xff]  ;;  %v1408_v53 = vld [vmem:[%s6661_s1 + $0x6b8] sm:$0xff] }
 0x215   : > { %v2526_v0 = vrot.slane %v904_v27, %v4928_v58  ;;  %v2423_v20 = vsel %vm1780_vm10, %v2422_v18, %v2418_v55  ;;  %v2442_v60 = vrot.slane %v853_v56, %v4911_v42  ;;  %v2575_v27 = vrot.slane %v6065_v10, %v4859_v48  ;;  %v1388_v10 = vld [vmem:[%s6661_s1 + $0x618] sm:$0xff] }
 0x216   : > { %v2428_v9 = vsel %vm1787_vm11, %v2427_v62, %v2423_v20  ;;  %v2664_v50 = vrot.slane %v6084_v35, %v4879_v4  ;;  %v2585_v18 = vrot.slane %v6126_v13, %v4879_v4  ;;  %v2669_v35 = vrot.slane %v6124_v37, %v4884_v7  ;;  %v1390_v37 = vld [vmem:[%s6661_s1 + $0x628] sm:$0xff] }
 0x217   : > { %1143 = vadd.xlane.f32.xlu1 %v1142_v22  ;;  %1191 = vadd.xlane.f32.xlu0 %v1190_v6  ;;  %v2527_v41 = vsel %vm1815_vm15, %v2526_v0, %v2522_v25  ;;  %v2570_v22 = vrot.slane %v6039_v32, %v4845_v33  ;;  %v2433_v54 = vsel %vm1794_vm12, %v2432_v21, %v2428_v9  ;;  %v1387_v0 = vld [vmem:[%s6661_s1 + $0x610] sm:$0xff]  ;;  %v1405_v25 = vld [vmem:[%s6661_s1 + $0x6a0] sm:$0xff] }
 0x218   : > { %v6168_v11 = vpop.xlane.xlu1 %993  ;;  %3362 = vmatprep.mubr.f32.mxu0 %v2527_v41  ;;  %v6170_v49 = vpop.xlane.xlu0 %942  ;;  %v2438_v56 = vsel %vm1801_vm13, %v2437_v63, %v2433_v54  ;;  %v2580_v32 = vrot.slane %v6086_v29, %v4868_v51  ;;  %v2660_v41 = vsel %vm1780_vm10, %v2659_v57, %v2655_v1  ;;  %v4136_v63 = vpack.c.bf16 %v1388_v10, %v1387_v0  ;;  %v1435_v57 = vld [vmem:[%s6661_s1 + $0x790] sm:$0xff]  ;;  %v1436_v54 = vld [vmem:[%s6661_s1 + $0x798] sm:$0xff] }
 0x219   : > { %v2443_v17 = vsel %vm1808_vm14, %v2442_v60, %v2438_v56  ;;  %v2571_v62 = vsel %vm1766_vm8, %v2570_v22, %v2566_v16  ;;  %v2590_v13 = vrot.slane %v6170_v49, %v4884_v7  ;;  %v2674_v5 = vrot.slane %v6168_v11, %v4902_v31  ;;  %v1417_v60 = vld [vmem:[%s6661_s1 + $0x700] sm:$0xff]  ;;  %v1419_v0 = vld [vmem:[%s6661_s1 + $0x710] sm:$0xff] }
 0x21a   : > { %v2576_v21 = vsel %vm1773_vm9, %v2575_v27, %v2571_v62  ;;  %v4138_v11 = vpack.c.bf16 %v1406_v44, %v1405_v25  ;;  %v2665_v3 = vsel %vm1787_vm11, %v2664_v50, %v2660_v41  ;;  %v4140_v22 = vpack.c.bf16 %v1390_v37, %v1389_v19  ;;  %v1410_v25 = vld [vmem:[%s6661_s1 + $0x6c8] sm:$0xff]  ;;  %v1437_v41 = vld [vmem:[%s6661_s1 + $0x7a0] sm:$0xff] }
 0x21b   : > { %v2581_v49 = vsel %vm1780_vm10, %v2580_v32, %v2576_v21  ;;  %v2670_v9 = vsel %vm1794_vm12, %v2669_v35, %v2665_v3  ;;  %v4164_v16 = vpack.c.bf16 %v1418_v52, %v1417_v60  ;;  %v4142_v32 = vpack.c.bf16 %v1408_v53, %v1407_v28  ;;  %v1438_v35 = vld [vmem:[%s6661_s1 + $0x7a8] sm:$0xff]  ;;  %v1421_v19 = vld [vmem:[%s6661_s1 + $0x720] sm:$0xff]  ;;  %v1440_v52 = vld [vmem:[%s6661_s1 + $0x7b8] sm:$0xff] }
 0x21c   : > { %v946_v40 = vpop.xlane.xlu1 %945  ;;  %v856_v38 = vpop.xlane.xlu0 %855  ;;  %v2586_v26 = vsel %vm1787_vm11, %v2585_v18, %v2581_v49  ;;  %v4166_v50 = vpack.c.bf16 %v1436_v54, %v1435_v57  ;;  %v1420_v18 = vld [vmem:[%s6661_s1 + $0x718] sm:$0xff]  ;;  %v4170_v49 = vpack.c.bf16 %v1438_v35, %v1437_v41  ;;  %v1423_v57 = vld [vmem:[%s6661_s1 + $0x730] sm:$0xff]  ;;  %v1426_v41 = vld [vmem:[%s6661_s1 + $0x748] sm:$0xff] }
 0x21d   : > { %v2447_v6 = vrot.slane %v856_v38, %v4928_v58  ;;  %v2595_v55 = vrot.slane %v946_v40, %v4902_v31  ;;  %v2591_v24 = vsel %vm1794_vm12, %v2590_v13, %v2586_v26  ;;  %v2675_v40 = vsel %vm1801_vm13, %v2674_v5, %v2670_v9  ;;  %v1439_v26 = vld [vmem:[%s6661_s1 + $0x7b0] sm:$0xff] }
 0x21e   : > { %v4168_v21 = vpack.c.bf16 %v1420_v18, %v1419_v0  ;;  %v1398_v18 = vld [vmem:[%s6661_s1 + $0x668] sm:$0xff]  ;;  %v1415_v35 = vld [vmem:[%s6661_s1 + $0x6f0] sm:$0xff] }
 0x21f   : > { %v2448_v29 = vsel %vm1815_vm15, %v2447_v6, %v2443_v17  ;;  %v2596_v38 = vsel %vm1801_vm13, %v2595_v55, %v2591_v24  ;;  %v1391_v17 = vld [vmem:[%s6661_s1 + $0x630] sm:$0xff]  ;;  %v1393_v55 = vld [vmem:[%s6661_s1 + $0x640] sm:$0xff] }
 0x220   : > { %v949_v47 = vpop.xlane.xlu1 %948  ;;  %3363 = vmatmul.mubr.f32.vlgmr.msra.gmra.mrb[4].mxu0 %v2448_v29  ;;  %v997_v45 = vpop.xlane.xlu0 %996  ;;  %v1409_v29 = vld [vmem:[%s6661_s1 + $0x6c0] sm:$0xff] }
 0x221   : > { %4133 = vmatpush3.bf16.msra.mxu0 %v4132_v61  ;;  %v2600_v14 = vrot.slane %v949_v47, %v4911_v42  ;;  %v2679_v20 = vrot.slane %v997_v45, %v4911_v42  ;;  %v4146_v5 = vpack.c.bf16 %v1410_v25, %v1409_v29  ;;  %v1425_v29 = vld [vmem:[%s6661_s1 + $0x740] sm:$0xff] }
 0x222   : > { %4135 = vmatprep.subr.bf16.mxu0 %v4134_v2  ;;  %v1392_v2 = vld [vmem:[%s6661_s1 + $0x638] sm:$0xff] }
 0x223   : > { %v2601_v6 = vsel %vm1808_vm14, %v2600_v14, %v2596_v38  ;;  %v2680_v61 = vsel %vm1808_vm14, %v2679_v20, %v2675_v40  ;;  %v4144_v45 = vpack.c.bf16 %v1392_v2, %v1391_v17  ;;  %v1422_v14 = vld [vmem:[%s6661_s1 + $0x728] sm:$0xff]  ;;  %v1411_v20 = vld [vmem:[%s6661_s1 + $0x6d0] sm:$0xff]  ;;  %v4174_v40 = vpack.c.bf16 %v1440_v52, %v1439_v26  ;;  %v1424_v38 = vld [vmem:[%s6661_s1 + $0x738] sm:$0xff] }
 0x224   : > { %v952_v39 = vpop.xlane.xlu1 %951  ;;  %v1000_v12 = vpop.xlane.xlu0 %999  ;;  %v4172_v24 = vpack.c.bf16 %v1422_v14, %v1421_v19  ;;  %v4180_v19 = vpack.c.bf16 %v1426_v41, %v1425_v29  ;;  %v1400_v14 = vld [vmem:[%s6661_s1 + $0x678] sm:$0xff] }
 0x225   : > { %v2605_v27 = vrot.slane %v952_v39, %v4928_v58  ;;  %v2684_v56 = vrot.slane %v1000_v12, %v4928_v58  ;;  %4137 = vmatpush3.bf16.msra.mxu0 %v4136_v63  ;;  %v1394_v63 = vld [vmem:[%s6661_s1 + $0x648] sm:$0xff]  ;;  %v1395_v12 = vld [vmem:[%s6661_s1 + $0x650] sm:$0xff] }
 0x226   : > { %4139 = vmatprep.subr.bf16.mxu0 %v4138_v11  ;;  %v1412_v11 = vld [vmem:[%s6661_s1 + $0x6d8] sm:$0xff]  ;;  %v4148_v9 = vpack.c.bf16 %v1394_v63, %v1393_v55 }
 0x227   : > { %v2685_v10 = vsel %vm1815_vm15, %v2684_v56, %v2680_v61  ;;  %v2606_v1 = vsel %vm1815_vm15, %v2605_v27, %v2601_v6  ;;  %v4150_v39 = vpack.c.bf16 %v1412_v11, %v1411_v20  ;;  %v1413_v27 = vld [vmem:[%s6661_s1 + $0x6e0] sm:$0xff]  ;;  %v1414_v56 = vld [vmem:[%s6661_s1 + $0x6e8] sm:$0xff] }
 0x228   : > { %v1054_v44 = vpop.xlane.xlu1 %1053  ;;  %3432 = vmatprep.mubr.f32.mxu1 %v2685_v10  ;;  %v1051_v62 = vpop.xlane.xlu0 %1050  ;;  %v4176_v10 = vpack.c.bf16 %v1424_v38, %v1423_v57  ;;  %v1429_v38 = vld [vmem:[%s6661_s1 + $0x760] sm:$0xff] }
 0x229   : > { %v2772_v13 = vrot.slane %v1054_v44, %v4771_v30  ;;  %v2768_v47 = vrot.slane %v1051_v62, %v4778_v34  ;;  %3433 = vmatmul.mubr.f32.vlgmr.msra.gmra.mrb[4].mxu1 %v2606_v1  ;;  %4141 = vmatpush3.bf16.msra.mxu0 %v4140_v22  ;;  %v1396_v22 = vld [vmem:[%s6661_s1 + $0x658] sm:$0xff]  ;;  %v4154_v1 = vpack.c.bf16 %v1414_v56, %v1413_v27  ;;  %v1430_v27 = vld [vmem:[%s6661_s1 + $0x768] sm:$0xff] }
 0x22a   : > { %4165 = vmatpush3.bf16.msra.mxu1 %v4164_v16  ;;  %4143 = vmatprep.subr.bf16.mxu0 %v4142_v32  ;;  %v1441_v16 = vld [vmem:[%s6661_s1 + $0x7c0] sm:$0xff]  ;;  %v1442_v32 = vld [vmem:[%s6661_s1 + $0x7c8] sm:$0xff]  ;;  %v4152_v0 = vpack.c.bf16 %v1396_v22, %v1395_v12 }
 0x22b   : > { %v2773_v37 = vsel %vm1717_vm1, %v2772_v13, %v2768_v47  ;;  %4167 = vmatprep.subr.bf16.mxu1 %v4166_v50  ;;  %v1397_v50 = vld [vmem:[%s6661_s1 + $0x660] sm:$0xff]  ;;  %v4178_v62 = vpack.c.bf16 %v1442_v32, %v1441_v16  ;;  %v1416_v13 = vld [vmem:[%s6661_s1 + $0x6f8] sm:$0xff] }
 0x22c   : > { %v1006_v60 = vpop.xlane.xlu1 %1005  ;;  %v1003_v3 = vpop.xlane.xlu0 %1002  ;;  %v4156_v63 = vpack.c.bf16 %v1398_v18, %v1397_v50  ;;  %v1448_v16 = vld [vmem:[%s6661_s1 + $0x7f8] sm:$0xff] }
 0x22d   : > { %v2693_v28 = vrot.slane %v1006_v60, %v4771_v30  ;;  %v2689_v53 = vrot.slane %v1003_v3, %v4778_v34  ;;  %4145 = vmatpush3.bf16.msra.mxu0 %v4144_v45  ;;  %v1427_v60 = vld [vmem:[%s6661_s1 + $0x750] sm:$0xff]  ;;  %v1428_v3 = vld [vmem:[%s6661_s1 + $0x758] sm:$0xff] }
 0x22e   : > { %4169 = vmatpush3.bf16.msra.mxu1 %v4168_v21  ;;  %4147 = vmatprep.subr.bf16.mxu0 %v4146_v5  ;;  %v1443_v21 = vld [vmem:[%s6661_s1 + $0x7d0] sm:$0xff]  ;;  %v1444_v5 = vld [vmem:[%s6661_s1 + $0x7d8] sm:$0xff]  ;;  %v4184_v22 = vpack.c.bf16 %v1428_v3, %v1427_v60 }
 0x22f   : > { %v2694_v54 = vsel %vm1717_vm1, %v2693_v28, %v2689_v53  ;;  %4171 = vmatprep.subr.bf16.mxu1 %v4170_v49  ;;  %v1399_v49 = vld [vmem:[%s6661_s1 + $0x670] sm:$0xff]  ;;  %v4182_v11 = vpack.c.bf16 %v1444_v5, %v1443_v21  ;;  %v1445_v28 = vld [vmem:[%s6661_s1 + $0x7e0] sm:$0xff]  ;;  %v1446_v53 = vld [vmem:[%s6661_s1 + $0x7e8] sm:$0xff] }
 0x230   : > { %v1009_v6 = vpop.xlane.xlu1 %1008  ;;  %v1057_v61 = vpop.xlane.xlu0 %1056  ;;  %v4160_v12 = vpack.c.bf16 %v1400_v14, %v1399_v49 }
 0x231   : > { %v2698_v17 = vrot.slane %v1009_v6, %v4792_v43  ;;  %v2777_v2 = vrot.slane %v1057_v61, %v4792_v43  ;;  %4149 = vmatpush3.bf16.msra.mxu0 %v4148_v9  ;;  %v1447_v61 = vld [vmem:[%s6661_s1 + $0x7f0] sm:$0xff] }
 0x232   : > { %4173 = vmatpush3.bf16.msra.mxu1 %v4172_v24  ;;  %4151 = vmatprep.subr.bf16.mxu0 %v4150_v39 }
 0x233   : > { %v2699_v25 = vsel %vm1724_vm2, %v2698_v17, %v2694_v54  ;;  %v2778_v44 = vsel %vm1724_vm2, %v2777_v2, %v2773_v37  ;;  %4175 = vmatprep.subr.bf16.mxu1 %v4174_v40  ;;  %v4158_v37 = vpack.c.bf16 %v1416_v13, %v1415_v35  ;;  %v4186_v40 = vpack.c.bf16 %v1446_v53, %v1445_v28 }
 0x234   : > { %v1147_v47 = vpop.xlane.xlu1 %1146  ;;  %v1060_v45 = vpop.xlane.xlu0 %1059  ;;  %v4188_v17 = vpack.c.bf16 %v1430_v27, %v1429_v38 }
 0x235   : > { %v2782_v55 = vrot.slane %v1060_v45, %v4798_v46  ;;  %4153 = vmatpush3.bf16.msra.mxu0 %v4152_v0  ;;  %v2926_v9 = vrot.slane %v1147_v47, %v4778_v34  ;;  %v4190_v0 = vpack.c.bf16 %v1448_v16, %v1447_v61 }
 0x236   : > { %4177 = vmatpush3.bf16.msra.mxu1 %v4176_v10  ;;  %4155 = vmatprep.subr.bf16.mxu0 %v4154_v1  ;;  %v1431_v10 = vld [vmem:[%s6661_s1 + $0x770] sm:$0xff]  ;;  %v1432_v1 = vld [vmem:[%s6661_s1 + $0x778] sm:$0xff] }
 0x237   : > { %v2783_v20 = vsel %vm1731_vm3, %v2782_v55, %v2778_v44  ;;  %4179 = vmatprep.subr.bf16.mxu1 %v4178_v62  ;;  %v4192_v62 = vpack.c.bf16 %v1432_v1, %v1431_v10 }
 0x238   : > { %v1012_v26 = vpop.xlane.xlu1 %1011  ;;  %v1150_v52 = vpop.xlane.xlu0 %1149 }
 0x239   : > { %v2703_v24 = vrot.slane %v1012_v26, %v4798_v46  ;;  %v2930_v39 = vrot.slane %v1150_v52, %v4771_v30  ;;  %4157 = vmatpush3.bf16.msra.mxu0 %v4156_v63 }
 0x23a   : > { %4181 = vmatpush3.bf16.msra.mxu1 %v4180_v19  ;;  %4159 = vmatprep.subr.bf16.mxu0 %v4158_v37 }
 0x23b   : > { %v2704_v57 = vsel %vm1731_vm3, %v2703_v24, %v2699_v25  ;;  %v2931_v54 = vsel %vm1717_vm1, %v2930_v39, %v2926_v9  ;;  %4183 = vmatprep.subr.bf16.mxu1 %v4182_v11 }
 0x23c   : > { %v1099_v56 = vpop.xlane.xlu1 %1098  ;;  %v1063_v6 = vpop.xlane.xlu0 %1062 }
 0x23d   : > { %v2787_v32 = vrot.slane %v1063_v6, %v4810_v59  ;;  %4161 = vmatpush3.bf16.msra.mxu0 %v4160_v12  ;;  %v2847_v29 = vrot.slane %v1099_v56, %v4778_v34 }
 0x23e   : > { %4185 = vmatpush3.bf16.msra.mxu1 %v4184_v22 }
 0x23f   : > { %v2788_v2 = vsel %vm1738_vm4, %v2787_v32, %v2783_v20  ;;  %4187 = vmatprep.subr.bf16.mxu1 %v4186_v40 }
 0x240   : > { %v1153_v50 = vpop.xlane.xlu1 %1152  ;;  %v1102_v18 = vpop.xlane.xlu0 %1101 }
 0x241   : > { %v2935_v25 = vrot.slane %v1153_v50, %v4792_v43  ;;  %v2851_v44 = vrot.slane %v1102_v18, %v4771_v30 }
 0x242   : > { %4189 = vmatpush3.bf16.msra.mxu1 %v4188_v17 }
 0x243   : > { %v2936_v41 = vsel %vm1724_vm2, %v2935_v25, %v2931_v54  ;;  %v2852_v35 = vsel %vm1717_vm1, %v2851_v44, %v2847_v29  ;;  %4191 = vmatprep.subr.bf16.mxu1 %v4190_v0 }
 0x244   : > { %v1066_v13 = vpop.xlane.xlu1 %1065  ;;  %v1015_v47 = vpop.xlane.xlu0 %1014 }
 0x245   : > { %v2792_v45 = vrot.slane %v1066_v13, %v4821_v8  ;;  %v2708_v21 = vrot.slane %v1015_v47, %v4810_v59 }
 0x246   : > { %4193 = vmatpush3.bf16.msra.mxu1 %v4192_v62 }
 0x247   : > { %v6440_v34 = vsel %vm1745_vm5, %v2792_v45, %v2788_v2  ;;  %v2709_v5 = vsel %vm1738_vm4, %v2708_v21, %v2704_v57 }
 0x248   : > { %v1156_v30 = vpop.xlane.xlu1 %1155  ;;  %v1105_v55 = vpop.xlane.xlu0 %1104 }
 0x249   : > { %v2940_v63 = vrot.slane %v1156_v30, %v4798_v46  ;;  %v2856_v19 = vrot.slane %v1105_v55, %v4792_v43 }
 0x24b   : > { %v2941_v37 = vsel %vm1731_vm3, %v2940_v63, %v2936_v41  ;;  %v2857_v49 = vsel %vm1724_vm2, %v2856_v19, %v2852_v35 }
 0x24c   : > { %v1069_v14 = vpop.xlane.xlu1 %1068  ;;  %v1018_v20 = vpop.xlane.xlu0 %1017 }
 0x24d   : > { %v2713_v11 = vrot.slane %v1018_v20, %v4821_v8 }
 0x24f   : > { %v6449_v60 = vsel %vm1745_vm5, %v2713_v11, %v2709_v5 }
 0x250   : > { %v1159_v3 = vpop.xlane.xlu1 %1158  ;;  %v1108_v26 = vpop.xlane.xlu0 %1107 }
 0x251   : > { %v2945_v52 = vrot.slane %v1159_v3, %v4810_v59  ;;  %v2861_v28 = vrot.slane %v1108_v26, %v4798_v46 }
 0x253   : > { %v2946_v53 = vsel %vm1738_vm4, %v2945_v52, %v2941_v37  ;;  %v2862_v43 = vsel %vm1731_vm3, %v2861_v28, %v2857_v49  ;;  %v2797_v37 = vrot.slane %v1069_v14, %v4830_v15 }
 0x254   : > { %v1072_v9 = vpop.xlane.xlu1 %1071  ;;  %v6455_v24 = vpop.xlane.xlu0 %1020 }
 0x255   : > { %v2802_v49 = vrot.slane %v1072_v9, %v4837_v23  ;;  %v2798_v52 = vsel %vm1752_vm6, %v2797_v37, %v6440_v34 }
 0x258   : > { %v1162_v39 = vpop.xlane.xlu1 %1161  ;;  %v1111_v12 = vpop.xlane.xlu0 %1110 }
 0x259   : > { %v2950_v22 = vrot.slane %v1162_v39, %v4821_v8  ;;  %v2866_v57 = vrot.slane %v1111_v12, %v4810_v59 }
 0x25b   : > { %v6460_v54 = vsel %vm1745_vm5, %v2950_v22, %v2946_v53  ;;  %v6463_v40 = vsel %vm1738_vm4, %v2866_v57, %v2862_v43  ;;  %v2803_v53 = vsel %vm1759_vm7, %v2802_v49, %v2798_v52 }
 0x25c   : > { %v1075_v46 = vpop.xlane.xlu1 %1074  ;;  %v6465_v38 = vpop.xlane.xlu0 %1023 }
 0x25d   : > { %v2807_v20 = vrot.slane %v1075_v46, %v4845_v33 }
 0x25f   : > { %v2808_v39 = vsel %vm1766_vm8, %v2807_v20, %v2803_v53 }
 0x260   : > { %v6467_v27 = vpop.xlane.xlu1 %1164  ;;  %v6469_v56 = vpop.xlane.xlu0 %1113 }
 0x261   : > { %v2871_v49 = vrot.slane %v6469_v56, %v4821_v8 }
 0x264   : > { %v1078_v6 = vpop.xlane.xlu1 %1077  ;;  %v6471_v61 = vpop.xlane.xlu0 %1026 }
 0x265   : > { %v2812_v3 = vrot.slane %v1078_v6, %v4859_v48  ;;  %v2718_v6 = vrot.slane %v6455_v24, %v4830_v15 }
 0x267   : > { %v2813_v12 = vsel %vm1773_vm9, %v2812_v3, %v2808_v39 }
 0x268   : > { %v6473_v16 = vpop.xlane.xlu1 %1167  ;;  %v6475_v32 = vpop.xlane.xlu0 %1116 }
 0x26c   : > { %v1081_v59 = vpop.xlane.xlu1 %1080  ;;  %v6477_v17 = vpop.xlane.xlu0 %1029 }
 0x26d   : > { %v2817_v28 = vrot.slane %v1081_v59, %v4868_v51 }
 0x26f   : > { %v2818_v34 = vsel %vm1780_vm10, %v2817_v28, %v2813_v12 }
 0x270   : > { %v6479_v2 = vpop.xlane.xlu1 %1170  ;;  %v6481_v0 = vpop.xlane.xlu0 %1119 }
 0x273   : > { %v3760_v10 = vpop.f32.mrb[2].mxu0 }
 0x274   : > { %v1084_v1 = vpop.xlane.xlu1 %1083  ;;  %v3761_v50 = vpop.f32.mrb[3].mxu0 }
 0x275   : > { %v3762_v18 = vadd.f32 %v3761_v50, %v3760_v10  ;;  %v6483_v29 = vpop.xlane.xlu0 %1032  ;;  %v2822_v43 = vrot.slane %v1084_v1, %v4879_v4  ;;  %v2723_v10 = vrot.slane %v6465_v38, %v4837_v23  ;;  %v2955_v38 = vrot.slane %v6467_v27, %v4830_v15 }
 0x277   : > { %v3225_v25 = vadd.f32 %v3762_v18, %v6069_v36  ;;  %v2823_v59 = vsel %vm1787_vm11, %v2822_v43, %v2818_v34  ;;  %v2728_v18 = vrot.slane %v6471_v61, %v4845_v33  ;;  %v2956_v56 = vsel %vm1752_vm6, %v2955_v38, %v6460_v54 }
 0x278   : > { %v6486_v44 = vpop.xlane.xlu1 %1173 }
 0x279   : > { %v6488_v62 = vpop.xlane.xlu0 %1122 }
 0x27c   : > { %v1087_v41 = vpop.xlane.xlu1 %1086  ;;  %v3795_v35 = vpop.f32.mrb[2].mxu1 }
 0x27d   : > { %v6490_v13 = vpop.xlane.xlu0 %1035  ;;  %v3796_v47 = vpop.f32.mrb[3].mxu1  ;;  %v2827_v14 = vrot.slane %v1087_v41, %v4884_v7 }
 0x27e   : > { %v3797_v45 = vadd.f32 %v3796_v47, %v3795_v35  ;;  %v2733_v47 = vrot.slane %v6477_v17, %v4859_v48  ;;  %v2960_v17 = vrot.slane %v6473_v16, %v4837_v23  ;;  %v2743_v20 = vrot.slane %v6490_v13, %v4879_v4 }
 0x27f   : > { %v2828_v1 = vsel %vm1794_vm12, %v2827_v14, %v2823_v59  ;;  %v2881_v16 = vrot.slane %v6481_v0, %v4837_v23  ;;  %v2965_v23 = vrot.slane %v6479_v2, %v4845_v33 }
 0x280   : > { %v6492_v21 = vadd.f32 %v3797_v45, %v3225_v25  ;;  %v6494_v5 = vpop.xlane.xlu1 %1176  ;;  %v2719_v45 = vsel %vm1752_vm6, %v2718_v6, %v6449_v60 }
 0x281   : > { %v6496_v30 = vpop.xlane.xlu0 %1125  ;;  %v2724_v37 = vsel %vm1759_vm7, %v2723_v10, %v2719_v45 }
 0x282   : > { %v2729_v27 = vsel %vm1766_vm8, %v2728_v18, %v2724_v37  ;;  %v2891_v0 = vrot.slane %v6496_v30, %v4859_v48 }
 0x283   : > { %v2734_v52 = vsel %vm1773_vm9, %v2733_v47, %v2729_v27 }
 0x284   : > { %v1090_v55 = vpop.xlane.xlu1 %1089 }
 0x285   : > { %v1039_v63 = vpop.xlane.xlu0 %1038  ;;  %v2832_v22 = vrot.slane %v1090_v55, %v4902_v31  ;;  %v2738_v55 = vrot.slane %v6483_v29, %v4868_v51  ;;  %v2876_v29 = vrot.slane %v6475_v32, %v4830_v15  ;;  %v2872_v15 = vsel %vm1745_vm5, %v2871_v49, %v6463_v40 }
 0x286   : > { %v2961_v32 = vsel %vm1759_vm7, %v2960_v17, %v2956_v56  ;;  %v2970_v40 = vrot.slane %v6486_v44, %v4859_v48 }
 0x287   : > { %v2833_v25 = vsel %vm1801_vm13, %v2832_v22, %v2828_v1  ;;  %v2739_v13 = vsel %vm1780_vm10, %v2738_v55, %v2734_v52  ;;  %v2877_v54 = vsel %vm1752_vm6, %v2876_v29, %v2872_v15  ;;  %v2966_v6 = vsel %vm1766_vm8, %v2965_v23, %v2961_v32 }
 0x288   : > { %v6498_v19 = vpop.xlane.xlu1 %1179  ;;  %v2882_v22 = vsel %vm1759_vm7, %v2881_v16, %v2877_v54  ;;  %v2971_v10 = vsel %vm1773_vm9, %v2970_v40, %v2966_v6 }
 0x289   : > { %v6500_v36 = vpop.xlane.xlu0 %1128  ;;  %v2980_v48 = vrot.slane %v6498_v19, %v4879_v4 }
 0x28c   : > { %v1093_v11 = vpop.xlane.xlu1 %1092 }
 0x28d   : > { %v1042_v26 = vpop.xlane.xlu0 %1041  ;;  %v2837_v46 = vrot.slane %v1093_v11, %v4911_v42  ;;  %v2748_v11 = vrot.slane %v1039_v63, %v4884_v7  ;;  %v2886_v63 = vrot.slane %v6488_v62, %v4845_v33  ;;  %v2896_v62 = vrot.slane %v6500_v36, %v4868_v51 }
 0x28e   : > { %v2753_v8 = vrot.slane %v1042_v26, %v4902_v31  ;;  %v2744_v26 = vsel %vm1787_vm11, %v2743_v20, %v2739_v13  ;;  %v2975_v33 = vrot.slane %v6494_v5, %v4868_v51 }
 0x28f   : > { %v2838_v24 = vsel %vm1808_vm14, %v2837_v46, %v2833_v25  ;;  %v2749_v43 = vsel %vm1794_vm12, %v2748_v11, %v2744_v26  ;;  %v2887_v34 = vsel %vm1766_vm8, %v2886_v63, %v2882_v22 }
 0x290   : > { %v6513_v9 = vpop.xlane.xlu1 %1182  ;;  %v2754_v14 = vsel %vm1801_vm13, %v2753_v8, %v2749_v43  ;;  %v2892_v59 = vsel %vm1773_vm9, %v2891_v0, %v2887_v34 }
 0x291   : > { %v6517_v57 = vpop.xlane.xlu0 %1131  ;;  %v2985_v51 = vrot.slane %v6513_v9, %v4884_v7 }
 0x292   : > { %v2901_v2 = vrot.slane %v6517_v57, %v4879_v4  ;;  %v2897_v4 = vsel %vm1780_vm10, %v2896_v62, %v2892_v59 }
 0x294   : > { %v1096_v50 = vpop.xlane.xlu1 %1095  ;;  %v2902_v18 = vsel %vm1787_vm11, %v2901_v2, %v2897_v4 }
 0x295   : > { %v2842_v41 = vrot.slane %v1096_v50, %v4928_v58  ;;  %v1045_v35 = vpop.xlane.xlu0 %1044  ;;  %v2976_v50 = vsel %vm1780_vm10, %v2975_v33, %v2971_v10 }
 0x296   : > { %v2758_v28 = vrot.slane %v1045_v35, %v4911_v42 }
 0x297   : > { %v2843_v61 = vsel %vm1815_vm15, %v2842_v41, %v2838_v24 }
 0x298   : > { %v1186_v60 = vpop.xlane.xlu1 %1185  ;;  %3502 = vmatprep.mubr.f32.mxu0 %v2843_v61  ;;  %v2759_v30 = vsel %vm1808_vm14, %v2758_v28, %v2754_v14 }
 0x299   : > { %v1135_v3 = vpop.xlane.xlu0 %1134  ;;  %v2990_v19 = vrot.slane %v1186_v60, %v4902_v31 }
 0x29a   : > { %v2906_v44 = vrot.slane %v1135_v3, %v4884_v7  ;;  %v2981_v7 = vsel %vm1787_vm11, %v2980_v48, %v2976_v50 }
 0x29b   : > { %v2986_v35 = vsel %vm1794_vm12, %v2985_v51, %v2981_v7 }
 0x29c   : > { %v1138_v53 = vpop.xlane.xlu1 %1137  ;;  %v2907_v9 = vsel %vm1794_vm12, %v2906_v44, %v2902_v18  ;;  %v2991_v45 = vsel %vm1801_vm13, %v2990_v19, %v2986_v35 }
 0x29d   : > { %v1048_v39 = vpop.xlane.xlu0 %1047  ;;  %v2911_v5 = vrot.slane %v1138_v53, %v4902_v31 }
 0x29e   : > { %v2763_v12 = vrot.slane %v1048_v39, %v4928_v58 }
 0x29f   : > { %v2912_v47 = vsel %vm1801_vm13, %v2911_v5, %v2907_v9 }
 0x2a0   : > { %v1141_v36 = vpop.xlane.xlu1 %1140  ;;  %v2764_v46 = vsel %vm1815_vm15, %v2763_v12, %v2759_v30 }
 0x2a1   : > { %3503 = vmatmul.mubr.f32.vlgmr.msra.gmra.mrb[6].mxu0 %v2764_v46  ;;  %v1189_v57 = vpop.xlane.xlu0 %1188  ;;  %v2916_v1 = vrot.slane %v1141_v36, %v4911_v42 }
 0x2a2   : > { %v2995_v25 = vrot.slane %v1189_v57, %v4911_v42 }
 0x2a3   : > { %v2917_v38 = vsel %vm1808_vm14, %v2916_v1, %v2912_v47 }
 0x2a4   : > { %v1144_v41 = vpop.xlane.xlu1 %1143  ;;  %v2996_v42 = vsel %vm1808_vm14, %v2995_v25, %v2991_v45 }
 0x2a5   : > { %v2921_v24 = vrot.slane %v1144_v41, %v4928_v58  ;;  %v1192_v31 = vpop.xlane.xlu0 %1191 }
 0x2a6   : > { %v3000_v55 = vrot.slane %v1192_v31, %v4928_v58 }
 0x2a7   : > { %v2922_v61 = vsel %vm1815_vm15, %v2921_v24, %v2917_v38 }
 0x2a8   : > { %v3001_v37 = vsel %vm1815_vm15, %v3000_v55, %v2996_v42 }
 0x2a9   : > { %3572 = vmatprep.mubr.f32.mxu1 %v3001_v37 }
 0x2aa   : > { %3573 = vmatmul.mubr.f32.vlgmr.msra.gmra.mrb[6].mxu1 %v2922_v61 }
 0x2f3   : > { %v3830_v49 = vpop.f32.mrb[4].mxu0 }
 0x2f4   : > { %v3831_v17 = vpop.f32.mrb[5].mxu0 }
 0x2f5   : > { %v3832_v20 = vadd.f32 %v3831_v17, %v3830_v49 }
 0x2f7   : > { %v3365_v60 = vadd.f32 %v3832_v20, %v6492_v21 }
 0x2fc   : > { %v3865_v27 = vpop.f32.mrb[4].mxu1 }
 0x2fd   : > { %v3866_v29 = vpop.f32.mrb[5].mxu1 }
 0x2fe   : > { %v3867_v11 = vadd.f32 %v3866_v29, %v3865_v27 }
 0x300   : > { %v3435_v3 = vadd.f32 %v3867_v11, %v3365_v60 }
 0x374   : > { %v3900_v58 = vpop.f32.mrb[6].mxu0 }
 0x375   : > { %v3901_v52 = vpop.f32.mrb[7].mxu0 }
 0x376   : > { %v3902_v8 = vadd.f32 %v3901_v52, %v3900_v58 }
 0x378   : > { %v3505_v56 = vadd.f32 %v3902_v8, %v3435_v3 }
 0x37d   : > { %v3935_v16 = vpop.f32.mrb[6].mxu1 }
 0x37e   : > { %v3936_v13 = vpop.f32.mrb[7].mxu1 }
 0x37f   : > { %v3937_v28 = vadd.f32 %v3936_v13, %v3935_v16 }
 0x381   : > { %v3575_v15 = vadd.f32 %v3937_v28, %v3505_v56 }
 0x383   : > { %3579 = vst.msk [vmem:[%s162_s27] sm:$0x1] %vm3578_vm0, %v3575_v15 }
 0x384   : > { %4246 = shalt.err (!%p4243_p3)
}
 0x385   : > { %s4247_s9 = scalar_lea.hbm %s6618_s28, 16  ;;  %s4251_s17 = scalar_lea.hbm %s6663_s3, 32 }
 0x386   : > { %p4248_p4 = scmp.ne.s32.totalorder %s6618_s28, %s4247_s9  ;;  %p4252_p9 = scmp.lt.u32.totalorder %s6618_s28, %s6663_s3 }
 0x387   : > { %p4253_p10 = scmp.lt.u32.totalorder %s4251_s17, %s4247_s9  ;;  %p4255_p12 = scmp.lt.u32.totalorder %s4247_s9, %s6618_s28 }
 0x388   : > { %p4249_p7 = pnand %p4248_p4, %p4356_p5 }
 0x389   : > { %p4254_p11 = por %p4253_p10, %p4252_p9 }
 0x38a   : > { %p4250_p8 = pneg %p4249_p7 }
 0x38b   : > { %p4256_p13 = por %p4255_p12, %p4254_p11 }
 0x38d   : > { %p4257_p0 = pnand %p4256_p13, %p4250_p8 }
 0x38f   : > { %4260 = shalt.err (!%p4257_p0)
}
 0x390   : > { %4194 = dma.vmem_to_hbm [thread:$0]  (%p4356_p5), %s6620_s29, 16, %s6618_s28, %s3581_s5  }
 0x391 PF: > { %p4200_p1 = scmp.ge.s32.totalorder %s4295_s15, 2  ;;  %s3605_s24 = sand.u32 1, %s4283_s12  }
 0x392   : > { %s3606_s25 = scalar_lea.sflag [#allocation3], %s3605_s24 }
 0x393   : > { %p4197_p2 = pnand %p4200_p1, %p4360_p6 }
 0x395   : > { %4278 = dma.done.wait (!%p4197_p2), %s3606_s25, 16  }
 0x396   : > { %4280 = vsyncadd (!%p4197_p2), %s3606_s25, 4294967280  ;;  %p13_p3 = scmp.ge.s32.totalorder %s4343_s18, 4   ;;  %s6666_s12 = smov %s4287_s13 }
 0x397   : > { %s6667_s13 = smov %s4291_s14  ;;  %s6668_s14 = smov %s4354_s21 }
 0x398   : > { %s6669_s15 = smov %s4343_s18  ;;  %15 = sbr.rel (!%p13_p3) target bundleno = 3 (0x3), region = 67 }
 0x39f   :  { %3610 = vsyncpa [#allocation3], 1 }
 0x3a0   :  { %3612 = vsyncpa [#allocation3 + $0x1], 1 }

</bundles_post_ra>
